<compile_context>
chip_gen: v7x
topology: tpu7x:2x2x1
jax: 0.10.0
libtpu: 0.0.40
codegen_flags: <defaults>
</compile_context>

<pallas_src>
import jax
import jax.numpy as jnp
from jax.experimental import pallas as pl
from jax.experimental.pallas import tpu as pltpu


# MXU operand dtype.  bf16 is native on v5e/v6e/v7x (f32 matmuls cost ~2-3x
# the MXU cycles and 2x the DMA bytes).  Accumulation is always f32 and the
# hidden-state carry / gate nonlinearities stay f32, so this only quantizes
# the matmul inputs.  Set to jnp.float32 for exact parity with the fp32
# PyTorch reference.
MATMUL_DTYPE = jnp.bfloat16

# Upper bound on time steps processed per grid iteration.  16 amortizes the
# ~0.35us per-grid-step overhead while keeping the unrolled inner loop and
# VMEM footprint modest on v7x (64 MiB).  On v6e (128 MiB) this can be raised
# to 32-64.
_TIME_CHUNK_CAP = 16

_MIB = 1024 * 1024
_VMEM_BUDGET_BYTES = 24 * _MIB      # budget used when sizing the time chunk
_VMEM_LIMIT_CAP_BYTES = 48 * _MIB   # < 64 MiB so it is valid on v7x


# --------------------------------------------------------------------------
# VMEM sizing helpers
# --------------------------------------------------------------------------
def _vmem_estimate_bytes(tc, B, D, H):
    """Rough per-kernel VMEM footprint for a time chunk of `tc` steps."""
    H3 = 3 * H
    f32 = 4
    mm = jnp.dtype(MATMUL_DTYPE).itemsize
    x_blocks = 2 * 2 * tc * B * D * f32      # fwd + bwd x views, double-buffered
    out_blocks = 2 * 2 * tc * B * H * f32    # two outputs, double-buffered
    gx_scratch = 2 * tc * B * H3 * f32       # single-buffered scratch
    weights = 2 * 2 * (D * H3 + H * H3) * mm  # invariant, but double-buffered
    biases = 2 * 2 * (H3 + B * H3) * f32 + 2 * 2 * D * f32
    carry = 2 * B * H * f32
    return x_blocks + out_blocks + gx_scratch + weights + biases + carry


def _choose_time_chunk(T, B, D, H):
    """Largest chunk <= cap fitting the VMEM budget.  Prefer an exact divisor
    of T (no padding); if the best divisor is pathologically small (prime /
    odd T), pad the time axis instead of collapsing to t_chunk=1."""
    tc = max(1, min(_TIME_CHUNK_CAP, T))
    while tc > 1 and _vmem_estimate_bytes(tc, B, D, H) > _VMEM_BUDGET_BYTES:
        tc -= 1
    div = 1
    for d in range(tc, 0, -1):
        if T % d == 0:
            div = d
            break
    if 2 * div >= tc:                 # exact divisor close to the cap
        return div, T
    t_pad = -(-T // tc) * tc          # pad instead of shrinking the chunk
    return tc, t_pad


# --------------------------------------------------------------------------
# Fused kernel: LayerNorm + exact GELU + input projection + bidirectional GRU.
# Grid iterates sequentially over chunks of Tc time steps; both directions are
# processed per chunk (forward reads chunk c, backward reads chunk nc-1-c and
# walks it in reverse).  Hidden states live in one (2, B, H) VMEM scratch that
# persists across grid steps.
# --------------------------------------------------------------------------
def _make_bigru_kernel(n_pad):
    """`n_pad` (static) = number of zero-padded time steps at the end of the
    time-major input.  The backward direction must skip them so its state
    entering the last *real* step is the initial (zero) state."""

    def kernel(xf_ref, xb_ref, gamma_ref, beta_ref,
               wih_f_ref, wih_b_ref, bih_f_ref, bih_b_ref,
               whh_f_ref, whh_b_ref, bhh_f_ref, bhh_b_ref,
               of_ref, ob_ref,
               gxf_ref, gxb_ref, h_ref):
        c = pl.program_id(0)
        Tc, B, D = xf_ref.shape
        H = h_ref.shape[-1]

        @pl.when(c == 0)
        def _():
            h_ref[...] = jnp.zeros_like(h_ref)

        gamma = gamma_ref[...]
        beta = beta_ref[...]

        # ---- time-parallel phase: LayerNorm + exact (erf) GELU + input
        # projection, one big bf16 MXU matmul per direction, b_ih folded in.
        # gx stays in VMEM scratch (no HBM round trip).
        def project(x_ref, wih_ref, bih_ref, gx_ref):
            x = x_ref[...].astype(jnp.float32)                   # (Tc, B, D)
            mean = jnp.mean(x, axis=-1, keepdims=True)
            var = jnp.mean(jnp.square(x - mean), axis=-1, keepdims=True)
            xn = (x - mean) * jax.lax.rsqrt(var + 1e-5)
            y = xn * gamma + beta
            g = 0.5 * y * (1.0 + jax.lax.erf(y * 0.7071067811865475))
            g2 = g.reshape(Tc * B, D).astype(MATMUL_DTYPE)
            gx = jnp.dot(g2, wih_ref[...],
                         preferred_element_type=jnp.float32) + bih_ref[...]
            gx_ref[...] = gx.reshape(gx_ref.shape)

        project(xf_ref, wih_f_ref, bih_f_ref, gxf_ref)
        project(xb_ref, wih_b_ref, bih_b_ref, gxb_ref)

        # ---- serial phase: the unavoidable h @ W_hh recurrence, both
        # directions fused per step; time-invariant loads hoisted.
        whh_f = whh_f_ref[...]          # (H, 3H) bf16
        whh_b = whh_b_ref[...]
        bhh_f = bhh_f_ref[...]          # (B, 3H) f32, pre-broadcast in wrapper
        bhh_b = bhh_b_ref[...]

        def step(i, carry):
            h_f = h_ref[0]                         # (B, H) f32 carry
            h_b = h_ref[1]
            gx_f = gxf_ref[i]                      # (B, 3H)
            gx_b = gxb_ref[Tc - 1 - i]             # reversed within the chunk

            gh_f = jnp.dot(h_f.astype(MATMUL_DTYPE), whh_f,
                           preferred_element_type=jnp.float32) + bhh_f
            gh_b = jnp.dot(h_b.astype(MATMUL_DTYPE), whh_b,
                           preferred_element_type=jnp.float32) + bhh_b

            # PyTorch gate order (r, z, n); b_hh_n stays inside r * (.).
            # TODO(synk): for large H with H % 128 != 0, pad each gate block
            # to a 128-lane multiple so these slices are lane-aligned.
            r_f = jax.nn.sigmoid(gx_f[:, :H] + gh_f[:, :H])
            z_f = jax.nn.sigmoid(gx_f[:, H:2 * H] + gh_f[:, H:2 * H])
            n_f = jnp.tanh(gx_f[:, 2 * H:] + r_f * gh_f[:, 2 * H:])
            hf_new = (1.0 - z_f) * n_f + z_f * h_f

            r_b = jax.nn.sigmoid(gx_b[:, :H] + gh_b[:, :H])
            z_b = jax.nn.sigmoid(gx_b[:, H:2 * H] + gh_b[:, H:2 * H])
            n_b = jnp.tanh(gx_b[:, 2 * H:] + r_b * gh_b[:, 2 * H:])
            hb_new = (1.0 - z_b) * n_b + z_b * h_b

            if n_pad:
                # The first n_pad backward steps (global step c*Tc + i) lie in
                # the zero-padded sequence tail: keep h_b unchanged there.
                in_pad = (c * Tc + i) < n_pad
                hb_new = jnp.where(in_pad, h_b, hb_new)

            h_ref[0] = hf_new
            h_ref[1] = hb_new
            of_ref[i] = hf_new
            ob_ref[Tc - 1 - i] = hb_new
            return carry

        jax.lax.fori_loop(0, Tc, step, 0, unroll=True)

    return kernel


def _bigru_fused(x_tbd, gamma, beta, wih_f, wih_b, bih_f, bih_b,
                 whh_f, whh_b, bhh_f, bhh_b, *, t_chunk, n_pad,
                 vmem_limit_bytes):
    T, B, D = x_tbd.shape            # T is already padded to a chunk multiple
    H3 = wih_f.shape[1]
    H = H3 // 3
    nc = T // t_chunk

    kernel = _make_bigru_kernel(n_pad)
    const = lambda c: (0, 0)

    # TODO(synk): on v7x (2 TensorCores) a leading "parallel" direction grid
    # axis (weights stacked per direction) would roughly halve the serial
    # recurrence wall-clock; kept single-pass here since it only adds grid
    # overhead on single-core v5e/v6e.
    return pl.pallas_call(
        kernel,
        out_shape=(jax.ShapeDtypeStruct((T, B, H), jnp.float32),
                   jax.ShapeDtypeStruct((T, B, H), jnp.float32)),
        grid=(nc,),
        in_specs=[
            pl.BlockSpec((t_chunk, B, D), lambda c: (c, 0, 0)),           # x fwd
            pl.BlockSpec((t_chunk, B, D), lambda c: (nc - 1 - c, 0, 0)),  # x bwd
            pl.BlockSpec((1, D), const),                                  # gamma
            pl.BlockSpec((1, D), const),                                  # beta
            pl.BlockSpec((D, H3), const),                                 # W_ih fwd
            pl.BlockSpec((D, H3), const),                                 # W_ih bwd
            pl.BlockSpec((1, H3), const),                                 # b_ih fwd
            pl.BlockSpec((1, H3), const),                                 # b_ih bwd
            pl.BlockSpec((H, H3), const),                                 # W_hh fwd
            pl.BlockSpec((H, H3), const),                                 # W_hh bwd
            pl.BlockSpec((B, H3), const),                                 # b_hh fwd
            pl.BlockSpec((B, H3), const),                                 # b_hh bwd
        ],
        out_specs=(pl.BlockSpec((t_chunk, B, H), lambda c: (c, 0, 0)),
                   pl.BlockSpec((t_chunk, B, H), lambda c: (nc - 1 - c, 0, 0))),
        scratch_shapes=[
            pltpu.VMEM((t_chunk, B, H3), jnp.float32),   # gx forward chunk
            pltpu.VMEM((t_chunk, B, H3), jnp.float32),   # gx backward chunk
            pltpu.VMEM((2, B, H), jnp.float32),          # hidden-state carry
        ],
        compiler_params=pltpu.CompilerParams(
            dimension_semantics=("arbitrary",),
            vmem_limit_bytes=vmem_limit_bytes),
    )(x_tbd, x_tbd, gamma, beta, wih_f, wih_b, bih_f, bih_b,
      whh_f, whh_b, bhh_f, bhh_b)


# --------------------------------------------------------------------------
# Module wrapper
# --------------------------------------------------------------------------
def init_params(key, rnn_dim, hidden_size):
    """Deterministic init matching the PyTorch module's parameter shapes."""
    k = 1.0 / jnp.sqrt(hidden_size)
    keys = jax.random.split(key, 8)

    def u(kk, shape):
        return jax.random.uniform(kk, shape, jnp.float32, minval=-k, maxval=k)

    return {
        # LayerNorm(rnn_dim)
        "ln_gamma": jnp.ones((1, rnn_dim), jnp.float32),
        "ln_beta": jnp.zeros((1, rnn_dim), jnp.float32),
        # forward direction (PyTorch weight_ih_l0: (3H, D); stored transposed)
        "w_ih_f": u(keys[0], (rnn_dim, 3 * hidden_size)),
        "w_hh_f": u(keys[1], (hidden_size, 3 * hidden_size)),
        "b_ih_f": u(keys[2], (1, 3 * hidden_size)),
        "b_hh_f": u(keys[3], (1, 3 * hidden_size)),
        # reverse direction
        "w_ih_b": u(keys[4], (rnn_dim, 3 * hidden_size)),
        "w_hh_b": u(keys[5], (hidden_size, 3 * hidden_size)),
        "b_ih_b": u(keys[6], (1, 3 * hidden_size)),
        "b_hh_b": u(keys[7], (1, 3 * hidden_size)),
    }


@jax.jit
def bidirectional_gru_forward(params, x):
    """x: (B, T, rnn_dim) -> (B, T, 2*hidden_size).  Eval-mode forward."""
    B, T, D = x.shape
    H = params["w_hh_f"].shape[0]

    # Time-major inside the kernel.
    # TODO(synk): reading x natively as (B, T, D) blocks would drop this XLA
    # transpose pass but needs an in-kernel (B,Tc)->(Tc,B) relayout per chunk.
    x_tbd = jnp.transpose(x, (1, 0, 2)).astype(jnp.float32)      # (T, B, D)

    # Pad tiny batches up to 8 sublanes (full vreg rows / MXU rows).
    B_pad = 8 if B < 8 else B

    t_chunk, T_pad = _choose_time_chunk(T, B_pad, D, H)
    n_pad_t = T_pad - T

    if n_pad_t or B_pad != B:
        x_tbd = jnp.pad(x_tbd, ((0, n_pad_t), (0, B_pad - B), (0, 0)))

    est = _vmem_estimate_bytes(t_chunk, B_pad, D, H)
    vmem_limit = int(min(_VMEM_LIMIT_CAP_BYTES, max(16 * _MIB, est + 16 * _MIB)))

    # Pre-broadcast b_hh so no per-step broadcast happens inside the loop.
    bhh_f = jnp.broadcast_to(params["b_hh_f"], (B_pad, 3 * H))
    bhh_b = jnp.broadcast_to(params["b_hh_b"], (B_pad, 3 * H))

    h_f, h_b = _bigru_fused(
        x_tbd, params["ln_gamma"], params["ln_beta"],
        params["w_ih_f"].astype(MATMUL_DTYPE),
        params["w_ih_b"].astype(MATMUL_DTYPE),
        params["b_ih_f"], params["b_ih_b"],
        params["w_hh_f"].astype(MATMUL_DTYPE),
        params["w_hh_b"].astype(MATMUL_DTYPE),
        bhh_f, bhh_b,
        t_chunk=t_chunk, n_pad=n_pad_t, vmem_limit_bytes=vmem_limit)

    # Pad slice + direction concat + transpose back to batch-first: one fused
    # XLA copy pass.
    out_tbd = jnp.concatenate([h_f[:T, :B], h_b[:T, :B]], axis=-1)  # (T, B, 2H)
    # TODO(synk): nn.Dropout is identity in eval mode; training-mode RNG
    # dropout is not applied here.
    return jnp.transpose(out_tbd, (1, 0, 2))                       # (B, T, 2H)


if __name__ == "__main__":
    B, T, RNN_DIM, HIDDEN = 2, 8, 64, 32

    key = jax.random.PRNGKey(0)
    k_x, k_p = jax.random.split(key)
    x = jax.random.normal(k_x, (B, T, RNN_DIM), dtype=jnp.float32)
    params = init_params(k_p, RNN_DIM, HIDDEN)

    out = bidirectional_gru_forward(params, x)
    jax.block_until_ready(out)

    assert out.shape == (B, T, 2 * HIDDEN), out.shape
    assert bool(jnp.all(jnp.isfinite(out)))
    print("KERNEL_OK")
</pallas_src>

<mosaic_0001>
module attributes {stable_mosaic.version = 11 : i64} {
  func.func @kernel(%arg0: i32, %arg1: memref<8x8x64xf32, #tpu.memory_space<vmem>>, %arg2: memref<8x8x64xf32, #tpu.memory_space<vmem>>, %arg3: memref<1x64xf32, #tpu.memory_space<vmem>>, %arg4: memref<1x64xf32, #tpu.memory_space<vmem>>, %arg5: memref<64x96xbf16, #tpu.memory_space<vmem>>, %arg6: memref<64x96xbf16, #tpu.memory_space<vmem>>, %arg7: memref<1x96xf32, #tpu.memory_space<vmem>>, %arg8: memref<1x96xf32, #tpu.memory_space<vmem>>, %arg9: memref<32x96xbf16, #tpu.memory_space<vmem>>, %arg10: memref<32x96xbf16, #tpu.memory_space<vmem>>, %arg11: memref<8x96xf32, #tpu.memory_space<vmem>>, %arg12: memref<8x96xf32, #tpu.memory_space<vmem>>, %arg13: memref<8x8x32xf32, #tpu.memory_space<vmem>>, %arg14: memref<8x8x32xf32, #tpu.memory_space<vmem>>, %arg15: memref<8x8x96xf32, #tpu.memory_space<vmem>>, %arg16: memref<8x8x96xf32, #tpu.memory_space<vmem>>, %arg17: memref<2x8x32xf32, #tpu.memory_space<vmem>>) attributes {dimension_semantics = [#tpu.dimension_semantics<arbitrary>], iteration_bounds = array<i64: 1>, scalar_prefetch = 0 : i64, scratch_operands = 3 : i64, tpu.core_type = #tpu.core_type<tc>, window_params = [{transform_indices = @transform_0, window_bounds = array<i64: 8, 8, 64>}, {transform_indices = @transform_1, window_bounds = array<i64: 8, 8, 64>}, {pipeline_mode = #tpu.pipeline_mode<synchronous>, transform_indices = @transform_2, window_bounds = array<i64: 1, 64>}, {pipeline_mode = #tpu.pipeline_mode<synchronous>, transform_indices = @transform_3, window_bounds = array<i64: 1, 64>}, {pipeline_mode = #tpu.pipeline_mode<synchronous>, transform_indices = @transform_4, window_bounds = array<i64: 64, 96>}, {pipeline_mode = #tpu.pipeline_mode<synchronous>, transform_indices = @transform_5, window_bounds = array<i64: 64, 96>}, {pipeline_mode = #tpu.pipeline_mode<synchronous>, transform_indices = @transform_6, window_bounds = array<i64: 1, 96>}, {pipeline_mode = #tpu.pipeline_mode<synchronous>, transform_indices = @transform_7, window_bounds = array<i64: 1, 96>}, {pipeline_mode = #tpu.pipeline_mode<synchronous>, transform_indices = @transform_8, window_bounds = array<i64: 32, 96>}, {pipeline_mode = #tpu.pipeline_mode<synchronous>, transform_indices = @transform_9, window_bounds = array<i64: 32, 96>}, {pipeline_mode = #tpu.pipeline_mode<synchronous>, transform_indices = @transform_10, window_bounds = array<i64: 8, 96>}, {pipeline_mode = #tpu.pipeline_mode<synchronous>, transform_indices = @transform_11, window_bounds = array<i64: 8, 96>}, {transform_indices = @transform_12, window_bounds = array<i64: 8, 8, 32>}, {transform_indices = @transform_13, window_bounds = array<i64: 8, 8, 32>}]} {
    %c0_i32 = arith.constant 0 : i32
    %0 = arith.cmpi eq, %arg0, %c0_i32 : i32
    %1 = arith.extui %0 : i1 to i32
    %c0_i32_0 = arith.constant 0 : i32
    %2 = arith.cmpi ne, %1, %c0_i32_0 : i32
    scf.if %2 {
      %cst_289 = arith.constant 0.000000e+00 : f32
      %765 = vector.broadcast %cst_289 : f32 to vector<2x8x32xf32>
      %c0_290 = arith.constant 0 : index
      %c0_291 = arith.constant 0 : index
      %c0_292 = arith.constant 0 : index
      %766 = vector.load %arg17[%c0_290, %c0_291, %c0_292] : memref<2x8x32xf32, #tpu.memory_space<vmem>>, vector<2x8x32xf32>
      tpu.vector_store %arg17[%c0_290, %c0_291, %c0_292], %765 {strides = array<i32>} : memref<2x8x32xf32, #tpu.memory_space<vmem>>, vector<2x8x32xf32>,
    } else {
    }
    %c0 = arith.constant 0 : index
    %c0_1 = arith.constant 0 : index
    %3 = vector.load %arg3[%c0, %c0_1] : memref<1x64xf32, #tpu.memory_space<vmem>>, vector<1x64xf32>
    %c0_2 = arith.constant 0 : index
    %c0_3 = arith.constant 0 : index
    %4 = vector.load %arg4[%c0_2, %c0_3] : memref<1x64xf32, #tpu.memory_space<vmem>>, vector<1x64xf32>
    %c0_4 = arith.constant 0 : index
    %c0_5 = arith.constant 0 : index
    %c0_6 = arith.constant 0 : index
    %5 = vector.load %arg1[%c0_4, %c0_5, %c0_6] : memref<8x8x64xf32, #tpu.memory_space<vmem>>, vector<8x8x64xf32>
    %cst = arith.constant dense<0.000000e+00> : vector<8x8xf32>
    %6 = vector.multi_reduction <add>, %5, %cst [2] : vector<8x8x64xf32> to vector<8x8xf32>
    %7 = vector.shape_cast %6 : vector<8x8xf32> to vector<8x8x1xf32>
    %cst_7 = arith.constant 6.400000e+01 : f32
    %8 = vector.broadcast %cst_7 : f32 to vector<8x8x1xf32>
    %9 = arith.divf %7, %8 : vector<8x8x1xf32>
    %10 = vector.broadcast %9 : vector<8x8x1xf32> to vector<8x8x64xf32>
    %11 = arith.subf %5, %10 : vector<8x8x64xf32>
    %12 = arith.mulf %11, %11 : vector<8x8x64xf32>
    %cst_8 = arith.constant dense<0.000000e+00> : vector<8x8xf32>
    %13 = vector.multi_reduction <add>, %12, %cst_8 [2] : vector<8x8x64xf32> to vector<8x8xf32>
    %14 = vector.shape_cast %13 : vector<8x8xf32> to vector<8x8x1xf32>
    %cst_9 = arith.constant 6.400000e+01 : f32
    %15 = vector.broadcast %cst_9 : f32 to vector<8x8x1xf32>
    %16 = arith.divf %14, %15 : vector<8x8x1xf32>
    %17 = vector.broadcast %9 : vector<8x8x1xf32> to vector<8x8x64xf32>
    %18 = arith.subf %5, %17 : vector<8x8x64xf32>
    %cst_10 = arith.constant 9.99999974E-6 : f32
    %19 = vector.broadcast %cst_10 : f32 to vector<8x8x1xf32>
    %20 = arith.addf %16, %19 : vector<8x8x1xf32>
    %21 = math.rsqrt %20 : vector<8x8x1xf32>
    %22 = vector.broadcast %21 : vector<8x8x1xf32> to vector<8x8x64xf32>
    %23 = arith.mulf %18, %22 : vector<8x8x64xf32>
    %24 = vector.shape_cast %3 : vector<1x64xf32> to vector<1x1x64xf32>
    %25 = vector.broadcast %24 : vector<1x1x64xf32> to vector<8x8x64xf32>
    %26 = arith.mulf %23, %25 : vector<8x8x64xf32>
    %27 = vector.shape_cast %4 : vector<1x64xf32> to vector<1x1x64xf32>
    %28 = vector.broadcast %27 : vector<1x1x64xf32> to vector<8x8x64xf32>
    %29 = arith.addf %26, %28 : vector<8x8x64xf32>
    %cst_11 = arith.constant 5.000000e-01 : f32
    %30 = vector.broadcast %cst_11 : f32 to vector<8x8x64xf32>
    %31 = arith.mulf %30, %29 : vector<8x8x64xf32>
    %cst_12 = arith.constant 0.707106769 : f32
    %32 = vector.broadcast %cst_12 : f32 to vector<8x8x64xf32>
    %33 = arith.mulf %29, %32 : vector<8x8x64xf32>
    %34 = math.erf %33 : vector<8x8x64xf32>
    %cst_13 = arith.constant 1.000000e+00 : f32
    %35 = vector.broadcast %cst_13 : f32 to vector<8x8x64xf32>
    %36 = arith.addf %35, %34 : vector<8x8x64xf32>
    %37 = arith.mulf %31, %36 : vector<8x8x64xf32>
    %38 = vector.shape_cast %37 : vector<8x8x64xf32> to vector<64x64xf32>
    %39 = arith.truncf %38 : vector<64x64xf32> to vector<64x64xbf16>
    %c0_14 = arith.constant 0 : index
    %c0_15 = arith.constant 0 : index
    %40 = vector.load %arg5[%c0_14, %c0_15] : memref<64x96xbf16, #tpu.memory_space<vmem>>, vector<64x96xbf16>
    %cst_16 = arith.constant dense<0.000000e+00> : vector<64x96xf32>
    %41 = tpu.matmul %39, %40, %cst_16 {dimension_numbers = #tpu.dot_dimension_numbers<[1], [0], [0], [1], [0, 0, 1, 1], [], []>} : vector<64x64xbf16>, vector<64x96xbf16>, vector<64x96xf32> -> vector<64x96xf32>
    %c0_17 = arith.constant 0 : index
    %c0_18 = arith.constant 0 : index
    %42 = vector.load %arg7[%c0_17, %c0_18] : memref<1x96xf32, #tpu.memory_space<vmem>>, vector<1x96xf32>
    %43 = vector.broadcast %42 : vector<1x96xf32> to vector<64x96xf32>
    %44 = arith.addf %41, %43 : vector<64x96xf32>
    %45 = vector.shape_cast %44 : vector<64x96xf32> to vector<8x8x96xf32>
    %c0_19 = arith.constant 0 : index
    %c0_20 = arith.constant 0 : index
    %c0_21 = arith.constant 0 : index
    %46 = vector.load %arg15[%c0_19, %c0_20, %c0_21] : memref<8x8x96xf32, #tpu.memory_space<vmem>>, vector<8x8x96xf32>
    tpu.vector_store %arg15[%c0_19, %c0_20, %c0_21], %45 {strides = array<i32>} : memref<8x8x96xf32, #tpu.memory_space<vmem>>, vector<8x8x96xf32>,
    %c0_22 = arith.constant 0 : index
    %c0_23 = arith.constant 0 : index
    %c0_24 = arith.constant 0 : index
    %47 = vector.load %arg2[%c0_22, %c0_23, %c0_24] : memref<8x8x64xf32, #tpu.memory_space<vmem>>, vector<8x8x64xf32>
    %cst_25 = arith.constant dense<0.000000e+00> : vector<8x8xf32>
    %48 = vector.multi_reduction <add>, %47, %cst_25 [2] : vector<8x8x64xf32> to vector<8x8xf32>
    %49 = vector.shape_cast %48 : vector<8x8xf32> to vector<8x8x1xf32>
    %cst_26 = arith.constant 6.400000e+01 : f32
    %50 = vector.broadcast %cst_26 : f32 to vector<8x8x1xf32>
    %51 = arith.divf %49, %50 : vector<8x8x1xf32>
    %52 = vector.broadcast %51 : vector<8x8x1xf32> to vector<8x8x64xf32>
    %53 = arith.subf %47, %52 : vector<8x8x64xf32>
    %54 = arith.mulf %53, %53 : vector<8x8x64xf32>
    %cst_27 = arith.constant dense<0.000000e+00> : vector<8x8xf32>
    %55 = vector.multi_reduction <add>, %54, %cst_27 [2] : vector<8x8x64xf32> to vector<8x8xf32>
    %56 = vector.shape_cast %55 : vector<8x8xf32> to vector<8x8x1xf32>
    %cst_28 = arith.constant 6.400000e+01 : f32
    %57 = vector.broadcast %cst_28 : f32 to vector<8x8x1xf32>
    %58 = arith.divf %56, %57 : vector<8x8x1xf32>
    %59 = vector.broadcast %51 : vector<8x8x1xf32> to vector<8x8x64xf32>
    %60 = arith.subf %47, %59 : vector<8x8x64xf32>
    %cst_29 = arith.constant 9.99999974E-6 : f32
    %61 = vector.broadcast %cst_29 : f32 to vector<8x8x1xf32>
    %62 = arith.addf %58, %61 : vector<8x8x1xf32>
    %63 = math.rsqrt %62 : vector<8x8x1xf32>
    %64 = vector.broadcast %63 : vector<8x8x1xf32> to vector<8x8x64xf32>
    %65 = arith.mulf %60, %64 : vector<8x8x64xf32>
    %66 = vector.shape_cast %3 : vector<1x64xf32> to vector<1x1x64xf32>
    %67 = vector.broadcast %66 : vector<1x1x64xf32> to vector<8x8x64xf32>
    %68 = arith.mulf %65, %67 : vector<8x8x64xf32>
    %69 = vector.shape_cast %4 : vector<1x64xf32> to vector<1x1x64xf32>
    %70 = vector.broadcast %69 : vector<1x1x64xf32> to vector<8x8x64xf32>
    %71 = arith.addf %68, %70 : vector<8x8x64xf32>
    %cst_30 = arith.constant 5.000000e-01 : f32
    %72 = vector.broadcast %cst_30 : f32 to vector<8x8x64xf32>
    %73 = arith.mulf %72, %71 : vector<8x8x64xf32>
    %cst_31 = arith.constant 0.707106769 : f32
    %74 = vector.broadcast %cst_31 : f32 to vector<8x8x64xf32>
    %75 = arith.mulf %71, %74 : vector<8x8x64xf32>
    %76 = math.erf %75 : vector<8x8x64xf32>
    %cst_32 = arith.constant 1.000000e+00 : f32
    %77 = vector.broadcast %cst_32 : f32 to vector<8x8x64xf32>
    %78 = arith.addf %77, %76 : vector<8x8x64xf32>
    %79 = arith.mulf %73, %78 : vector<8x8x64xf32>
    %80 = vector.shape_cast %79 : vector<8x8x64xf32> to vector<64x64xf32>
    %81 = arith.truncf %80 : vector<64x64xf32> to vector<64x64xbf16>
    %c0_33 = arith.constant 0 : index
    %c0_34 = arith.constant 0 : index
    %82 = vector.load %arg6[%c0_33, %c0_34] : memref<64x96xbf16, #tpu.memory_space<vmem>>, vector<64x96xbf16>
    %cst_35 = arith.constant dense<0.000000e+00> : vector<64x96xf32>
    %83 = tpu.matmul %81, %82, %cst_35 {dimension_numbers = #tpu.dot_dimension_numbers<[1], [0], [0], [1], [0, 0, 1, 1], [], []>} : vector<64x64xbf16>, vector<64x96xbf16>, vector<64x96xf32> -> vector<64x96xf32>
    %c0_36 = arith.constant 0 : index
    %c0_37 = arith.constant 0 : index
    %84 = vector.load %arg8[%c0_36, %c0_37] : memref<1x96xf32, #tpu.memory_space<vmem>>, vector<1x96xf32>
    %85 = vector.broadcast %84 : vector<1x96xf32> to vector<64x96xf32>
    %86 = arith.addf %83, %85 : vector<64x96xf32>
    %87 = vector.shape_cast %86 : vector<64x96xf32> to vector<8x8x96xf32>
    %c0_38 = arith.constant 0 : index
    %c0_39 = arith.constant 0 : index
    %c0_40 = arith.constant 0 : index
    %88 = vector.load %arg16[%c0_38, %c0_39, %c0_40] : memref<8x8x96xf32, #tpu.memory_space<vmem>>, vector<8x8x96xf32>
    tpu.vector_store %arg16[%c0_38, %c0_39, %c0_40], %87 {strides = array<i32>} : memref<8x8x96xf32, #tpu.memory_space<vmem>>, vector<8x8x96xf32>,
    %c0_41 = arith.constant 0 : index
    %c0_42 = arith.constant 0 : index
    %89 = vector.load %arg9[%c0_41, %c0_42] : memref<32x96xbf16, #tpu.memory_space<vmem>>, vector<32x96xbf16>
    %c0_43 = arith.constant 0 : index
    %c0_44 = arith.constant 0 : index
    %90 = vector.load %arg10[%c0_43, %c0_44] : memref<32x96xbf16, #tpu.memory_space<vmem>>, vector<32x96xbf16>
    %c0_45 = arith.constant 0 : index
    %c0_46 = arith.constant 0 : index
    %91 = vector.load %arg11[%c0_45, %c0_46] : memref<8x96xf32, #tpu.memory_space<vmem>>, vector<8x96xf32>
    %c0_47 = arith.constant 0 : index
    %c0_48 = arith.constant 0 : index
    %92 = vector.load %arg12[%c0_47, %c0_48] : memref<8x96xf32, #tpu.memory_space<vmem>>, vector<8x96xf32>
    %c0_i32_49 = arith.constant 0 : i32
    %c0_50 = arith.constant 0 : index
    %c0_51 = arith.constant 0 : index
    %c0_52 = arith.constant 0 : index
    %93 = vector.load %arg17[%c0_50, %c0_51, %c0_52] : memref<2x8x32xf32, #tpu.memory_space<vmem>>, vector<1x8x32xf32>
    %94 = vector.shape_cast %93 : vector<1x8x32xf32> to vector<8x32xf32>
    %c1 = arith.constant 1 : index
    %c0_53 = arith.constant 0 : index
    %c0_54 = arith.constant 0 : index
    %95 = vector.load %arg17[%c1, %c0_53, %c0_54] : memref<2x8x32xf32, #tpu.memory_space<vmem>>, vector<1x8x32xf32>
    %96 = vector.shape_cast %95 : vector<1x8x32xf32> to vector<8x32xf32>
    %97 = arith.index_cast %c0_i32_49 : i32 to index
    %c0_55 = arith.constant 0 : index
    %c0_56 = arith.constant 0 : index
    %98 = vector.load %arg15[%97, %c0_55, %c0_56] : memref<8x8x96xf32, #tpu.memory_space<vmem>>, vector<1x8x96xf32>
    %99 = vector.shape_cast %98 : vector<1x8x96xf32> to vector<8x96xf32>
    %c7_i32 = arith.constant 7 : i32
    %100 = arith.subi %c7_i32, %c0_i32_49 : i32
    %101 = arith.index_cast %100 : i32 to index
    %c0_57 = arith.constant 0 : index
    %c0_58 = arith.constant 0 : index
    %102 = vector.load %arg16[%101, %c0_57, %c0_58] : memref<8x8x96xf32, #tpu.memory_space<vmem>>, vector<1x8x96xf32>
    %103 = vector.shape_cast %102 : vector<1x8x96xf32> to vector<8x96xf32>
    %104 = arith.truncf %94 : vector<8x32xf32> to vector<8x32xbf16>
    %cst_59 = arith.constant dense<0.000000e+00> : vector<8x96xf32>
    %105 = tpu.matmul %104, %89, %cst_59 {dimension_numbers = #tpu.dot_dimension_numbers<[1], [0], [0], [1], [0, 0, 1, 1], [], []>} : vector<8x32xbf16>, vector<32x96xbf16>, vector<8x96xf32> -> vector<8x96xf32>
    %106 = arith.addf %105, %91 : vector<8x96xf32>
    %107 = arith.truncf %96 : vector<8x32xf32> to vector<8x32xbf16>
    %cst_60 = arith.constant dense<0.000000e+00> : vector<8x96xf32>
    %108 = tpu.matmul %107, %90, %cst_60 {dimension_numbers = #tpu.dot_dimension_numbers<[1], [0], [0], [1], [0, 0, 1, 1], [], []>} : vector<8x32xbf16>, vector<32x96xbf16>, vector<8x96xf32> -> vector<8x96xf32>
    %109 = arith.addf %108, %92 : vector<8x96xf32>
    %110 = vector.extract_strided_slice %99 {offsets = [0, 0], sizes = [8, 32], strides = [1, 1]} : vector<8x96xf32> to vector<8x32xf32>
    %111 = vector.extract_strided_slice %106 {offsets = [0, 0], sizes = [8, 32], strides = [1, 1]} : vector<8x96xf32> to vector<8x32xf32>
    %112 = arith.addf %110, %111 : vector<8x32xf32>
    %113 = arith.negf %112 : vector<8x32xf32>
    %114 = math.exp %113 : vector<8x32xf32>
    %cst_61 = arith.constant 1.000000e+00 : f32
    %115 = vector.broadcast %cst_61 : f32 to vector<8x32xf32>
    %116 = arith.addf %115, %114 : vector<8x32xf32>
    %117 = arith.divf %115, %116 : vector<8x32xf32>
    %118 = vector.extract_strided_slice %99 {offsets = [0, 32], sizes = [8, 32], strides = [1, 1]} : vector<8x96xf32> to vector<8x32xf32>
    %119 = vector.extract_strided_slice %106 {offsets = [0, 32], sizes = [8, 32], strides = [1, 1]} : vector<8x96xf32> to vector<8x32xf32>
    %120 = arith.addf %118, %119 : vector<8x32xf32>
    %121 = arith.negf %120 : vector<8x32xf32>
    %122 = math.exp %121 : vector<8x32xf32>
    %cst_62 = arith.constant 1.000000e+00 : f32
    %123 = vector.broadcast %cst_62 : f32 to vector<8x32xf32>
    %124 = arith.addf %123, %122 : vector<8x32xf32>
    %125 = arith.divf %123, %124 : vector<8x32xf32>
    %126 = vector.extract_strided_slice %99 {offsets = [0, 64], sizes = [8, 32], strides = [1, 1]} : vector<8x96xf32> to vector<8x32xf32>
    %127 = vector.extract_strided_slice %106 {offsets = [0, 64], sizes = [8, 32], strides = [1, 1]} : vector<8x96xf32> to vector<8x32xf32>
    %128 = arith.mulf %117, %127 : vector<8x32xf32>
    %129 = arith.addf %126, %128 : vector<8x32xf32>
    %130 = math.tanh %129 : vector<8x32xf32>
    %cst_63 = arith.constant 1.000000e+00 : f32
    %131 = vector.broadcast %cst_63 : f32 to vector<8x32xf32>
    %132 = arith.subf %131, %125 : vector<8x32xf32>
    %133 = arith.mulf %132, %130 : vector<8x32xf32>
    %134 = arith.mulf %125, %94 : vector<8x32xf32>
    %135 = arith.addf %133, %134 : vector<8x32xf32>
    %136 = vector.extract_strided_slice %103 {offsets = [0, 0], sizes = [8, 32], strides = [1, 1]} : vector<8x96xf32> to vector<8x32xf32>
    %137 = vector.extract_strided_slice %109 {offsets = [0, 0], sizes = [8, 32], strides = [1, 1]} : vector<8x96xf32> to vector<8x32xf32>
    %138 = arith.addf %136, %137 : vector<8x32xf32>
    %139 = arith.negf %138 : vector<8x32xf32>
    %140 = math.exp %139 : vector<8x32xf32>
    %cst_64 = arith.constant 1.000000e+00 : f32
    %141 = vector.broadcast %cst_64 : f32 to vector<8x32xf32>
    %142 = arith.addf %141, %140 : vector<8x32xf32>
    %143 = arith.divf %141, %142 : vector<8x32xf32>
    %144 = vector.extract_strided_slice %103 {offsets = [0, 32], sizes = [8, 32], strides = [1, 1]} : vector<8x96xf32> to vector<8x32xf32>
    %145 = vector.extract_strided_slice %109 {offsets = [0, 32], sizes = [8, 32], strides = [1, 1]} : vector<8x96xf32> to vector<8x32xf32>
    %146 = arith.addf %144, %145 : vector<8x32xf32>
    %147 = arith.negf %146 : vector<8x32xf32>
    %148 = math.exp %147 : vector<8x32xf32>
    %cst_65 = arith.constant 1.000000e+00 : f32
    %149 = vector.broadcast %cst_65 : f32 to vector<8x32xf32>
    %150 = arith.addf %149, %148 : vector<8x32xf32>
    %151 = arith.divf %149, %150 : vector<8x32xf32>
    %152 = vector.extract_strided_slice %103 {offsets = [0, 64], sizes = [8, 32], strides = [1, 1]} : vector<8x96xf32> to vector<8x32xf32>
    %153 = vector.extract_strided_slice %109 {offsets = [0, 64], sizes = [8, 32], strides = [1, 1]} : vector<8x96xf32> to vector<8x32xf32>
    %154 = arith.mulf %143, %153 : vector<8x32xf32>
    %155 = arith.addf %152, %154 : vector<8x32xf32>
    %156 = math.tanh %155 : vector<8x32xf32>
    %cst_66 = arith.constant 1.000000e+00 : f32
    %157 = vector.broadcast %cst_66 : f32 to vector<8x32xf32>
    %158 = arith.subf %157, %151 : vector<8x32xf32>
    %159 = arith.mulf %158, %156 : vector<8x32xf32>
    %160 = arith.mulf %151, %96 : vector<8x32xf32>
    %161 = arith.addf %159, %160 : vector<8x32xf32>
    %c0_67 = arith.constant 0 : index
    %c0_68 = arith.constant 0 : index
    %c0_69 = arith.constant 0 : index
    %162 = vector.load %arg17[%c0_67, %c0_68, %c0_69] : memref<2x8x32xf32, #tpu.memory_space<vmem>>, vector<1x8x32xf32>
    %163 = vector.shape_cast %162 : vector<1x8x32xf32> to vector<8x32xf32>
    %164 = vector.shape_cast %135 : vector<8x32xf32> to vector<1x8x32xf32>
    tpu.vector_store %arg17[%c0_67, %c0_68, %c0_69], %164 {strides = array<i32>} : memref<2x8x32xf32, #tpu.memory_space<vmem>>, vector<1x8x32xf32>,
    %c1_70 = arith.constant 1 : index
    %c0_71 = arith.constant 0 : index
    %c0_72 = arith.constant 0 : index
    %165 = vector.load %arg17[%c1_70, %c0_71, %c0_72] : memref<2x8x32xf32, #tpu.memory_space<vmem>>, vector<1x8x32xf32>
    %166 = vector.shape_cast %165 : vector<1x8x32xf32> to vector<8x32xf32>
    %167 = vector.shape_cast %161 : vector<8x32xf32> to vector<1x8x32xf32>
    tpu.vector_store %arg17[%c1_70, %c0_71, %c0_72], %167 {strides = array<i32>} : memref<2x8x32xf32, #tpu.memory_space<vmem>>, vector<1x8x32xf32>,
    %168 = arith.index_cast %c0_i32_49 : i32 to index
    %c0_73 = arith.constant 0 : index
    %c0_74 = arith.constant 0 : index
    %169 = vector.load %arg13[%168, %c0_73, %c0_74] : memref<8x8x32xf32, #tpu.memory_space<vmem>>, vector<1x8x32xf32>
    %170 = vector.shape_cast %169 : vector<1x8x32xf32> to vector<8x32xf32>
    %171 = vector.shape_cast %135 : vector<8x32xf32> to vector<1x8x32xf32>
    tpu.vector_store %arg13[%168, %c0_73, %c0_74], %171 {strides = array<i32>} : memref<8x8x32xf32, #tpu.memory_space<vmem>>, vector<1x8x32xf32>,
    %c7_i32_75 = arith.constant 7 : i32
    %172 = arith.subi %c7_i32_75, %c0_i32_49 : i32
    %173 = arith.index_cast %172 : i32 to index
    %c0_76 = arith.constant 0 : index
    %c0_77 = arith.constant 0 : index
    %174 = vector.load %arg14[%173, %c0_76, %c0_77] : memref<8x8x32xf32, #tpu.memory_space<vmem>>, vector<1x8x32xf32>
    %175 = vector.shape_cast %174 : vector<1x8x32xf32> to vector<8x32xf32>
    %176 = vector.shape_cast %161 : vector<8x32xf32> to vector<1x8x32xf32>
    tpu.vector_store %arg14[%173, %c0_76, %c0_77], %176 {strides = array<i32>} : memref<8x8x32xf32, #tpu.memory_space<vmem>>, vector<1x8x32xf32>,
    %c1_i32 = arith.constant 1 : i32
    %c0_78 = arith.constant 0 : index
    %c0_79 = arith.constant 0 : index
    %c0_80 = arith.constant 0 : index
    %177 = vector.load %arg17[%c0_78, %c0_79, %c0_80] : memref<2x8x32xf32, #tpu.memory_space<vmem>>, vector<1x8x32xf32>
    %178 = vector.shape_cast %177 : vector<1x8x32xf32> to vector<8x32xf32>
    %c1_81 = arith.constant 1 : index
    %c0_82 = arith.constant 0 : index
    %c0_83 = arith.constant 0 : index
    %179 = vector.load %arg17[%c1_81, %c0_82, %c0_83] : memref<2x8x32xf32, #tpu.memory_space<vmem>>, vector<1x8x32xf32>
    %180 = vector.shape_cast %179 : vector<1x8x32xf32> to vector<8x32xf32>
    %181 = arith.index_cast %c1_i32 : i32 to index
    %c0_84 = arith.constant 0 : index
    %c0_85 = arith.constant 0 : index
    %182 = vector.load %arg15[%181, %c0_84, %c0_85] : memref<8x8x96xf32, #tpu.memory_space<vmem>>, vector<1x8x96xf32>
    %183 = vector.shape_cast %182 : vector<1x8x96xf32> to vector<8x96xf32>
    %c7_i32_86 = arith.constant 7 : i32
    %184 = arith.subi %c7_i32_86, %c1_i32 : i32
    %185 = arith.index_cast %184 : i32 to index
    %c0_87 = arith.constant 0 : index
    %c0_88 = arith.constant 0 : index
    %186 = vector.load %arg16[%185, %c0_87, %c0_88] : memref<8x8x96xf32, #tpu.memory_space<vmem>>, vector<1x8x96xf32>
    %187 = vector.shape_cast %186 : vector<1x8x96xf32> to vector<8x96xf32>
    %188 = arith.truncf %178 : vector<8x32xf32> to vector<8x32xbf16>
    %cst_89 = arith.constant dense<0.000000e+00> : vector<8x96xf32>
    %189 = tpu.matmul %188, %89, %cst_89 {dimension_numbers = #tpu.dot_dimension_numbers<[1], [0], [0], [1], [0, 0, 1, 1], [], []>} : vector<8x32xbf16>, vector<32x96xbf16>, vector<8x96xf32> -> vector<8x96xf32>
    %190 = arith.addf %189, %91 : vector<8x96xf32>
    %191 = arith.truncf %180 : vector<8x32xf32> to vector<8x32xbf16>
    %cst_90 = arith.constant dense<0.000000e+00> : vector<8x96xf32>
    %192 = tpu.matmul %191, %90, %cst_90 {dimension_numbers = #tpu.dot_dimension_numbers<[1], [0], [0], [1], [0, 0, 1, 1], [], []>} : vector<8x32xbf16>, vector<32x96xbf16>, vector<8x96xf32> -> vector<8x96xf32>
    %193 = arith.addf %192, %92 : vector<8x96xf32>
    %194 = vector.extract_strided_slice %183 {offsets = [0, 0], sizes = [8, 32], strides = [1, 1]} : vector<8x96xf32> to vector<8x32xf32>
    %195 = vector.extract_strided_slice %190 {offsets = [0, 0], sizes = [8, 32], strides = [1, 1]} : vector<8x96xf32> to vector<8x32xf32>
    %196 = arith.addf %194, %195 : vector<8x32xf32>
    %197 = arith.negf %196 : vector<8x32xf32>
    %198 = math.exp %197 : vector<8x32xf32>
    %cst_91 = arith.constant 1.000000e+00 : f32
    %199 = vector.broadcast %cst_91 : f32 to vector<8x32xf32>
    %200 = arith.addf %199, %198 : vector<8x32xf32>
    %201 = arith.divf %199, %200 : vector<8x32xf32>
    %202 = vector.extract_strided_slice %183 {offsets = [0, 32], sizes = [8, 32], strides = [1, 1]} : vector<8x96xf32> to vector<8x32xf32>
    %203 = vector.extract_strided_slice %190 {offsets = [0, 32], sizes = [8, 32], strides = [1, 1]} : vector<8x96xf32> to vector<8x32xf32>
    %204 = arith.addf %202, %203 : vector<8x32xf32>
    %205 = arith.negf %204 : vector<8x32xf32>
    %206 = math.exp %205 : vector<8x32xf32>
    %cst_92 = arith.constant 1.000000e+00 : f32
    %207 = vector.broadcast %cst_92 : f32 to vector<8x32xf32>
    %208 = arith.addf %207, %206 : vector<8x32xf32>
    %209 = arith.divf %207, %208 : vector<8x32xf32>
    %210 = vector.extract_strided_slice %183 {offsets = [0, 64], sizes = [8, 32], strides = [1, 1]} : vector<8x96xf32> to vector<8x32xf32>
    %211 = vector.extract_strided_slice %190 {offsets = [0, 64], sizes = [8, 32], strides = [1, 1]} : vector<8x96xf32> to vector<8x32xf32>
    %212 = arith.mulf %201, %211 : vector<8x32xf32>
    %213 = arith.addf %210, %212 : vector<8x32xf32>
    %214 = math.tanh %213 : vector<8x32xf32>
    %cst_93 = arith.constant 1.000000e+00 : f32
    %215 = vector.broadcast %cst_93 : f32 to vector<8x32xf32>
    %216 = arith.subf %215, %209 : vector<8x32xf32>
    %217 = arith.mulf %216, %214 : vector<8x32xf32>
    %218 = arith.mulf %209, %178 : vector<8x32xf32>
    %219 = arith.addf %217, %218 : vector<8x32xf32>
    %220 = vector.extract_strided_slice %187 {offsets = [0, 0], sizes = [8, 32], strides = [1, 1]} : vector<8x96xf32> to vector<8x32xf32>
    %221 = vector.extract_strided_slice %193 {offsets = [0, 0], sizes = [8, 32], strides = [1, 1]} : vector<8x96xf32> to vector<8x32xf32>
    %222 = arith.addf %220, %221 : vector<8x32xf32>
    %223 = arith.negf %222 : vector<8x32xf32>
    %224 = math.exp %223 : vector<8x32xf32>
    %cst_94 = arith.constant 1.000000e+00 : f32
    %225 = vector.broadcast %cst_94 : f32 to vector<8x32xf32>
    %226 = arith.addf %225, %224 : vector<8x32xf32>
    %227 = arith.divf %225, %226 : vector<8x32xf32>
    %228 = vector.extract_strided_slice %187 {offsets = [0, 32], sizes = [8, 32], strides = [1, 1]} : vector<8x96xf32> to vector<8x32xf32>
    %229 = vector.extract_strided_slice %193 {offsets = [0, 32], sizes = [8, 32], strides = [1, 1]} : vector<8x96xf32> to vector<8x32xf32>
    %230 = arith.addf %228, %229 : vector<8x32xf32>
    %231 = arith.negf %230 : vector<8x32xf32>
    %232 = math.exp %231 : vector<8x32xf32>
    %cst_95 = arith.constant 1.000000e+00 : f32
    %233 = vector.broadcast %cst_95 : f32 to vector<8x32xf32>
    %234 = arith.addf %233, %232 : vector<8x32xf32>
    %235 = arith.divf %233, %234 : vector<8x32xf32>
    %236 = vector.extract_strided_slice %187 {offsets = [0, 64], sizes = [8, 32], strides = [1, 1]} : vector<8x96xf32> to vector<8x32xf32>
    %237 = vector.extract_strided_slice %193 {offsets = [0, 64], sizes = [8, 32], strides = [1, 1]} : vector<8x96xf32> to vector<8x32xf32>
    %238 = arith.mulf %227, %237 : vector<8x32xf32>
    %239 = arith.addf %236, %238 : vector<8x32xf32>
    %240 = math.tanh %239 : vector<8x32xf32>
    %cst_96 = arith.constant 1.000000e+00 : f32
    %241 = vector.broadcast %cst_96 : f32 to vector<8x32xf32>
    %242 = arith.subf %241, %235 : vector<8x32xf32>
    %243 = arith.mulf %242, %240 : vector<8x32xf32>
    %244 = arith.mulf %235, %180 : vector<8x32xf32>
    %245 = arith.addf %243, %244 : vector<8x32xf32>
    %c0_97 = arith.constant 0 : index
    %c0_98 = arith.constant 0 : index
    %c0_99 = arith.constant 0 : index
    %246 = vector.load %arg17[%c0_97, %c0_98, %c0_99] : memref<2x8x32xf32, #tpu.memory_space<vmem>>, vector<1x8x32xf32>
    %247 = vector.shape_cast %246 : vector<1x8x32xf32> to vector<8x32xf32>
    %248 = vector.shape_cast %219 : vector<8x32xf32> to vector<1x8x32xf32>
    tpu.vector_store %arg17[%c0_97, %c0_98, %c0_99], %248 {strides = array<i32>} : memref<2x8x32xf32, #tpu.memory_space<vmem>>, vector<1x8x32xf32>,
    %c1_100 = arith.constant 1 : index
    %c0_101 = arith.constant 0 : index
    %c0_102 = arith.constant 0 : index
    %249 = vector.load %arg17[%c1_100, %c0_101, %c0_102] : memref<2x8x32xf32, #tpu.memory_space<vmem>>, vector<1x8x32xf32>
    %250 = vector.shape_cast %249 : vector<1x8x32xf32> to vector<8x32xf32>
    %251 = vector.shape_cast %245 : vector<8x32xf32> to vector<1x8x32xf32>
    tpu.vector_store %arg17[%c1_100, %c0_101, %c0_102], %251 {strides = array<i32>} : memref<2x8x32xf32, #tpu.memory_space<vmem>>, vector<1x8x32xf32>,
    %252 = arith.index_cast %c1_i32 : i32 to index
    %c0_103 = arith.constant 0 : index
    %c0_104 = arith.constant 0 : index
    %253 = vector.load %arg13[%252, %c0_103, %c0_104] : memref<8x8x32xf32, #tpu.memory_space<vmem>>, vector<1x8x32xf32>
    %254 = vector.shape_cast %253 : vector<1x8x32xf32> to vector<8x32xf32>
    %255 = vector.shape_cast %219 : vector<8x32xf32> to vector<1x8x32xf32>
    tpu.vector_store %arg13[%252, %c0_103, %c0_104], %255 {strides = array<i32>} : memref<8x8x32xf32, #tpu.memory_space<vmem>>, vector<1x8x32xf32>,
    %c7_i32_105 = arith.constant 7 : i32
    %256 = arith.subi %c7_i32_105, %c1_i32 : i32
    %257 = arith.index_cast %256 : i32 to index
    %c0_106 = arith.constant 0 : index
    %c0_107 = arith.constant 0 : index
    %258 = vector.load %arg14[%257, %c0_106, %c0_107] : memref<8x8x32xf32, #tpu.memory_space<vmem>>, vector<1x8x32xf32>
    %259 = vector.shape_cast %258 : vector<1x8x32xf32> to vector<8x32xf32>
    %260 = vector.shape_cast %245 : vector<8x32xf32> to vector<1x8x32xf32>
    tpu.vector_store %arg14[%257, %c0_106, %c0_107], %260 {strides = array<i32>} : memref<8x8x32xf32, #tpu.memory_space<vmem>>, vector<1x8x32xf32>,
    %c2_i32 = arith.constant 2 : i32
    %c0_108 = arith.constant 0 : index
    %c0_109 = arith.constant 0 : index
    %c0_110 = arith.constant 0 : index
    %261 = vector.load %arg17[%c0_108, %c0_109, %c0_110] : memref<2x8x32xf32, #tpu.memory_space<vmem>>, vector<1x8x32xf32>
    %262 = vector.shape_cast %261 : vector<1x8x32xf32> to vector<8x32xf32>
    %c1_111 = arith.constant 1 : index
    %c0_112 = arith.constant 0 : index
    %c0_113 = arith.constant 0 : index
    %263 = vector.load %arg17[%c1_111, %c0_112, %c0_113] : memref<2x8x32xf32, #tpu.memory_space<vmem>>, vector<1x8x32xf32>
    %264 = vector.shape_cast %263 : vector<1x8x32xf32> to vector<8x32xf32>
    %265 = arith.index_cast %c2_i32 : i32 to index
    %c0_114 = arith.constant 0 : index
    %c0_115 = arith.constant 0 : index
    %266 = vector.load %arg15[%265, %c0_114, %c0_115] : memref<8x8x96xf32, #tpu.memory_space<vmem>>, vector<1x8x96xf32>
    %267 = vector.shape_cast %266 : vector<1x8x96xf32> to vector<8x96xf32>
    %c7_i32_116 = arith.constant 7 : i32
    %268 = arith.subi %c7_i32_116, %c2_i32 : i32
    %269 = arith.index_cast %268 : i32 to index
    %c0_117 = arith.constant 0 : index
    %c0_118 = arith.constant 0 : index
    %270 = vector.load %arg16[%269, %c0_117, %c0_118] : memref<8x8x96xf32, #tpu.memory_space<vmem>>, vector<1x8x96xf32>
    %271 = vector.shape_cast %270 : vector<1x8x96xf32> to vector<8x96xf32>
    %272 = arith.truncf %262 : vector<8x32xf32> to vector<8x32xbf16>
    %cst_119 = arith.constant dense<0.000000e+00> : vector<8x96xf32>
    %273 = tpu.matmul %272, %89, %cst_119 {dimension_numbers = #tpu.dot_dimension_numbers<[1], [0], [0], [1], [0, 0, 1, 1], [], []>} : vector<8x32xbf16>, vector<32x96xbf16>, vector<8x96xf32> -> vector<8x96xf32>
    %274 = arith.addf %273, %91 : vector<8x96xf32>
    %275 = arith.truncf %264 : vector<8x32xf32> to vector<8x32xbf16>
    %cst_120 = arith.constant dense<0.000000e+00> : vector<8x96xf32>
    %276 = tpu.matmul %275, %90, %cst_120 {dimension_numbers = #tpu.dot_dimension_numbers<[1], [0], [0], [1], [0, 0, 1, 1], [], []>} : vector<8x32xbf16>, vector<32x96xbf16>, vector<8x96xf32> -> vector<8x96xf32>
    %277 = arith.addf %276, %92 : vector<8x96xf32>
    %278 = vector.extract_strided_slice %267 {offsets = [0, 0], sizes = [8, 32], strides = [1, 1]} : vector<8x96xf32> to vector<8x32xf32>
    %279 = vector.extract_strided_slice %274 {offsets = [0, 0], sizes = [8, 32], strides = [1, 1]} : vector<8x96xf32> to vector<8x32xf32>
    %280 = arith.addf %278, %279 : vector<8x32xf32>
    %281 = arith.negf %280 : vector<8x32xf32>
    %282 = math.exp %281 : vector<8x32xf32>
    %cst_121 = arith.constant 1.000000e+00 : f32
    %283 = vector.broadcast %cst_121 : f32 to vector<8x32xf32>
    %284 = arith.addf %283, %282 : vector<8x32xf32>
    %285 = arith.divf %283, %284 : vector<8x32xf32>
    %286 = vector.extract_strided_slice %267 {offsets = [0, 32], sizes = [8, 32], strides = [1, 1]} : vector<8x96xf32> to vector<8x32xf32>
    %287 = vector.extract_strided_slice %274 {offsets = [0, 32], sizes = [8, 32], strides = [1, 1]} : vector<8x96xf32> to vector<8x32xf32>
    %288 = arith.addf %286, %287 : vector<8x32xf32>
    %289 = arith.negf %288 : vector<8x32xf32>
    %290 = math.exp %289 : vector<8x32xf32>
    %cst_122 = arith.constant 1.000000e+00 : f32
    %291 = vector.broadcast %cst_122 : f32 to vector<8x32xf32>
    %292 = arith.addf %291, %290 : vector<8x32xf32>
    %293 = arith.divf %291, %292 : vector<8x32xf32>
    %294 = vector.extract_strided_slice %267 {offsets = [0, 64], sizes = [8, 32], strides = [1, 1]} : vector<8x96xf32> to vector<8x32xf32>
    %295 = vector.extract_strided_slice %274 {offsets = [0, 64], sizes = [8, 32], strides = [1, 1]} : vector<8x96xf32> to vector<8x32xf32>
    %296 = arith.mulf %285, %295 : vector<8x32xf32>
    %297 = arith.addf %294, %296 : vector<8x32xf32>
    %298 = math.tanh %297 : vector<8x32xf32>
    %cst_123 = arith.constant 1.000000e+00 : f32
    %299 = vector.broadcast %cst_123 : f32 to vector<8x32xf32>
    %300 = arith.subf %299, %293 : vector<8x32xf32>
    %301 = arith.mulf %300, %298 : vector<8x32xf32>
    %302 = arith.mulf %293, %262 : vector<8x32xf32>
    %303 = arith.addf %301, %302 : vector<8x32xf32>
    %304 = vector.extract_strided_slice %271 {offsets = [0, 0], sizes = [8, 32], strides = [1, 1]} : vector<8x96xf32> to vector<8x32xf32>
    %305 = vector.extract_strided_slice %277 {offsets = [0, 0], sizes = [8, 32], strides = [1, 1]} : vector<8x96xf32> to vector<8x32xf32>
    %306 = arith.addf %304, %305 : vector<8x32xf32>
    %307 = arith.negf %306 : vector<8x32xf32>
    %308 = math.exp %307 : vector<8x32xf32>
    %cst_124 = arith.constant 1.000000e+00 : f32
    %309 = vector.broadcast %cst_124 : f32 to vector<8x32xf32>
    %310 = arith.addf %309, %308 : vector<8x32xf32>
    %311 = arith.divf %309, %310 : vector<8x32xf32>
    %312 = vector.extract_strided_slice %271 {offsets = [0, 32], sizes = [8, 32], strides = [1, 1]} : vector<8x96xf32> to vector<8x32xf32>
    %313 = vector.extract_strided_slice %277 {offsets = [0, 32], sizes = [8, 32], strides = [1, 1]} : vector<8x96xf32> to vector<8x32xf32>
    %314 = arith.addf %312, %313 : vector<8x32xf32>
    %315 = arith.negf %314 : vector<8x32xf32>
    %316 = math.exp %315 : vector<8x32xf32>
    %cst_125 = arith.constant 1.000000e+00 : f32
    %317 = vector.broadcast %cst_125 : f32 to vector<8x32xf32>
    %318 = arith.addf %317, %316 : vector<8x32xf32>
    %319 = arith.divf %317, %318 : vector<8x32xf32>
    %320 = vector.extract_strided_slice %271 {offsets = [0, 64], sizes = [8, 32], strides = [1, 1]} : vector<8x96xf32> to vector<8x32xf32>
    %321 = vector.extract_strided_slice %277 {offsets = [0, 64], sizes = [8, 32], strides = [1, 1]} : vector<8x96xf32> to vector<8x32xf32>
    %322 = arith.mulf %311, %321 : vector<8x32xf32>
    %323 = arith.addf %320, %322 : vector<8x32xf32>
    %324 = math.tanh %323 : vector<8x32xf32>
    %cst_126 = arith.constant 1.000000e+00 : f32
    %325 = vector.broadcast %cst_126 : f32 to vector<8x32xf32>
    %326 = arith.subf %325, %319 : vector<8x32xf32>
    %327 = arith.mulf %326, %324 : vector<8x32xf32>
    %328 = arith.mulf %319, %264 : vector<8x32xf32>
    %329 = arith.addf %327, %328 : vector<8x32xf32>
    %c0_127 = arith.constant 0 : index
    %c0_128 = arith.constant 0 : index
    %c0_129 = arith.constant 0 : index
    %330 = vector.load %arg17[%c0_127, %c0_128, %c0_129] : memref<2x8x32xf32, #tpu.memory_space<vmem>>, vector<1x8x32xf32>
    %331 = vector.shape_cast %330 : vector<1x8x32xf32> to vector<8x32xf32>
    %332 = vector.shape_cast %303 : vector<8x32xf32> to vector<1x8x32xf32>
    tpu.vector_store %arg17[%c0_127, %c0_128, %c0_129], %332 {strides = array<i32>} : memref<2x8x32xf32, #tpu.memory_space<vmem>>, vector<1x8x32xf32>,
    %c1_130 = arith.constant 1 : index
    %c0_131 = arith.constant 0 : index
    %c0_132 = arith.constant 0 : index
    %333 = vector.load %arg17[%c1_130, %c0_131, %c0_132] : memref<2x8x32xf32, #tpu.memory_space<vmem>>, vector<1x8x32xf32>
    %334 = vector.shape_cast %333 : vector<1x8x32xf32> to vector<8x32xf32>
    %335 = vector.shape_cast %329 : vector<8x32xf32> to vector<1x8x32xf32>
    tpu.vector_store %arg17[%c1_130, %c0_131, %c0_132], %335 {strides = array<i32>} : memref<2x8x32xf32, #tpu.memory_space<vmem>>, vector<1x8x32xf32>,
    %336 = arith.index_cast %c2_i32 : i32 to index
    %c0_133 = arith.constant 0 : index
    %c0_134 = arith.constant 0 : index
    %337 = vector.load %arg13[%336, %c0_133, %c0_134] : memref<8x8x32xf32, #tpu.memory_space<vmem>>, vector<1x8x32xf32>
    %338 = vector.shape_cast %337 : vector<1x8x32xf32> to vector<8x32xf32>
    %339 = vector.shape_cast %303 : vector<8x32xf32> to vector<1x8x32xf32>
    tpu.vector_store %arg13[%336, %c0_133, %c0_134], %339 {strides = array<i32>} : memref<8x8x32xf32, #tpu.memory_space<vmem>>, vector<1x8x32xf32>,
    %c7_i32_135 = arith.constant 7 : i32
    %340 = arith.subi %c7_i32_135, %c2_i32 : i32
    %341 = arith.index_cast %340 : i32 to index
    %c0_136 = arith.constant 0 : index
    %c0_137 = arith.constant 0 : index
    %342 = vector.load %arg14[%341, %c0_136, %c0_137] : memref<8x8x32xf32, #tpu.memory_space<vmem>>, vector<1x8x32xf32>
    %343 = vector.shape_cast %342 : vector<1x8x32xf32> to vector<8x32xf32>
    %344 = vector.shape_cast %329 : vector<8x32xf32> to vector<1x8x32xf32>
    tpu.vector_store %arg14[%341, %c0_136, %c0_137], %344 {strides = array<i32>} : memref<8x8x32xf32, #tpu.memory_space<vmem>>, vector<1x8x32xf32>,
    %c3_i32 = arith.constant 3 : i32
    %c0_138 = arith.constant 0 : index
    %c0_139 = arith.constant 0 : index
    %c0_140 = arith.constant 0 : index
    %345 = vector.load %arg17[%c0_138, %c0_139, %c0_140] : memref<2x8x32xf32, #tpu.memory_space<vmem>>, vector<1x8x32xf32>
    %346 = vector.shape_cast %345 : vector<1x8x32xf32> to vector<8x32xf32>
    %c1_141 = arith.constant 1 : index
    %c0_142 = arith.constant 0 : index
    %c0_143 = arith.constant 0 : index
    %347 = vector.load %arg17[%c1_141, %c0_142, %c0_143] : memref<2x8x32xf32, #tpu.memory_space<vmem>>, vector<1x8x32xf32>
    %348 = vector.shape_cast %347 : vector<1x8x32xf32> to vector<8x32xf32>
    %349 = arith.index_cast %c3_i32 : i32 to index
    %c0_144 = arith.constant 0 : index
    %c0_145 = arith.constant 0 : index
    %350 = vector.load %arg15[%349, %c0_144, %c0_145] : memref<8x8x96xf32, #tpu.memory_space<vmem>>, vector<1x8x96xf32>
    %351 = vector.shape_cast %350 : vector<1x8x96xf32> to vector<8x96xf32>
    %c7_i32_146 = arith.constant 7 : i32
    %352 = arith.subi %c7_i32_146, %c3_i32 : i32
    %353 = arith.index_cast %352 : i32 to index
    %c0_147 = arith.constant 0 : index
    %c0_148 = arith.constant 0 : index
    %354 = vector.load %arg16[%353, %c0_147, %c0_148] : memref<8x8x96xf32, #tpu.memory_space<vmem>>, vector<1x8x96xf32>
    %355 = vector.shape_cast %354 : vector<1x8x96xf32> to vector<8x96xf32>
    %356 = arith.truncf %346 : vector<8x32xf32> to vector<8x32xbf16>
    %cst_149 = arith.constant dense<0.000000e+00> : vector<8x96xf32>
    %357 = tpu.matmul %356, %89, %cst_149 {dimension_numbers = #tpu.dot_dimension_numbers<[1], [0], [0], [1], [0, 0, 1, 1], [], []>} : vector<8x32xbf16>, vector<32x96xbf16>, vector<8x96xf32> -> vector<8x96xf32>
    %358 = arith.addf %357, %91 : vector<8x96xf32>
    %359 = arith.truncf %348 : vector<8x32xf32> to vector<8x32xbf16>
    %cst_150 = arith.constant dense<0.000000e+00> : vector<8x96xf32>
    %360 = tpu.matmul %359, %90, %cst_150 {dimension_numbers = #tpu.dot_dimension_numbers<[1], [0], [0], [1], [0, 0, 1, 1], [], []>} : vector<8x32xbf16>, vector<32x96xbf16>, vector<8x96xf32> -> vector<8x96xf32>
    %361 = arith.addf %360, %92 : vector<8x96xf32>
    %362 = vector.extract_strided_slice %351 {offsets = [0, 0], sizes = [8, 32], strides = [1, 1]} : vector<8x96xf32> to vector<8x32xf32>
    %363 = vector.extract_strided_slice %358 {offsets = [0, 0], sizes = [8, 32], strides = [1, 1]} : vector<8x96xf32> to vector<8x32xf32>
    %364 = arith.addf %362, %363 : vector<8x32xf32>
    %365 = arith.negf %364 : vector<8x32xf32>
    %366 = math.exp %365 : vector<8x32xf32>
    %cst_151 = arith.constant 1.000000e+00 : f32
    %367 = vector.broadcast %cst_151 : f32 to vector<8x32xf32>
    %368 = arith.addf %367, %366 : vector<8x32xf32>
    %369 = arith.divf %367, %368 : vector<8x32xf32>
    %370 = vector.extract_strided_slice %351 {offsets = [0, 32], sizes = [8, 32], strides = [1, 1]} : vector<8x96xf32> to vector<8x32xf32>
    %371 = vector.extract_strided_slice %358 {offsets = [0, 32], sizes = [8, 32], strides = [1, 1]} : vector<8x96xf32> to vector<8x32xf32>
    %372 = arith.addf %370, %371 : vector<8x32xf32>
    %373 = arith.negf %372 : vector<8x32xf32>
    %374 = math.exp %373 : vector<8x32xf32>
    %cst_152 = arith.constant 1.000000e+00 : f32
    %375 = vector.broadcast %cst_152 : f32 to vector<8x32xf32>
    %376 = arith.addf %375, %374 : vector<8x32xf32>
    %377 = arith.divf %375, %376 : vector<8x32xf32>
    %378 = vector.extract_strided_slice %351 {offsets = [0, 64], sizes = [8, 32], strides = [1, 1]} : vector<8x96xf32> to vector<8x32xf32>
    %379 = vector.extract_strided_slice %358 {offsets = [0, 64], sizes = [8, 32], strides = [1, 1]} : vector<8x96xf32> to vector<8x32xf32>
    %380 = arith.mulf %369, %379 : vector<8x32xf32>
    %381 = arith.addf %378, %380 : vector<8x32xf32>
    %382 = math.tanh %381 : vector<8x32xf32>
    %cst_153 = arith.constant 1.000000e+00 : f32
    %383 = vector.broadcast %cst_153 : f32 to vector<8x32xf32>
    %384 = arith.subf %383, %377 : vector<8x32xf32>
    %385 = arith.mulf %384, %382 : vector<8x32xf32>
    %386 = arith.mulf %377, %346 : vector<8x32xf32>
    %387 = arith.addf %385, %386 : vector<8x32xf32>
    %388 = vector.extract_strided_slice %355 {offsets = [0, 0], sizes = [8, 32], strides = [1, 1]} : vector<8x96xf32> to vector<8x32xf32>
    %389 = vector.extract_strided_slice %361 {offsets = [0, 0], sizes = [8, 32], strides = [1, 1]} : vector<8x96xf32> to vector<8x32xf32>
    %390 = arith.addf %388, %389 : vector<8x32xf32>
    %391 = arith.negf %390 : vector<8x32xf32>
    %392 = math.exp %391 : vector<8x32xf32>
    %cst_154 = arith.constant 1.000000e+00 : f32
    %393 = vector.broadcast %cst_154 : f32 to vector<8x32xf32>
    %394 = arith.addf %393, %392 : vector<8x32xf32>
    %395 = arith.divf %393, %394 : vector<8x32xf32>
    %396 = vector.extract_strided_slice %355 {offsets = [0, 32], sizes = [8, 32], strides = [1, 1]} : vector<8x96xf32> to vector<8x32xf32>
    %397 = vector.extract_strided_slice %361 {offsets = [0, 32], sizes = [8, 32], strides = [1, 1]} : vector<8x96xf32> to vector<8x32xf32>
    %398 = arith.addf %396, %397 : vector<8x32xf32>
    %399 = arith.negf %398 : vector<8x32xf32>
    %400 = math.exp %399 : vector<8x32xf32>
    %cst_155 = arith.constant 1.000000e+00 : f32
    %401 = vector.broadcast %cst_155 : f32 to vector<8x32xf32>
    %402 = arith.addf %401, %400 : vector<8x32xf32>
    %403 = arith.divf %401, %402 : vector<8x32xf32>
    %404 = vector.extract_strided_slice %355 {offsets = [0, 64], sizes = [8, 32], strides = [1, 1]} : vector<8x96xf32> to vector<8x32xf32>
    %405 = vector.extract_strided_slice %361 {offsets = [0, 64], sizes = [8, 32], strides = [1, 1]} : vector<8x96xf32> to vector<8x32xf32>
    %406 = arith.mulf %395, %405 : vector<8x32xf32>
    %407 = arith.addf %404, %406 : vector<8x32xf32>
    %408 = math.tanh %407 : vector<8x32xf32>
    %cst_156 = arith.constant 1.000000e+00 : f32
    %409 = vector.broadcast %cst_156 : f32 to vector<8x32xf32>
    %410 = arith.subf %409, %403 : vector<8x32xf32>
    %411 = arith.mulf %410, %408 : vector<8x32xf32>
    %412 = arith.mulf %403, %348 : vector<8x32xf32>
    %413 = arith.addf %411, %412 : vector<8x32xf32>
    %c0_157 = arith.constant 0 : index
    %c0_158 = arith.constant 0 : index
    %c0_159 = arith.constant 0 : index
    %414 = vector.load %arg17[%c0_157, %c0_158, %c0_159] : memref<2x8x32xf32, #tpu.memory_space<vmem>>, vector<1x8x32xf32>
    %415 = vector.shape_cast %414 : vector<1x8x32xf32> to vector<8x32xf32>
    %416 = vector.shape_cast %387 : vector<8x32xf32> to vector<1x8x32xf32>
    tpu.vector_store %arg17[%c0_157, %c0_158, %c0_159], %416 {strides = array<i32>} : memref<2x8x32xf32, #tpu.memory_space<vmem>>, vector<1x8x32xf32>,
    %c1_160 = arith.constant 1 : index
    %c0_161 = arith.constant 0 : index
    %c0_162 = arith.constant 0 : index
    %417 = vector.load %arg17[%c1_160, %c0_161, %c0_162] : memref<2x8x32xf32, #tpu.memory_space<vmem>>, vector<1x8x32xf32>
    %418 = vector.shape_cast %417 : vector<1x8x32xf32> to vector<8x32xf32>
    %419 = vector.shape_cast %413 : vector<8x32xf32> to vector<1x8x32xf32>
    tpu.vector_store %arg17[%c1_160, %c0_161, %c0_162], %419 {strides = array<i32>} : memref<2x8x32xf32, #tpu.memory_space<vmem>>, vector<1x8x32xf32>,
    %420 = arith.index_cast %c3_i32 : i32 to index
    %c0_163 = arith.constant 0 : index
    %c0_164 = arith.constant 0 : index
    %421 = vector.load %arg13[%420, %c0_163, %c0_164] : memref<8x8x32xf32, #tpu.memory_space<vmem>>, vector<1x8x32xf32>
    %422 = vector.shape_cast %421 : vector<1x8x32xf32> to vector<8x32xf32>
    %423 = vector.shape_cast %387 : vector<8x32xf32> to vector<1x8x32xf32>
    tpu.vector_store %arg13[%420, %c0_163, %c0_164], %423 {strides = array<i32>} : memref<8x8x32xf32, #tpu.memory_space<vmem>>, vector<1x8x32xf32>,
    %c7_i32_165 = arith.constant 7 : i32
    %424 = arith.subi %c7_i32_165, %c3_i32 : i32
    %425 = arith.index_cast %424 : i32 to index
    %c0_166 = arith.constant 0 : index
    %c0_167 = arith.constant 0 : index
    %426 = vector.load %arg14[%425, %c0_166, %c0_167] : memref<8x8x32xf32, #tpu.memory_space<vmem>>, vector<1x8x32xf32>
    %427 = vector.shape_cast %426 : vector<1x8x32xf32> to vector<8x32xf32>
    %428 = vector.shape_cast %413 : vector<8x32xf32> to vector<1x8x32xf32>
    tpu.vector_store %arg14[%425, %c0_166, %c0_167], %428 {strides = array<i32>} : memref<8x8x32xf32, #tpu.memory_space<vmem>>, vector<1x8x32xf32>,
    %c4_i32 = arith.constant 4 : i32
    %c0_168 = arith.constant 0 : index
    %c0_169 = arith.constant 0 : index
    %c0_170 = arith.constant 0 : index
    %429 = vector.load %arg17[%c0_168, %c0_169, %c0_170] : memref<2x8x32xf32, #tpu.memory_space<vmem>>, vector<1x8x32xf32>
    %430 = vector.shape_cast %429 : vector<1x8x32xf32> to vector<8x32xf32>
    %c1_171 = arith.constant 1 : index
    %c0_172 = arith.constant 0 : index
    %c0_173 = arith.constant 0 : index
    %431 = vector.load %arg17[%c1_171, %c0_172, %c0_173] : memref<2x8x32xf32, #tpu.memory_space<vmem>>, vector<1x8x32xf32>
    %432 = vector.shape_cast %431 : vector<1x8x32xf32> to vector<8x32xf32>
    %433 = arith.index_cast %c4_i32 : i32 to index
    %c0_174 = arith.constant 0 : index
    %c0_175 = arith.constant 0 : index
    %434 = vector.load %arg15[%433, %c0_174, %c0_175] : memref<8x8x96xf32, #tpu.memory_space<vmem>>, vector<1x8x96xf32>
    %435 = vector.shape_cast %434 : vector<1x8x96xf32> to vector<8x96xf32>
    %c7_i32_176 = arith.constant 7 : i32
    %436 = arith.subi %c7_i32_176, %c4_i32 : i32
    %437 = arith.index_cast %436 : i32 to index
    %c0_177 = arith.constant 0 : index
    %c0_178 = arith.constant 0 : index
    %438 = vector.load %arg16[%437, %c0_177, %c0_178] : memref<8x8x96xf32, #tpu.memory_space<vmem>>, vector<1x8x96xf32>
    %439 = vector.shape_cast %438 : vector<1x8x96xf32> to vector<8x96xf32>
    %440 = arith.truncf %430 : vector<8x32xf32> to vector<8x32xbf16>
    %cst_179 = arith.constant dense<0.000000e+00> : vector<8x96xf32>
    %441 = tpu.matmul %440, %89, %cst_179 {dimension_numbers = #tpu.dot_dimension_numbers<[1], [0], [0], [1], [0, 0, 1, 1], [], []>} : vector<8x32xbf16>, vector<32x96xbf16>, vector<8x96xf32> -> vector<8x96xf32>
    %442 = arith.addf %441, %91 : vector<8x96xf32>
    %443 = arith.truncf %432 : vector<8x32xf32> to vector<8x32xbf16>
    %cst_180 = arith.constant dense<0.000000e+00> : vector<8x96xf32>
    %444 = tpu.matmul %443, %90, %cst_180 {dimension_numbers = #tpu.dot_dimension_numbers<[1], [0], [0], [1], [0, 0, 1, 1], [], []>} : vector<8x32xbf16>, vector<32x96xbf16>, vector<8x96xf32> -> vector<8x96xf32>
    %445 = arith.addf %444, %92 : vector<8x96xf32>
    %446 = vector.extract_strided_slice %435 {offsets = [0, 0], sizes = [8, 32], strides = [1, 1]} : vector<8x96xf32> to vector<8x32xf32>
    %447 = vector.extract_strided_slice %442 {offsets = [0, 0], sizes = [8, 32], strides = [1, 1]} : vector<8x96xf32> to vector<8x32xf32>
    %448 = arith.addf %446, %447 : vector<8x32xf32>
    %449 = arith.negf %448 : vector<8x32xf32>
    %450 = math.exp %449 : vector<8x32xf32>
    %cst_181 = arith.constant 1.000000e+00 : f32
    %451 = vector.broadcast %cst_181 : f32 to vector<8x32xf32>
    %452 = arith.addf %451, %450 : vector<8x32xf32>
    %453 = arith.divf %451, %452 : vector<8x32xf32>
    %454 = vector.extract_strided_slice %435 {offsets = [0, 32], sizes = [8, 32], strides = [1, 1]} : vector<8x96xf32> to vector<8x32xf32>
    %455 = vector.extract_strided_slice %442 {offsets = [0, 32], sizes = [8, 32], strides = [1, 1]} : vector<8x96xf32> to vector<8x32xf32>
    %456 = arith.addf %454, %455 : vector<8x32xf32>
    %457 = arith.negf %456 : vector<8x32xf32>
    %458 = math.exp %457 : vector<8x32xf32>
    %cst_182 = arith.constant 1.000000e+00 : f32
    %459 = vector.broadcast %cst_182 : f32 to vector<8x32xf32>
    %460 = arith.addf %459, %458 : vector<8x32xf32>
    %461 = arith.divf %459, %460 : vector<8x32xf32>
    %462 = vector.extract_strided_slice %435 {offsets = [0, 64], sizes = [8, 32], strides = [1, 1]} : vector<8x96xf32> to vector<8x32xf32>
    %463 = vector.extract_strided_slice %442 {offsets = [0, 64], sizes = [8, 32], strides = [1, 1]} : vector<8x96xf32> to vector<8x32xf32>
    %464 = arith.mulf %453, %463 : vector<8x32xf32>
    %465 = arith.addf %462, %464 : vector<8x32xf32>
    %466 = math.tanh %465 : vector<8x32xf32>
    %cst_183 = arith.constant 1.000000e+00 : f32
    %467 = vector.broadcast %cst_183 : f32 to vector<8x32xf32>
    %468 = arith.subf %467, %461 : vector<8x32xf32>
    %469 = arith.mulf %468, %466 : vector<8x32xf32>
    %470 = arith.mulf %461, %430 : vector<8x32xf32>
    %471 = arith.addf %469, %470 : vector<8x32xf32>
    %472 = vector.extract_strided_slice %439 {offsets = [0, 0], sizes = [8, 32], strides = [1, 1]} : vector<8x96xf32> to vector<8x32xf32>
    %473 = vector.extract_strided_slice %445 {offsets = [0, 0], sizes = [8, 32], strides = [1, 1]} : vector<8x96xf32> to vector<8x32xf32>
    %474 = arith.addf %472, %473 : vector<8x32xf32>
    %475 = arith.negf %474 : vector<8x32xf32>
    %476 = math.exp %475 : vector<8x32xf32>
    %cst_184 = arith.constant 1.000000e+00 : f32
    %477 = vector.broadcast %cst_184 : f32 to vector<8x32xf32>
    %478 = arith.addf %477, %476 : vector<8x32xf32>
    %479 = arith.divf %477, %478 : vector<8x32xf32>
    %480 = vector.extract_strided_slice %439 {offsets = [0, 32], sizes = [8, 32], strides = [1, 1]} : vector<8x96xf32> to vector<8x32xf32>
    %481 = vector.extract_strided_slice %445 {offsets = [0, 32], sizes = [8, 32], strides = [1, 1]} : vector<8x96xf32> to vector<8x32xf32>
    %482 = arith.addf %480, %481 : vector<8x32xf32>
    %483 = arith.negf %482 : vector<8x32xf32>
    %484 = math.exp %483 : vector<8x32xf32>
    %cst_185 = arith.constant 1.000000e+00 : f32
    %485 = vector.broadcast %cst_185 : f32 to vector<8x32xf32>
    %486 = arith.addf %485, %484 : vector<8x32xf32>
    %487 = arith.divf %485, %486 : vector<8x32xf32>
    %488 = vector.extract_strided_slice %439 {offsets = [0, 64], sizes = [8, 32], strides = [1, 1]} : vector<8x96xf32> to vector<8x32xf32>
    %489 = vector.extract_strided_slice %445 {offsets = [0, 64], sizes = [8, 32], strides = [1, 1]} : vector<8x96xf32> to vector<8x32xf32>
    %490 = arith.mulf %479, %489 : vector<8x32xf32>
    %491 = arith.addf %488, %490 : vector<8x32xf32>
    %492 = math.tanh %491 : vector<8x32xf32>
    %cst_186 = arith.constant 1.000000e+00 : f32
    %493 = vector.broadcast %cst_186 : f32 to vector<8x32xf32>
    %494 = arith.subf %493, %487 : vector<8x32xf32>
    %495 = arith.mulf %494, %492 : vector<8x32xf32>
    %496 = arith.mulf %487, %432 : vector<8x32xf32>
    %497 = arith.addf %495, %496 : vector<8x32xf32>
    %c0_187 = arith.constant 0 : index
    %c0_188 = arith.constant 0 : index
    %c0_189 = arith.constant 0 : index
    %498 = vector.load %arg17[%c0_187, %c0_188, %c0_189] : memref<2x8x32xf32, #tpu.memory_space<vmem>>, vector<1x8x32xf32>
    %499 = vector.shape_cast %498 : vector<1x8x32xf32> to vector<8x32xf32>
    %500 = vector.shape_cast %471 : vector<8x32xf32> to vector<1x8x32xf32>
    tpu.vector_store %arg17[%c0_187, %c0_188, %c0_189], %500 {strides = array<i32>} : memref<2x8x32xf32, #tpu.memory_space<vmem>>, vector<1x8x32xf32>,
    %c1_190 = arith.constant 1 : index
    %c0_191 = arith.constant 0 : index
    %c0_192 = arith.constant 0 : index
    %501 = vector.load %arg17[%c1_190, %c0_191, %c0_192] : memref<2x8x32xf32, #tpu.memory_space<vmem>>, vector<1x8x32xf32>
    %502 = vector.shape_cast %501 : vector<1x8x32xf32> to vector<8x32xf32>
    %503 = vector.shape_cast %497 : vector<8x32xf32> to vector<1x8x32xf32>
    tpu.vector_store %arg17[%c1_190, %c0_191, %c0_192], %503 {strides = array<i32>} : memref<2x8x32xf32, #tpu.memory_space<vmem>>, vector<1x8x32xf32>,
    %504 = arith.index_cast %c4_i32 : i32 to index
    %c0_193 = arith.constant 0 : index
    %c0_194 = arith.constant 0 : index
    %505 = vector.load %arg13[%504, %c0_193, %c0_194] : memref<8x8x32xf32, #tpu.memory_space<vmem>>, vector<1x8x32xf32>
    %506 = vector.shape_cast %505 : vector<1x8x32xf32> to vector<8x32xf32>
    %507 = vector.shape_cast %471 : vector<8x32xf32> to vector<1x8x32xf32>
    tpu.vector_store %arg13[%504, %c0_193, %c0_194], %507 {strides = array<i32>} : memref<8x8x32xf32, #tpu.memory_space<vmem>>, vector<1x8x32xf32>,
    %c7_i32_195 = arith.constant 7 : i32
    %508 = arith.subi %c7_i32_195, %c4_i32 : i32
    %509 = arith.index_cast %508 : i32 to index
    %c0_196 = arith.constant 0 : index
    %c0_197 = arith.constant 0 : index
    %510 = vector.load %arg14[%509, %c0_196, %c0_197] : memref<8x8x32xf32, #tpu.memory_space<vmem>>, vector<1x8x32xf32>
    %511 = vector.shape_cast %510 : vector<1x8x32xf32> to vector<8x32xf32>
    %512 = vector.shape_cast %497 : vector<8x32xf32> to vector<1x8x32xf32>
    tpu.vector_store %arg14[%509, %c0_196, %c0_197], %512 {strides = array<i32>} : memref<8x8x32xf32, #tpu.memory_space<vmem>>, vector<1x8x32xf32>,
    %c5_i32 = arith.constant 5 : i32
    %c0_198 = arith.constant 0 : index
    %c0_199 = arith.constant 0 : index
    %c0_200 = arith.constant 0 : index
    %513 = vector.load %arg17[%c0_198, %c0_199, %c0_200] : memref<2x8x32xf32, #tpu.memory_space<vmem>>, vector<1x8x32xf32>
    %514 = vector.shape_cast %513 : vector<1x8x32xf32> to vector<8x32xf32>
    %c1_201 = arith.constant 1 : index
    %c0_202 = arith.constant 0 : index
    %c0_203 = arith.constant 0 : index
    %515 = vector.load %arg17[%c1_201, %c0_202, %c0_203] : memref<2x8x32xf32, #tpu.memory_space<vmem>>, vector<1x8x32xf32>
    %516 = vector.shape_cast %515 : vector<1x8x32xf32> to vector<8x32xf32>
    %517 = arith.index_cast %c5_i32 : i32 to index
    %c0_204 = arith.constant 0 : index
    %c0_205 = arith.constant 0 : index
    %518 = vector.load %arg15[%517, %c0_204, %c0_205] : memref<8x8x96xf32, #tpu.memory_space<vmem>>, vector<1x8x96xf32>
    %519 = vector.shape_cast %518 : vector<1x8x96xf32> to vector<8x96xf32>
    %c7_i32_206 = arith.constant 7 : i32
    %520 = arith.subi %c7_i32_206, %c5_i32 : i32
    %521 = arith.index_cast %520 : i32 to index
    %c0_207 = arith.constant 0 : index
    %c0_208 = arith.constant 0 : index
    %522 = vector.load %arg16[%521, %c0_207, %c0_208] : memref<8x8x96xf32, #tpu.memory_space<vmem>>, vector<1x8x96xf32>
    %523 = vector.shape_cast %522 : vector<1x8x96xf32> to vector<8x96xf32>
    %524 = arith.truncf %514 : vector<8x32xf32> to vector<8x32xbf16>
    %cst_209 = arith.constant dense<0.000000e+00> : vector<8x96xf32>
    %525 = tpu.matmul %524, %89, %cst_209 {dimension_numbers = #tpu.dot_dimension_numbers<[1], [0], [0], [1], [0, 0, 1, 1], [], []>} : vector<8x32xbf16>, vector<32x96xbf16>, vector<8x96xf32> -> vector<8x96xf32>
    %526 = arith.addf %525, %91 : vector<8x96xf32>
    %527 = arith.truncf %516 : vector<8x32xf32> to vector<8x32xbf16>
    %cst_210 = arith.constant dense<0.000000e+00> : vector<8x96xf32>
    %528 = tpu.matmul %527, %90, %cst_210 {dimension_numbers = #tpu.dot_dimension_numbers<[1], [0], [0], [1], [0, 0, 1, 1], [], []>} : vector<8x32xbf16>, vector<32x96xbf16>, vector<8x96xf32> -> vector<8x96xf32>
    %529 = arith.addf %528, %92 : vector<8x96xf32>
    %530 = vector.extract_strided_slice %519 {offsets = [0, 0], sizes = [8, 32], strides = [1, 1]} : vector<8x96xf32> to vector<8x32xf32>
    %531 = vector.extract_strided_slice %526 {offsets = [0, 0], sizes = [8, 32], strides = [1, 1]} : vector<8x96xf32> to vector<8x32xf32>
    %532 = arith.addf %530, %531 : vector<8x32xf32>
    %533 = arith.negf %532 : vector<8x32xf32>
    %534 = math.exp %533 : vector<8x32xf32>
    %cst_211 = arith.constant 1.000000e+00 : f32
    %535 = vector.broadcast %cst_211 : f32 to vector<8x32xf32>
    %536 = arith.addf %535, %534 : vector<8x32xf32>
    %537 = arith.divf %535, %536 : vector<8x32xf32>
    %538 = vector.extract_strided_slice %519 {offsets = [0, 32], sizes = [8, 32], strides = [1, 1]} : vector<8x96xf32> to vector<8x32xf32>
    %539 = vector.extract_strided_slice %526 {offsets = [0, 32], sizes = [8, 32], strides = [1, 1]} : vector<8x96xf32> to vector<8x32xf32>
    %540 = arith.addf %538, %539 : vector<8x32xf32>
    %541 = arith.negf %540 : vector<8x32xf32>
    %542 = math.exp %541 : vector<8x32xf32>
    %cst_212 = arith.constant 1.000000e+00 : f32
    %543 = vector.broadcast %cst_212 : f32 to vector<8x32xf32>
    %544 = arith.addf %543, %542 : vector<8x32xf32>
    %545 = arith.divf %543, %544 : vector<8x32xf32>
    %546 = vector.extract_strided_slice %519 {offsets = [0, 64], sizes = [8, 32], strides = [1, 1]} : vector<8x96xf32> to vector<8x32xf32>
    %547 = vector.extract_strided_slice %526 {offsets = [0, 64], sizes = [8, 32], strides = [1, 1]} : vector<8x96xf32> to vector<8x32xf32>
    %548 = arith.mulf %537, %547 : vector<8x32xf32>
    %549 = arith.addf %546, %548 : vector<8x32xf32>
    %550 = math.tanh %549 : vector<8x32xf32>
    %cst_213 = arith.constant 1.000000e+00 : f32
    %551 = vector.broadcast %cst_213 : f32 to vector<8x32xf32>
    %552 = arith.subf %551, %545 : vector<8x32xf32>
    %553 = arith.mulf %552, %550 : vector<8x32xf32>
    %554 = arith.mulf %545, %514 : vector<8x32xf32>
    %555 = arith.addf %553, %554 : vector<8x32xf32>
    %556 = vector.extract_strided_slice %523 {offsets = [0, 0], sizes = [8, 32], strides = [1, 1]} : vector<8x96xf32> to vector<8x32xf32>
    %557 = vector.extract_strided_slice %529 {offsets = [0, 0], sizes = [8, 32], strides = [1, 1]} : vector<8x96xf32> to vector<8x32xf32>
    %558 = arith.addf %556, %557 : vector<8x32xf32>
    %559 = arith.negf %558 : vector<8x32xf32>
    %560 = math.exp %559 : vector<8x32xf32>
    %cst_214 = arith.constant 1.000000e+00 : f32
    %561 = vector.broadcast %cst_214 : f32 to vector<8x32xf32>
    %562 = arith.addf %561, %560 : vector<8x32xf32>
    %563 = arith.divf %561, %562 : vector<8x32xf32>
    %564 = vector.extract_strided_slice %523 {offsets = [0, 32], sizes = [8, 32], strides = [1, 1]} : vector<8x96xf32> to vector<8x32xf32>
    %565 = vector.extract_strided_slice %529 {offsets = [0, 32], sizes = [8, 32], strides = [1, 1]} : vector<8x96xf32> to vector<8x32xf32>
    %566 = arith.addf %564, %565 : vector<8x32xf32>
    %567 = arith.negf %566 : vector<8x32xf32>
    %568 = math.exp %567 : vector<8x32xf32>
    %cst_215 = arith.constant 1.000000e+00 : f32
    %569 = vector.broadcast %cst_215 : f32 to vector<8x32xf32>
    %570 = arith.addf %569, %568 : vector<8x32xf32>
    %571 = arith.divf %569, %570 : vector<8x32xf32>
    %572 = vector.extract_strided_slice %523 {offsets = [0, 64], sizes = [8, 32], strides = [1, 1]} : vector<8x96xf32> to vector<8x32xf32>
    %573 = vector.extract_strided_slice %529 {offsets = [0, 64], sizes = [8, 32], strides = [1, 1]} : vector<8x96xf32> to vector<8x32xf32>
    %574 = arith.mulf %563, %573 : vector<8x32xf32>
    %575 = arith.addf %572, %574 : vector<8x32xf32>
    %576 = math.tanh %575 : vector<8x32xf32>
    %cst_216 = arith.constant 1.000000e+00 : f32
    %577 = vector.broadcast %cst_216 : f32 to vector<8x32xf32>
    %578 = arith.subf %577, %571 : vector<8x32xf32>
    %579 = arith.mulf %578, %576 : vector<8x32xf32>
    %580 = arith.mulf %571, %516 : vector<8x32xf32>
    %581 = arith.addf %579, %580 : vector<8x32xf32>
    %c0_217 = arith.constant 0 : index
    %c0_218 = arith.constant 0 : index
    %c0_219 = arith.constant 0 : index
    %582 = vector.load %arg17[%c0_217, %c0_218, %c0_219] : memref<2x8x32xf32, #tpu.memory_space<vmem>>, vector<1x8x32xf32>
    %583 = vector.shape_cast %582 : vector<1x8x32xf32> to vector<8x32xf32>
    %584 = vector.shape_cast %555 : vector<8x32xf32> to vector<1x8x32xf32>
    tpu.vector_store %arg17[%c0_217, %c0_218, %c0_219], %584 {strides = array<i32>} : memref<2x8x32xf32, #tpu.memory_space<vmem>>, vector<1x8x32xf32>,
    %c1_220 = arith.constant 1 : index
    %c0_221 = arith.constant 0 : index
    %c0_222 = arith.constant 0 : index
    %585 = vector.load %arg17[%c1_220, %c0_221, %c0_222] : memref<2x8x32xf32, #tpu.memory_space<vmem>>, vector<1x8x32xf32>
    %586 = vector.shape_cast %585 : vector<1x8x32xf32> to vector<8x32xf32>
    %587 = vector.shape_cast %581 : vector<8x32xf32> to vector<1x8x32xf32>
    tpu.vector_store %arg17[%c1_220, %c0_221, %c0_222], %587 {strides = array<i32>} : memref<2x8x32xf32, #tpu.memory_space<vmem>>, vector<1x8x32xf32>,
    %588 = arith.index_cast %c5_i32 : i32 to index
    %c0_223 = arith.constant 0 : index
    %c0_224 = arith.constant 0 : index
    %589 = vector.load %arg13[%588, %c0_223, %c0_224] : memref<8x8x32xf32, #tpu.memory_space<vmem>>, vector<1x8x32xf32>
    %590 = vector.shape_cast %589 : vector<1x8x32xf32> to vector<8x32xf32>
    %591 = vector.shape_cast %555 : vector<8x32xf32> to vector<1x8x32xf32>
    tpu.vector_store %arg13[%588, %c0_223, %c0_224], %591 {strides = array<i32>} : memref<8x8x32xf32, #tpu.memory_space<vmem>>, vector<1x8x32xf32>,
    %c7_i32_225 = arith.constant 7 : i32
    %592 = arith.subi %c7_i32_225, %c5_i32 : i32
    %593 = arith.index_cast %592 : i32 to index
    %c0_226 = arith.constant 0 : index
    %c0_227 = arith.constant 0 : index
    %594 = vector.load %arg14[%593, %c0_226, %c0_227] : memref<8x8x32xf32, #tpu.memory_space<vmem>>, vector<1x8x32xf32>
    %595 = vector.shape_cast %594 : vector<1x8x32xf32> to vector<8x32xf32>
    %596 = vector.shape_cast %581 : vector<8x32xf32> to vector<1x8x32xf32>
    tpu.vector_store %arg14[%593, %c0_226, %c0_227], %596 {strides = array<i32>} : memref<8x8x32xf32, #tpu.memory_space<vmem>>, vector<1x8x32xf32>,
    %c6_i32 = arith.constant 6 : i32
    %c0_228 = arith.constant 0 : index
    %c0_229 = arith.constant 0 : index
    %c0_230 = arith.constant 0 : index
    %597 = vector.load %arg17[%c0_228, %c0_229, %c0_230] : memref<2x8x32xf32, #tpu.memory_space<vmem>>, vector<1x8x32xf32>
    %598 = vector.shape_cast %597 : vector<1x8x32xf32> to vector<8x32xf32>
    %c1_231 = arith.constant 1 : index
    %c0_232 = arith.constant 0 : index
    %c0_233 = arith.constant 0 : index
    %599 = vector.load %arg17[%c1_231, %c0_232, %c0_233] : memref<2x8x32xf32, #tpu.memory_space<vmem>>, vector<1x8x32xf32>
    %600 = vector.shape_cast %599 : vector<1x8x32xf32> to vector<8x32xf32>
    %601 = arith.index_cast %c6_i32 : i32 to index
    %c0_234 = arith.constant 0 : index
    %c0_235 = arith.constant 0 : index
    %602 = vector.load %arg15[%601, %c0_234, %c0_235] : memref<8x8x96xf32, #tpu.memory_space<vmem>>, vector<1x8x96xf32>
    %603 = vector.shape_cast %602 : vector<1x8x96xf32> to vector<8x96xf32>
    %c7_i32_236 = arith.constant 7 : i32
    %604 = arith.subi %c7_i32_236, %c6_i32 : i32
    %605 = arith.index_cast %604 : i32 to index
    %c0_237 = arith.constant 0 : index
    %c0_238 = arith.constant 0 : index
    %606 = vector.load %arg16[%605, %c0_237, %c0_238] : memref<8x8x96xf32, #tpu.memory_space<vmem>>, vector<1x8x96xf32>
    %607 = vector.shape_cast %606 : vector<1x8x96xf32> to vector<8x96xf32>
    %608 = arith.truncf %598 : vector<8x32xf32> to vector<8x32xbf16>
    %cst_239 = arith.constant dense<0.000000e+00> : vector<8x96xf32>
    %609 = tpu.matmul %608, %89, %cst_239 {dimension_numbers = #tpu.dot_dimension_numbers<[1], [0], [0], [1], [0, 0, 1, 1], [], []>} : vector<8x32xbf16>, vector<32x96xbf16>, vector<8x96xf32> -> vector<8x96xf32>
    %610 = arith.addf %609, %91 : vector<8x96xf32>
    %611 = arith.truncf %600 : vector<8x32xf32> to vector<8x32xbf16>
    %cst_240 = arith.constant dense<0.000000e+00> : vector<8x96xf32>
    %612 = tpu.matmul %611, %90, %cst_240 {dimension_numbers = #tpu.dot_dimension_numbers<[1], [0], [0], [1], [0, 0, 1, 1], [], []>} : vector<8x32xbf16>, vector<32x96xbf16>, vector<8x96xf32> -> vector<8x96xf32>
    %613 = arith.addf %612, %92 : vector<8x96xf32>
    %614 = vector.extract_strided_slice %603 {offsets = [0, 0], sizes = [8, 32], strides = [1, 1]} : vector<8x96xf32> to vector<8x32xf32>
    %615 = vector.extract_strided_slice %610 {offsets = [0, 0], sizes = [8, 32], strides = [1, 1]} : vector<8x96xf32> to vector<8x32xf32>
    %616 = arith.addf %614, %615 : vector<8x32xf32>
    %617 = arith.negf %616 : vector<8x32xf32>
    %618 = math.exp %617 : vector<8x32xf32>
    %cst_241 = arith.constant 1.000000e+00 : f32
    %619 = vector.broadcast %cst_241 : f32 to vector<8x32xf32>
    %620 = arith.addf %619, %618 : vector<8x32xf32>
    %621 = arith.divf %619, %620 : vector<8x32xf32>
    %622 = vector.extract_strided_slice %603 {offsets = [0, 32], sizes = [8, 32], strides = [1, 1]} : vector<8x96xf32> to vector<8x32xf32>
    %623 = vector.extract_strided_slice %610 {offsets = [0, 32], sizes = [8, 32], strides = [1, 1]} : vector<8x96xf32> to vector<8x32xf32>
    %624 = arith.addf %622, %623 : vector<8x32xf32>
    %625 = arith.negf %624 : vector<8x32xf32>
    %626 = math.exp %625 : vector<8x32xf32>
    %cst_242 = arith.constant 1.000000e+00 : f32
    %627 = vector.broadcast %cst_242 : f32 to vector<8x32xf32>
    %628 = arith.addf %627, %626 : vector<8x32xf32>
    %629 = arith.divf %627, %628 : vector<8x32xf32>
    %630 = vector.extract_strided_slice %603 {offsets = [0, 64], sizes = [8, 32], strides = [1, 1]} : vector<8x96xf32> to vector<8x32xf32>
    %631 = vector.extract_strided_slice %610 {offsets = [0, 64], sizes = [8, 32], strides = [1, 1]} : vector<8x96xf32> to vector<8x32xf32>
    %632 = arith.mulf %621, %631 : vector<8x32xf32>
    %633 = arith.addf %630, %632 : vector<8x32xf32>
    %634 = math.tanh %633 : vector<8x32xf32>
    %cst_243 = arith.constant 1.000000e+00 : f32
    %635 = vector.broadcast %cst_243 : f32 to vector<8x32xf32>
    %636 = arith.subf %635, %629 : vector<8x32xf32>
    %637 = arith.mulf %636, %634 : vector<8x32xf32>
    %638 = arith.mulf %629, %598 : vector<8x32xf32>
    %639 = arith.addf %637, %638 : vector<8x32xf32>
    %640 = vector.extract_strided_slice %607 {offsets = [0, 0], sizes = [8, 32], strides = [1, 1]} : vector<8x96xf32> to vector<8x32xf32>
    %641 = vector.extract_strided_slice %613 {offsets = [0, 0], sizes = [8, 32], strides = [1, 1]} : vector<8x96xf32> to vector<8x32xf32>
    %642 = arith.addf %640, %641 : vector<8x32xf32>
    %643 = arith.negf %642 : vector<8x32xf32>
    %644 = math.exp %643 : vector<8x32xf32>
    %cst_244 = arith.constant 1.000000e+00 : f32
    %645 = vector.broadcast %cst_244 : f32 to vector<8x32xf32>
    %646 = arith.addf %645, %644 : vector<8x32xf32>
    %647 = arith.divf %645, %646 : vector<8x32xf32>
    %648 = vector.extract_strided_slice %607 {offsets = [0, 32], sizes = [8, 32], strides = [1, 1]} : vector<8x96xf32> to vector<8x32xf32>
    %649 = vector.extract_strided_slice %613 {offsets = [0, 32], sizes = [8, 32], strides = [1, 1]} : vector<8x96xf32> to vector<8x32xf32>
    %650 = arith.addf %648, %649 : vector<8x32xf32>
    %651 = arith.negf %650 : vector<8x32xf32>
    %652 = math.exp %651 : vector<8x32xf32>
    %cst_245 = arith.constant 1.000000e+00 : f32
    %653 = vector.broadcast %cst_245 : f32 to vector<8x32xf32>
    %654 = arith.addf %653, %652 : vector<8x32xf32>
    %655 = arith.divf %653, %654 : vector<8x32xf32>
    %656 = vector.extract_strided_slice %607 {offsets = [0, 64], sizes = [8, 32], strides = [1, 1]} : vector<8x96xf32> to vector<8x32xf32>
    %657 = vector.extract_strided_slice %613 {offsets = [0, 64], sizes = [8, 32], strides = [1, 1]} : vector<8x96xf32> to vector<8x32xf32>
    %658 = arith.mulf %647, %657 : vector<8x32xf32>
    %659 = arith.addf %656, %658 : vector<8x32xf32>
    %660 = math.tanh %659 : vector<8x32xf32>
    %cst_246 = arith.constant 1.000000e+00 : f32
    %661 = vector.broadcast %cst_246 : f32 to vector<8x32xf32>
    %662 = arith.subf %661, %655 : vector<8x32xf32>
    %663 = arith.mulf %662, %660 : vector<8x32xf32>
    %664 = arith.mulf %655, %600 : vector<8x32xf32>
    %665 = arith.addf %663, %664 : vector<8x32xf32>
    %c0_247 = arith.constant 0 : index
    %c0_248 = arith.constant 0 : index
    %c0_249 = arith.constant 0 : index
    %666 = vector.load %arg17[%c0_247, %c0_248, %c0_249] : memref<2x8x32xf32, #tpu.memory_space<vmem>>, vector<1x8x32xf32>
    %667 = vector.shape_cast %666 : vector<1x8x32xf32> to vector<8x32xf32>
    %668 = vector.shape_cast %639 : vector<8x32xf32> to vector<1x8x32xf32>
    tpu.vector_store %arg17[%c0_247, %c0_248, %c0_249], %668 {strides = array<i32>} : memref<2x8x32xf32, #tpu.memory_space<vmem>>, vector<1x8x32xf32>,
    %c1_250 = arith.constant 1 : index
    %c0_251 = arith.constant 0 : index
    %c0_252 = arith.constant 0 : index
    %669 = vector.load %arg17[%c1_250, %c0_251, %c0_252] : memref<2x8x32xf32, #tpu.memory_space<vmem>>, vector<1x8x32xf32>
    %670 = vector.shape_cast %669 : vector<1x8x32xf32> to vector<8x32xf32>
    %671 = vector.shape_cast %665 : vector<8x32xf32> to vector<1x8x32xf32>
    tpu.vector_store %arg17[%c1_250, %c0_251, %c0_252], %671 {strides = array<i32>} : memref<2x8x32xf32, #tpu.memory_space<vmem>>, vector<1x8x32xf32>,
    %672 = arith.index_cast %c6_i32 : i32 to index
    %c0_253 = arith.constant 0 : index
    %c0_254 = arith.constant 0 : index
    %673 = vector.load %arg13[%672, %c0_253, %c0_254] : memref<8x8x32xf32, #tpu.memory_space<vmem>>, vector<1x8x32xf32>
    %674 = vector.shape_cast %673 : vector<1x8x32xf32> to vector<8x32xf32>
    %675 = vector.shape_cast %639 : vector<8x32xf32> to vector<1x8x32xf32>
    tpu.vector_store %arg13[%672, %c0_253, %c0_254], %675 {strides = array<i32>} : memref<8x8x32xf32, #tpu.memory_space<vmem>>, vector<1x8x32xf32>,
    %c7_i32_255 = arith.constant 7 : i32
    %676 = arith.subi %c7_i32_255, %c6_i32 : i32
    %677 = arith.index_cast %676 : i32 to index
    %c0_256 = arith.constant 0 : index
    %c0_257 = arith.constant 0 : index
    %678 = vector.load %arg14[%677, %c0_256, %c0_257] : memref<8x8x32xf32, #tpu.memory_space<vmem>>, vector<1x8x32xf32>
    %679 = vector.shape_cast %678 : vector<1x8x32xf32> to vector<8x32xf32>
    %680 = vector.shape_cast %665 : vector<8x32xf32> to vector<1x8x32xf32>
    tpu.vector_store %arg14[%677, %c0_256, %c0_257], %680 {strides = array<i32>} : memref<8x8x32xf32, #tpu.memory_space<vmem>>, vector<1x8x32xf32>,
    %c7_i32_258 = arith.constant 7 : i32
    %c0_259 = arith.constant 0 : index
    %c0_260 = arith.constant 0 : index
    %c0_261 = arith.constant 0 : index
    %681 = vector.load %arg17[%c0_259, %c0_260, %c0_261] : memref<2x8x32xf32, #tpu.memory_space<vmem>>, vector<1x8x32xf32>
    %682 = vector.shape_cast %681 : vector<1x8x32xf32> to vector<8x32xf32>
    %c1_262 = arith.constant 1 : index
    %c0_263 = arith.constant 0 : index
    %c0_264 = arith.constant 0 : index
    %683 = vector.load %arg17[%c1_262, %c0_263, %c0_264] : memref<2x8x32xf32, #tpu.memory_space<vmem>>, vector<1x8x32xf32>
    %684 = vector.shape_cast %683 : vector<1x8x32xf32> to vector<8x32xf32>
    %685 = arith.index_cast %c7_i32_258 : i32 to index
    %c0_265 = arith.constant 0 : index
    %c0_266 = arith.constant 0 : index
    %686 = vector.load %arg15[%685, %c0_265, %c0_266] : memref<8x8x96xf32, #tpu.memory_space<vmem>>, vector<1x8x96xf32>
    %687 = vector.shape_cast %686 : vector<1x8x96xf32> to vector<8x96xf32>
    %c7_i32_267 = arith.constant 7 : i32
    %688 = arith.subi %c7_i32_267, %c7_i32_258 : i32
    %689 = arith.index_cast %688 : i32 to index
    %c0_268 = arith.constant 0 : index
    %c0_269 = arith.constant 0 : index
    %690 = vector.load %arg16[%689, %c0_268, %c0_269] : memref<8x8x96xf32, #tpu.memory_space<vmem>>, vector<1x8x96xf32>
    %691 = vector.shape_cast %690 : vector<1x8x96xf32> to vector<8x96xf32>
    %692 = arith.truncf %682 : vector<8x32xf32> to vector<8x32xbf16>
    %cst_270 = arith.constant dense<0.000000e+00> : vector<8x96xf32>
    %693 = tpu.matmul %692, %89, %cst_270 {dimension_numbers = #tpu.dot_dimension_numbers<[1], [0], [0], [1], [0, 0, 1, 1], [], []>} : vector<8x32xbf16>, vector<32x96xbf16>, vector<8x96xf32> -> vector<8x96xf32>
    %694 = arith.addf %693, %91 : vector<8x96xf32>
    %695 = arith.truncf %684 : vector<8x32xf32> to vector<8x32xbf16>
    %cst_271 = arith.constant dense<0.000000e+00> : vector<8x96xf32>
    %696 = tpu.matmul %695, %90, %cst_271 {dimension_numbers = #tpu.dot_dimension_numbers<[1], [0], [0], [1], [0, 0, 1, 1], [], []>} : vector<8x32xbf16>, vector<32x96xbf16>, vector<8x96xf32> -> vector<8x96xf32>
    %697 = arith.addf %696, %92 : vector<8x96xf32>
    %698 = vector.extract_strided_slice %687 {offsets = [0, 0], sizes = [8, 32], strides = [1, 1]} : vector<8x96xf32> to vector<8x32xf32>
    %699 = vector.extract_strided_slice %694 {offsets = [0, 0], sizes = [8, 32], strides = [1, 1]} : vector<8x96xf32> to vector<8x32xf32>
    %700 = arith.addf %698, %699 : vector<8x32xf32>
    %701 = arith.negf %700 : vector<8x32xf32>
    %702 = math.exp %701 : vector<8x32xf32>
    %cst_272 = arith.constant 1.000000e+00 : f32
    %703 = vector.broadcast %cst_272 : f32 to vector<8x32xf32>
    %704 = arith.addf %703, %702 : vector<8x32xf32>
    %705 = arith.divf %703, %704 : vector<8x32xf32>
    %706 = vector.extract_strided_slice %687 {offsets = [0, 32], sizes = [8, 32], strides = [1, 1]} : vector<8x96xf32> to vector<8x32xf32>
    %707 = vector.extract_strided_slice %694 {offsets = [0, 32], sizes = [8, 32], strides = [1, 1]} : vector<8x96xf32> to vector<8x32xf32>
    %708 = arith.addf %706, %707 : vector<8x32xf32>
    %709 = arith.negf %708 : vector<8x32xf32>
    %710 = math.exp %709 : vector<8x32xf32>
    %cst_273 = arith.constant 1.000000e+00 : f32
    %711 = vector.broadcast %cst_273 : f32 to vector<8x32xf32>
    %712 = arith.addf %711, %710 : vector<8x32xf32>
    %713 = arith.divf %711, %712 : vector<8x32xf32>
    %714 = vector.extract_strided_slice %687 {offsets = [0, 64], sizes = [8, 32], strides = [1, 1]} : vector<8x96xf32> to vector<8x32xf32>
    %715 = vector.extract_strided_slice %694 {offsets = [0, 64], sizes = [8, 32], strides = [1, 1]} : vector<8x96xf32> to vector<8x32xf32>
    %716 = arith.mulf %705, %715 : vector<8x32xf32>
    %717 = arith.addf %714, %716 : vector<8x32xf32>
    %718 = math.tanh %717 : vector<8x32xf32>
    %cst_274 = arith.constant 1.000000e+00 : f32
    %719 = vector.broadcast %cst_274 : f32 to vector<8x32xf32>
    %720 = arith.subf %719, %713 : vector<8x32xf32>
    %721 = arith.mulf %720, %718 : vector<8x32xf32>
    %722 = arith.mulf %713, %682 : vector<8x32xf32>
    %723 = arith.addf %721, %722 : vector<8x32xf32>
    %724 = vector.extract_strided_slice %691 {offsets = [0, 0], sizes = [8, 32], strides = [1, 1]} : vector<8x96xf32> to vector<8x32xf32>
    %725 = vector.extract_strided_slice %697 {offsets = [0, 0], sizes = [8, 32], strides = [1, 1]} : vector<8x96xf32> to vector<8x32xf32>
    %726 = arith.addf %724, %725 : vector<8x32xf32>
    %727 = arith.negf %726 : vector<8x32xf32>
    %728 = math.exp %727 : vector<8x32xf32>
    %cst_275 = arith.constant 1.000000e+00 : f32
    %729 = vector.broadcast %cst_275 : f32 to vector<8x32xf32>
    %730 = arith.addf %729, %728 : vector<8x32xf32>
    %731 = arith.divf %729, %730 : vector<8x32xf32>
    %732 = vector.extract_strided_slice %691 {offsets = [0, 32], sizes = [8, 32], strides = [1, 1]} : vector<8x96xf32> to vector<8x32xf32>
    %733 = vector.extract_strided_slice %697 {offsets = [0, 32], sizes = [8, 32], strides = [1, 1]} : vector<8x96xf32> to vector<8x32xf32>
    %734 = arith.addf %732, %733 : vector<8x32xf32>
    %735 = arith.negf %734 : vector<8x32xf32>
    %736 = math.exp %735 : vector<8x32xf32>
    %cst_276 = arith.constant 1.000000e+00 : f32
    %737 = vector.broadcast %cst_276 : f32 to vector<8x32xf32>
    %738 = arith.addf %737, %736 : vector<8x32xf32>
    %739 = arith.divf %737, %738 : vector<8x32xf32>
    %740 = vector.extract_strided_slice %691 {offsets = [0, 64], sizes = [8, 32], strides = [1, 1]} : vector<8x96xf32> to vector<8x32xf32>
    %741 = vector.extract_strided_slice %697 {offsets = [0, 64], sizes = [8, 32], strides = [1, 1]} : vector<8x96xf32> to vector<8x32xf32>
    %742 = arith.mulf %731, %741 : vector<8x32xf32>
    %743 = arith.addf %740, %742 : vector<8x32xf32>
    %744 = math.tanh %743 : vector<8x32xf32>
    %cst_277 = arith.constant 1.000000e+00 : f32
    %745 = vector.broadcast %cst_277 : f32 to vector<8x32xf32>
    %746 = arith.subf %745, %739 : vector<8x32xf32>
    %747 = arith.mulf %746, %744 : vector<8x32xf32>
    %748 = arith.mulf %739, %684 : vector<8x32xf32>
    %749 = arith.addf %747, %748 : vector<8x32xf32>
    %c0_278 = arith.constant 0 : index
    %c0_279 = arith.constant 0 : index
    %c0_280 = arith.constant 0 : index
    %750 = vector.load %arg17[%c0_278, %c0_279, %c0_280] : memref<2x8x32xf32, #tpu.memory_space<vmem>>, vector<1x8x32xf32>
    %751 = vector.shape_cast %750 : vector<1x8x32xf32> to vector<8x32xf32>
    %752 = vector.shape_cast %723 : vector<8x32xf32> to vector<1x8x32xf32>
    tpu.vector_store %arg17[%c0_278, %c0_279, %c0_280], %752 {strides = array<i32>} : memref<2x8x32xf32, #tpu.memory_space<vmem>>, vector<1x8x32xf32>,
    %c1_281 = arith.constant 1 : index
    %c0_282 = arith.constant 0 : index
    %c0_283 = arith.constant 0 : index
    %753 = vector.load %arg17[%c1_281, %c0_282, %c0_283] : memref<2x8x32xf32, #tpu.memory_space<vmem>>, vector<1x8x32xf32>
    %754 = vector.shape_cast %753 : vector<1x8x32xf32> to vector<8x32xf32>
    %755 = vector.shape_cast %749 : vector<8x32xf32> to vector<1x8x32xf32>
    tpu.vector_store %arg17[%c1_281, %c0_282, %c0_283], %755 {strides = array<i32>} : memref<2x8x32xf32, #tpu.memory_space<vmem>>, vector<1x8x32xf32>,
    %756 = arith.index_cast %c7_i32_258 : i32 to index
    %c0_284 = arith.constant 0 : index
    %c0_285 = arith.constant 0 : index
    %757 = vector.load %arg13[%756, %c0_284, %c0_285] : memref<8x8x32xf32, #tpu.memory_space<vmem>>, vector<1x8x32xf32>
    %758 = vector.shape_cast %757 : vector<1x8x32xf32> to vector<8x32xf32>
    %759 = vector.shape_cast %723 : vector<8x32xf32> to vector<1x8x32xf32>
    tpu.vector_store %arg13[%756, %c0_284, %c0_285], %759 {strides = array<i32>} : memref<8x8x32xf32, #tpu.memory_space<vmem>>, vector<1x8x32xf32>,
    %c7_i32_286 = arith.constant 7 : i32
    %760 = arith.subi %c7_i32_286, %c7_i32_258 : i32
    %761 = arith.index_cast %760 : i32 to index
    %c0_287 = arith.constant 0 : index
    %c0_288 = arith.constant 0 : index
    %762 = vector.load %arg14[%761, %c0_287, %c0_288] : memref<8x8x32xf32, #tpu.memory_space<vmem>>, vector<1x8x32xf32>
    %763 = vector.shape_cast %762 : vector<1x8x32xf32> to vector<8x32xf32>
    %764 = vector.shape_cast %749 : vector<8x32xf32> to vector<1x8x32xf32>
    tpu.vector_store %arg14[%761, %c0_287, %c0_288], %764 {strides = array<i32>} : memref<8x8x32xf32, #tpu.memory_space<vmem>>, vector<1x8x32xf32>,
    %c8_i32 = arith.constant 8 : i32
    return
  }
  func.func @transform_0(%arg0: i32) -> (i32, i32, i32) {
    %c0_i32 = arith.constant 0 : i32
    %c0_i32_0 = arith.constant 0 : i32
    %c0_i32_1 = arith.constant 0 : i32
    return %arg0, %c0_i32, %c0_i32_0 : i32, i32, i32
  }
  func.func @transform_1(%arg0: i32) -> (i32, i32, i32) {
    %c0_i32 = arith.constant 0 : i32
    %0 = arith.subi %c0_i32, %arg0 : i32
    %c0_i32_0 = arith.constant 0 : i32
    %c0_i32_1 = arith.constant 0 : i32
    %c0_i32_2 = arith.constant 0 : i32
    return %0, %c0_i32_0, %c0_i32_1 : i32, i32, i32
  }
  func.func @transform_2(%arg0: i32) -> (i32, i32) {
    %c0_i32 = arith.constant 0 : i32
    %c0_i32_0 = arith.constant 0 : i32
    %c0_i32_1 = arith.constant 0 : i32
    return %c0_i32, %c0_i32_0 : i32, i32
  }
  func.func @transform_3(%arg0: i32) -> (i32, i32) {
    %c0_i32 = arith.constant 0 : i32
    %c0_i32_0 = arith.constant 0 : i32
    %c0_i32_1 = arith.constant 0 : i32
    return %c0_i32, %c0_i32_0 : i32, i32
  }
  func.func @transform_4(%arg0: i32) -> (i32, i32) {
    %c0_i32 = arith.constant 0 : i32
    %c0_i32_0 = arith.constant 0 : i32
    %c0_i32_1 = arith.constant 0 : i32
    return %c0_i32, %c0_i32_0 : i32, i32
  }
  func.func @transform_5(%arg0: i32) -> (i32, i32) {
    %c0_i32 = arith.constant 0 : i32
    %c0_i32_0 = arith.constant 0 : i32
    %c0_i32_1 = arith.constant 0 : i32
    return %c0_i32, %c0_i32_0 : i32, i32
  }
  func.func @transform_6(%arg0: i32) -> (i32, i32) {
    %c0_i32 = arith.constant 0 : i32
    %c0_i32_0 = arith.constant 0 : i32
    %c0_i32_1 = arith.constant 0 : i32
    return %c0_i32, %c0_i32_0 : i32, i32
  }
  func.func @transform_7(%arg0: i32) -> (i32, i32) {
    %c0_i32 = arith.constant 0 : i32
    %c0_i32_0 = arith.constant 0 : i32
    %c0_i32_1 = arith.constant 0 : i32
    return %c0_i32, %c0_i32_0 : i32, i32
  }
  func.func @transform_8(%arg0: i32) -> (i32, i32) {
    %c0_i32 = arith.constant 0 : i32
    %c0_i32_0 = arith.constant 0 : i32
    %c0_i32_1 = arith.constant 0 : i32
    return %c0_i32, %c0_i32_0 : i32, i32
  }
  func.func @transform_9(%arg0: i32) -> (i32, i32) {
    %c0_i32 = arith.constant 0 : i32
    %c0_i32_0 = arith.constant 0 : i32
    %c0_i32_1 = arith.constant 0 : i32
    return %c0_i32, %c0_i32_0 : i32, i32
  }
  func.func @transform_10(%arg0: i32) -> (i32, i32) {
    %c0_i32 = arith.constant 0 : i32
    %c0_i32_0 = arith.constant 0 : i32
    %c0_i32_1 = arith.constant 0 : i32
    return %c0_i32, %c0_i32_0 : i32, i32
  }
  func.func @transform_11(%arg0: i32) -> (i32, i32) {
    %c0_i32 = arith.constant 0 : i32
    %c0_i32_0 = arith.constant 0 : i32
    %c0_i32_1 = arith.constant 0 : i32
    return %c0_i32, %c0_i32_0 : i32, i32
  }
  func.func @transform_12(%arg0: i32) -> (i32, i32, i32) {
    %c0_i32 = arith.constant 0 : i32
    %c0_i32_0 = arith.constant 0 : i32
    %c0_i32_1 = arith.constant 0 : i32
    return %arg0, %c0_i32, %c0_i32_0 : i32, i32, i32
  }
  func.func @transform_13(%arg0: i32) -> (i32, i32, i32) {
    %c0_i32 = arith.constant 0 : i32
    %0 = arith.subi %c0_i32, %arg0 : i32
    %c0_i32_0 = arith.constant 0 : i32
    %c0_i32_1 = arith.constant 0 : i32
    %c0_i32_2 = arith.constant 0 : i32
    return %0, %c0_i32_0, %c0_i32_1 : i32, i32, i32
  }
}

</mosaic_0001>

<bundles_post_ra>
// kernel: bidirectional_gru_forward.1
= control target key start
LH: loop header
LB: loop body
LE: loop exit
PB: predicated region body
PF: predicated region fallthrough
CT: control target
= control target key end

     0   :  { %vm97_vm0 = vcmask 523264   ;;  %vm84_vm1 = vcmask 261120   ;;  %vm2586_vm2 = vmmov 0   ;;  %vm391_vm3 = vcmask 785408   ;;  %s2587_s15 = smov 64   ;;  %s2588_s16 = smov 32   ;;  %s3368_s0 = inlined_call_operand.vmem [shape: f32[8,8,64], index: 0, kind: input, shape index: {}, may-alias: {0,1}]   ;;  %s3369_s1 = inlined_call_operand.vmem [shape: f32[8,8,64], index: 1, kind: input, shape index: {}, may-alias: {0,1}]   ;;  %s3370_s4 = inlined_call_operand.vmem [shape: bf16[64,96], index: 4, kind: input, shape index: {}]   ;;  %s3371_s5 = inlined_call_operand.vmem [shape: bf16[64,96], index: 5, kind: input, shape index: {}]   ;;  %s3372_s8 = inlined_call_operand.vmem [shape: bf16[32,96], index: 8, kind: input, shape index: {}]   ;;  %s3373_s9 = inlined_call_operand.vmem [shape: bf16[32,96], index: 9, kind: input, shape index: {}]   ;;  %s3374_s2 = inlined_call_operand.vmem [shape: f32[1,64], index: 2, kind: input, shape index: {}]   ;;  %s3375_s3 = inlined_call_operand.vmem [shape: f32[1,64], index: 3, kind: input, shape index: {}]   ;;  %s3376_s6 = inlined_call_operand.vmem [shape: f32[1,96], index: 6, kind: input, shape index: {}]   ;;  %s3377_s7 = inlined_call_operand.vmem [shape: f32[1,96], index: 7, kind: input, shape index: {}]   ;;  %s3378_s10 = inlined_call_operand.vmem [shape: f32[8,96], index: 10, kind: input, shape index: {}]   ;;  %s3379_s11 = inlined_call_operand.vmem [shape: f32[8,96], index: 11, kind: input, shape index: {}]   ;;  %s3380_s12 = inlined_call_operand.vmem [shape: f32[8,8,32], index: 12, kind: output, shape index: {0}]   ;;  %s3381_s13 = inlined_call_operand.vmem [shape: f32[8,8,32], index: 13, kind: output, shape index: {1}]  }
   0x1   :  { %v89_v0 = vld [vmem:[%s3368_s0] sm:$0xff]  ;;  %v90_v2 = vld [vmem:[%s3368_s0 + $0x8] sm:$0xff]  ;;  %v91_v8 = vld [vmem:[%s3368_s0 + $0x10] sm:$0xff]  ;;  %s2589_s17 = smov 96  }
   0x2   :  { %v400_v1 = vld [vmem:[%s3369_s1] sm:$0xff]  ;;  %v98_v3 = vsel %vm97_vm0, %v89_v0, 0.0  ;;  %v401_v5 = vld [vmem:[%s3369_s1 + $0x8] sm:$0xff]  ;;  %v101_v6 = vsel %vm97_vm0, %v90_v2, 0.0  ;;  %v92_v9 = vld [vmem:[%s3368_s0 + $0x18] sm:$0xff]  ;;  %v104_v10 = vsel %vm97_vm0, %v91_v8, 0.0 }
   0x3   :  { %v408_v4 = vsel %vm97_vm0, %v400_v1, 0.0  ;;  %99 = vadd.xlane.f32.xlu0 %v98_v3  ;;  %v411_v7 = vsel %vm97_vm0, %v401_v5, 0.0  ;;  %v107_v11 = vsel %vm97_vm0, %v92_v9, 0.0  ;;  %v2687_v12 = vld [vmem:[%s3369_s1 + $0x10] sm:$0xff]  ;;  %v2692_v13 = vld [vmem:[%s3369_s1 + $0x18] sm:$0xff]  ;;  %v2701_v16 = vld [vmem:[%s3368_s0 + $0x20] sm:$0xff] }
   0x4   :  { %409 = vadd.xlane.f32.xlu1 %v408_v4  ;;  %v414_v14 = vsel %vm97_vm0, %v2687_v12, 0.0  ;;  %v417_v15 = vsel %vm97_vm0, %v2692_v13, 0.0  ;;  %v2706_v17 = vld [vmem:[%s3368_s0 + $0x28] sm:$0xff]  ;;  %v110_v18 = vsel %vm97_vm0, %v2701_v16, 0.0  ;;  %v2715_v20 = vld [vmem:[%s3369_s1 + $0x20] sm:$0xff]  ;;  %v2729_v24 = vld [vmem:[%s3368_s0 + $0x30] sm:$0xff] }
   0x5   :  { %v113_v19 = vsel %vm97_vm0, %v2706_v17, 0.0  ;;  %v2720_v21 = vld [vmem:[%s3369_s1 + $0x28] sm:$0xff]  ;;  %v420_v22 = vsel %vm97_vm0, %v2715_v20, 0.0  ;;  %v2734_v25 = vld [vmem:[%s3368_s0 + $0x38] sm:$0xff]  ;;  %v116_v26 = vsel %vm97_vm0, %v2729_v24, 0.0  ;;  %v2743_v28 = vld [vmem:[%s3369_s1 + $0x30] sm:$0xff] }
   0x6   :  { %v423_v23 = vsel %vm97_vm0, %v2720_v21, 0.0  ;;  %v119_v27 = vsel %vm97_vm0, %v2734_v25, 0.0  ;;  %v2748_v29 = vld [vmem:[%s3369_s1 + $0x38] sm:$0xff]  ;;  %v426_v30 = vsel %vm97_vm0, %v2743_v28, 0.0 }
   0x7   :  { %102 = vadd.xlane.f32.xlu0 %v101_v6  ;;  %v429_v31 = vsel %vm97_vm0, %v2748_v29, 0.0 }
   0x8   :  { %412 = vadd.xlane.f32.xlu1 %v411_v7 }
   0xb   :  { %105 = vadd.xlane.f32.xlu0 %v104_v10 }
   0xc   :  { %108 = vadd.xlane.f32.xlu1 %v107_v11 }
   0xf   :  { %415 = vadd.xlane.f32.xlu0 %v414_v14 }
  0x10   :  { %418 = vadd.xlane.f32.xlu1 %v417_v15 }
  0x13   :  { %111 = vadd.xlane.f32.xlu0 %v110_v18 }
  0x14   :  { %114 = vadd.xlane.f32.xlu1 %v113_v19 }
  0x17   :  { %421 = vadd.xlane.f32.xlu0 %v420_v22 }
  0x18   :  { %424 = vadd.xlane.f32.xlu1 %v423_v23 }
  0x1b   :  { %117 = vadd.xlane.f32.xlu0 %v116_v26 }
  0x1c   :  { %120 = vadd.xlane.f32.xlu1 %v119_v27 }
  0x1f   :  { %427 = vadd.xlane.f32.xlu0 %v426_v30 }
  0x20   :  { %430 = vadd.xlane.f32.xlu1 %v429_v31 }
  0x90   :  { %v100_v32 = vpop.xlane.xlu0 %99 }
  0x91   :  { %v410_v33 = vpop.xlane.xlu1 %409  ;;  %v123_v34 = vmul.f32 0.015625, %v100_v32 }
  0x92   :  { %v432_v35 = vmul.f32 0.015625, %v410_v33 }
  0x93   :  { %v2754_v36 = vsub.f32 %v89_v0, %v123_v34 }
  0x94   :  { %v2756_v37 = vsub.f32 %v400_v1, %v432_v35  ;;  %v103_v38 = vpop.xlane.xlu0 %102 }
  0x95   :  { %v413_v39 = vpop.xlane.xlu1 %412  ;;  %v124_v40 = vmul.f32 0.015625, %v103_v38  ;;  %v139_v42 = vmul.f32 %v2754_v36, %v2754_v36 }
  0x96   :  { %v433_v41 = vmul.f32 0.015625, %v413_v39  ;;  %v448_v43 = vmul.f32 %v2756_v37, %v2756_v37 }
  0x97   :  { %v2762_v44 = vsub.f32 %v90_v2, %v124_v40  ;;  %v147_v46 = vsel %vm97_vm0, %v139_v42, 0.0 }
  0x98   :  { %v2764_v45 = vsub.f32 %v401_v5, %v433_v41  ;;  %148 = vadd.xlane.f32.xlu0 %v147_v46  ;;  %v106_v47 = vpop.xlane.xlu0 %105  ;;  %v456_v49 = vsel %vm97_vm0, %v448_v43, 0.0 }
  0x99   :  { %v109_v48 = vpop.xlane.xlu1 %108  ;;  %v125_v50 = vmul.f32 0.015625, %v106_v47  ;;  %v140_v52 = vmul.f32 %v2762_v44, %v2762_v44 }
  0x9a   :  { %v126_v51 = vmul.f32 0.015625, %v109_v48  ;;  %v449_v53 = vmul.f32 %v2764_v45, %v2764_v45 }
  0x9b   :  { %v2772_v54 = vsub.f32 %v91_v8, %v125_v50  ;;  %v150_v56 = vsel %vm97_vm0, %v140_v52, 0.0 }
  0x9c   :  { %v2774_v55 = vsub.f32 %v92_v9, %v126_v51  ;;  %457 = vadd.xlane.f32.xlu0 %v456_v49  ;;  %151 = vadd.xlane.f32.xlu1 %v150_v56  ;;  %v416_v57 = vpop.xlane.xlu0 %415  ;;  %v459_v59 = vsel %vm97_vm0, %v449_v53, 0.0  ;;  %v2408_v53 = vld [vmem:[%s3370_s4 + $0x8] sm:$0xff]   ;;  %v2409_v56 = vld [vmem:[%s3371_s5] sm:$0xff]  }
  0x9d   :  { %v419_v58 = vpop.xlane.xlu1 %418  ;;  %v434_v60 = vmul.f32 0.015625, %v416_v57  ;;  %v141_v62 = vmul.f32 %v2772_v54, %v2772_v54  ;;  %2258 = vmatprep.subr.bf16.mxu1 %v2409_v56  ;;  %v2410_v57 = vld [vmem:[%s3370_s4 + $0x10] sm:$0xff]  }
  0x9e   :  { %v435_v61 = vmul.f32 0.015625, %v419_v58  ;;  %v142_v63 = vmul.f32 %v2774_v55, %v2774_v55  ;;  %2259 = vmatpush3.bf16.msra.mxu1 %v2409_v56  ;;  %v2411_v58 = vld [vmem:[%s3371_s5 + $0x8] sm:$0xff]  }
  0x9f   :  { %v2783_v0 = vsub.f32 %v2687_v12, %v434_v60  ;;  %v153_v2 = vsel %vm97_vm0, %v141_v62, 0.0  ;;  %2260 = vmatprep.subr.bf16.mxu1 %v2411_v58  ;;  %v2413_v60 = vld [vmem:[%s3371_s5 + $0x10] sm:$0xff]   ;;  %v2585_v62 = vmov 0.0  }
  0xa0   :  { %v2786_v1 = vsub.f32 %v2692_v13, %v435_v61  ;;  %460 = vadd.xlane.f32.xlu1 %v459_v59  ;;  %154 = vadd.xlane.f32.xlu0 %v153_v2  ;;  %v112_v3 = vpop.xlane.xlu0 %111  ;;  %v156_v5 = vsel %vm97_vm0, %v142_v63, 0.0  ;;  %v2412_v59 = vld [vmem:[%s3370_s4 + $0x18] sm:$0xff]   ;;  %85 = vst.msk [vmem:[#allocation4] sm:$0xff] %vm84_vm1, %v2585_v62  ;;  %86 = vst.msk [vmem:[#allocation4 + $0x8] sm:$0xff] %vm84_vm1, %v2585_v62 }
  0xa1   :  { %v115_v4 = vpop.xlane.xlu1 %114  ;;  %v127_v6 = vmul.f32 0.015625, %v112_v3  ;;  %v450_v8 = vmul.f32 %v2783_v0, %v2783_v0  ;;  %v2414_v61 = vld [vmem:[%s3371_s5 + $0x18] sm:$0xff]  }
  0xa2   :  { %v128_v7 = vmul.f32 0.015625, %v115_v4  ;;  %v451_v9 = vmul.f32 %v2786_v1, %v2786_v1  ;;  %2261 = vmatpush3.bf16.msra.mxu1 %v2411_v58 }
  0xa3   :  { %v2795_v10 = vsub.f32 %v2701_v16, %v127_v6  ;;  %v462_v12 = vsel %vm97_vm0, %v450_v8, 0.0  ;;  %2262 = vmatprep.subr.bf16.mxu1 %v2413_v60 }
  0xa4   :  { %v2798_v11 = vsub.f32 %v2706_v17, %v128_v7  ;;  %157 = vadd.xlane.f32.xlu1 %v156_v5  ;;  %463 = vadd.xlane.f32.xlu0 %v462_v12  ;;  %v422_v13 = vpop.xlane.xlu0 %421  ;;  %v465_v15 = vsel %vm97_vm0, %v451_v9, 0.0 }
  0xa5   :  { %v425_v14 = vpop.xlane.xlu1 %424  ;;  %v436_v18 = vmul.f32 0.015625, %v422_v13  ;;  %v143_v22 = vmul.f32 %v2795_v10, %v2795_v10 }
  0xa6   :  { %v437_v19 = vmul.f32 0.015625, %v425_v14  ;;  %v144_v16 = vmul.f32 %v2798_v11, %v2798_v11  ;;  %2263 = vmatpush3.bf16.msra.mxu1 %v2413_v60 }
  0xa7   :  { %v2807_v23 = vsub.f32 %v2715_v20, %v436_v18  ;;  %v159_v26 = vsel %vm97_vm0, %v143_v22, 0.0  ;;  %2264 = vmatprep.subr.bf16.mxu1 %v2414_v61 }
  0xa8   :  { %v2810_v17 = vsub.f32 %v2720_v21, %v437_v19  ;;  %466 = vadd.xlane.f32.xlu1 %v465_v15  ;;  %160 = vadd.xlane.f32.xlu0 %v159_v26  ;;  %v118_v27 = vpop.xlane.xlu0 %117  ;;  %v162_v31 = vsel %vm97_vm0, %v144_v16, 0.0 }
  0xa9   :  { %v121_v30 = vpop.xlane.xlu1 %120  ;;  %v129_v32 = vmul.f32 0.015625, %v118_v27  ;;  %v452_v34 = vmul.f32 %v2807_v23, %v2807_v23 }
  0xaa   :  { %v130_v33 = vmul.f32 0.015625, %v121_v30  ;;  %v453_v20 = vmul.f32 %v2810_v17, %v2810_v17  ;;  %2265 = vmatpush3.bf16.msra.mxu1 %v2414_v61 }
  0xab   :  { %v2819_v35 = vsub.f32 %v2729_v24, %v129_v32  ;;  %v468_v38 = vsel %vm97_vm0, %v452_v34, 0.0  ;;  %2282 = vmatprep.subr.bf16.mxu1 %v2585_v62 }
  0xac   :  { %v2822_v21 = vsub.f32 %v2734_v25, %v130_v33  ;;  %163 = vadd.xlane.f32.xlu1 %v162_v31  ;;  %469 = vadd.xlane.f32.xlu0 %v468_v38  ;;  %v428_v39 = vpop.xlane.xlu0 %427  ;;  %v471_v41 = vsel %vm97_vm0, %v453_v20, 0.0  ;;  %v2877_v31 = vld [vmem:[%s3374_s2] ss:$0 sm:$0xff] }
  0xad   :  { %v431_v40 = vpop.xlane.xlu1 %430  ;;  %v438_v42 = vmul.f32 0.015625, %v428_v39  ;;  %v145_v46 = vmul.f32 %v2819_v35, %v2819_v35 }
  0xae   :  { %v439_v43 = vmul.f32 0.015625, %v431_v40  ;;  %v146_v24 = vmul.f32 %v2822_v21, %v2822_v21 }
  0xaf   :  { %v2831_v47 = vsub.f32 %v2743_v28, %v438_v42  ;;  %v165_v48 = vsel %vm97_vm0, %v145_v46, 0.0 }
  0xb0   :  { %v2834_v25 = vsub.f32 %v2748_v29, %v439_v43  ;;  %472 = vadd.xlane.f32.xlu1 %v471_v41  ;;  %166 = vadd.xlane.f32.xlu0 %v165_v48  ;;  %v168_v49 = vsel %vm97_vm0, %v146_v24, 0.0  ;;  %v2407_v29 = vld [vmem:[%s3370_s4] sm:$0xff]  }
  0xb1   :  { %v454_v50 = vmul.f32 %v2831_v47, %v2831_v47  ;;  %2242 = vmatprep.subr.bf16.mxu0 %v2407_v29  ;;  %v2883_v41 = vld [vmem:[%s3375_s3] ss:$0 sm:$0xff] }
  0xb2   :  { %v455_v51 = vmul.f32 %v2834_v25, %v2834_v25  ;;  %2243 = vmatpush3.bf16.msra.mxu0 %v2407_v29 }
  0xb3   :  { %v474_v52 = vsel %vm97_vm0, %v454_v50, 0.0  ;;  %2244 = vmatprep.subr.bf16.mxu0 %v2408_v53 }
  0xb4   :  { %169 = vadd.xlane.f32.xlu1 %v168_v49  ;;  %475 = vadd.xlane.f32.xlu0 %v474_v52  ;;  %v477_v28 = vsel %vm97_vm0, %v455_v51, 0.0 }
  0xb6   :  { %2245 = vmatpush3.bf16.msra.mxu0 %v2408_v53 }
  0xb7   :  { %2246 = vmatprep.subr.bf16.mxu0 %v2410_v57 }
  0xb8   :  { %478 = vadd.xlane.f32.xlu1 %v477_v28 }
  0xba   :  { %2247 = vmatpush3.bf16.msra.mxu0 %v2410_v57 }
  0xbb   :  { %2248 = vmatprep.subr.bf16.mxu0 %v2412_v59 }
  0xbe   :  { %2249 = vmatpush3.bf16.msra.mxu0 %v2412_v59 }
  0xbf   :  { %2274 = vmatprep.subr.bf16.mxu0 %v2585_v62 }
 0x125   :  { %v149_v63 = vpop.xlane.xlu0 %148 }
 0x126   :  { %v171_v2 = vmul.f32 0.015625, %v149_v63 }
 0x128   :  { %v179_v3 = vadd.f32 1e-05, %v171_v2 }
 0x129   :  { %v152_v4 = vpop.xlane.xlu1 %151  ;;  %v458_v5 = vpop.xlane.xlu0 %457 }
 0x12a   :  { %2419 = vrsqrt.f32 %v179_v3  ;;  %v172_v6 = vmul.f32 0.015625, %v152_v4  ;;  %v480_v7 = vmul.f32 0.015625, %v458_v5 }
 0x12c   :  { %v180_v8 = vadd.f32 1e-05, %v172_v6  ;;  %v488_v9 = vadd.f32 1e-05, %v480_v7 }
 0x12d   :  { %v461_v12 = vpop.xlane.xlu1 %460  ;;  %v155_v13 = vpop.xlane.xlu0 %154 }
 0x12e   :  { %2421 = vrsqrt.f32 %v180_v8  ;;  %v481_v14 = vmul.f32 0.015625, %v461_v12  ;;  %v173_v15 = vmul.f32 0.015625, %v155_v13 }
 0x12f   :  { %2423 = vrsqrt.f32 %v488_v9 }
 0x130   :  { %v489_v18 = vadd.f32 1e-05, %v481_v14  ;;  %v181_v19 = vadd.f32 1e-05, %v173_v15 }
 0x131   :  { %v158_v22 = vpop.xlane.xlu1 %157  ;;  %v464_v16 = vpop.xlane.xlu0 %463 }
 0x132   :  { %2425 = vrsqrt.f32 %v489_v18  ;;  %v174_v26 = vmul.f32 0.015625, %v158_v22  ;;  %v482_v27 = vmul.f32 0.015625, %v464_v16 }
 0x133   :  { %2427 = vrsqrt.f32 %v181_v19 }
 0x134   :  { %v2420_v30 = vpop.eup %2419  ;;  %v182_v32 = vadd.f32 1e-05, %v174_v26  ;;  %v490_v33 = vadd.f32 1e-05, %v482_v27 }
 0x135   :  { %v467_v34 = vpop.xlane.xlu1 %466  ;;  %v161_v20 = vpop.xlane.xlu0 %160  ;;  %v195_v38 = vmul.f32 %v2420_v30, %v2754_v36 }
 0x136   :  { %2429 = vrsqrt.f32 %v182_v32  ;;  %v483_v39 = vmul.f32 0.015625, %v467_v34  ;;  %v175_v40 = vmul.f32 0.015625, %v161_v20 }
 0x137   :  { %2431 = vrsqrt.f32 %v490_v33  ;;  %v209_v42 = vmul.f32 %v2877_v31, %v195_v38 }
 0x138   :  { %v2422_v43 = vpop.eup %2421  ;;  %v491_v46 = vadd.f32 1e-05, %v483_v39  ;;  %v183_v24 = vadd.f32 1e-05, %v175_v40 }
 0x139   :  { %v2424_v48 = vpop.eup %2423  ;;  %v164_v49 = vpop.xlane.xlu1 %163  ;;  %v196_v51 = vmul.f32 %v2422_v43, %v2762_v44  ;;  %v2888_v36 = vadd.f32 %v2883_v41, %v209_v42 }
 0x13a   :  { %v470_v50 = vpop.xlane.xlu0 %469  ;;  %2433 = vrsqrt.f32 %v491_v46  ;;  %v176_v52 = vmul.f32 0.015625, %v164_v49  ;;  %v504_v29 = vmul.f32 %v2424_v48, %v2756_v37 }
 0x13b   :  { %v484_v28 = vmul.f32 0.015625, %v470_v50  ;;  %2435 = vrsqrt.f32 %v183_v24  ;;  %v210_v53 = vmul.f32 %v2877_v31, %v196_v51  ;;  %v239_v56 = vmul.f32 0.70710677, %v2888_v36 }
 0x13c   :  { %v2426_v57 = vpop.eup %2425  ;;  %v184_v58 = vadd.f32 1e-05, %v176_v52  ;;  %v512_v60 = vmul.f32 %v2877_v31, %v504_v29 }
 0x13d   :  { %v492_v59 = vadd.f32 1e-05, %v484_v28  ;;  %v2428_v61 = vpop.eup %2427  ;;  %v473_v44 = vpop.xlane.xlu1 %472  ;;  %v224_v2 = vadd.f32 %v2883_v41, %v210_v53  ;;  %2437 = verf.f32 %v239_v56  ;;  %v505_v3 = vmul.f32 %v2426_v57, %v2764_v45 }
 0x13e   :  { %v167_v63 = vpop.xlane.xlu0 %166  ;;  %v197_v37 = vmul.f32 %v2428_v61, %v2772_v54  ;;  %2439 = vrsqrt.f32 %v184_v58  ;;  %v485_v4 = vmul.f32 0.015625, %v473_v44  ;;  %v2899_v13 = vadd.f32 %v2883_v41, %v512_v60 }
 0x13f   :  { %v177_v5 = vmul.f32 0.015625, %v167_v63  ;;  %2441 = vrsqrt.f32 %v492_v59  ;;  %v240_v6 = vmul.f32 0.70710677, %v224_v2  ;;  %v513_v7 = vmul.f32 %v2877_v31, %v505_v3 }
 0x140   :  { %v2430_v8 = vpop.eup %2429  ;;  %v493_v9 = vadd.f32 1e-05, %v485_v4  ;;  %v211_v15 = vmul.f32 %v2877_v31, %v197_v37  ;;  %v231_v57 = vmul.f32 0.5, %v2888_v36  ;;  %v232_v61 = vmul.f32 0.5, %v224_v2 }
 0x141   :  { %v185_v12 = vadd.f32 1e-05, %v177_v5  ;;  %v2432_v14 = vpop.eup %2431  ;;  %v198_v45 = vmul.f32 %v2430_v8, %v2774_v55  ;;  %v170_v18 = vpop.xlane.xlu1 %169  ;;  %2443 = verf.f32 %v240_v6  ;;  %v2904_v19 = vadd.f32 %v2883_v41, %v513_v7 }
 0x142   :  { %v476_v54 = vpop.xlane.xlu0 %475  ;;  %v506_v22 = vmul.f32 %v2432_v14, %v2783_v0  ;;  %2445 = vrsqrt.f32 %v493_v9  ;;  %v178_v16 = vmul.f32 0.015625, %v170_v18  ;;  %v536_v55 = vmul.f32 0.70710677, %v2899_v13 }
 0x143   :  { %v486_v26 = vmul.f32 0.015625, %v476_v54  ;;  %v212_v27 = vmul.f32 %v2877_v31, %v198_v45  ;;  %2447 = vrsqrt.f32 %v185_v12  ;;  %v537_v40 = vmul.f32 0.70710677, %v2904_v19 }
 0x144   :  { %v2434_v30 = vpop.eup %2433  ;;  %v514_v32 = vmul.f32 %v2877_v31, %v506_v22  ;;  %v186_v33 = vadd.f32 1e-05, %v178_v16  ;;  %v2913_v0 = vadd.f32 %v2883_v41, %v211_v15  ;;  %v528_v54 = vmul.f32 0.5, %v2899_v13 }
 0x145   :  { %v494_v34 = vadd.f32 1e-05, %v486_v26  ;;  %v2436_v20 = vpop.eup %2435  ;;  %v507_v38 = vmul.f32 %v2434_v30, %v2786_v1  ;;  %v479_v39 = vpop.xlane.xlu1 %478  ;;  %v2916_v42 = vadd.f32 %v2883_v41, %v212_v27  ;;  %v529_v13 = vmul.f32 0.5, %v2904_v19 }
 0x146   :  { %v199_v43 = vmul.f32 %v2436_v20, %v2795_v10  ;;  %2449 = vrsqrt.f32 %v186_v33  ;;  %v487_v46 = vmul.f32 0.015625, %v479_v39  ;;  %v2921_v49 = vadd.f32 %v2883_v41, %v514_v32 }
 0x147   :  { %v2438_v24 = vpop.eup %2437  ;;  %v515_v48 = vmul.f32 %v2877_v31, %v507_v38  ;;  %2451 = vrsqrt.f32 %v494_v34  ;;  %v241_v10 = vmul.f32 0.70710677, %v2913_v0  ;;  %v242_v53 = vmul.f32 0.70710677, %v2916_v42 }
 0x148   :  { %v2440_v1 = vpop.eup %2439  ;;  %v213_v50 = vmul.f32 %v2877_v31, %v199_v43  ;;  %v495_v51 = vadd.f32 1e-05, %v487_v46  ;;  %v255_v52 = vadd.f32 1.0, %v2438_v24  ;;  %2453 = verf.f32 %v536_v55 }
 0x149   :  { %v2442_v28 = vpop.eup %2441  ;;  %v200_v29 = vmul.f32 %v2440_v1, %v2798_v11  ;;  %2455 = verf.f32 %v537_v40  ;;  %v2930_v58 = vadd.f32 %v2883_v41, %v515_v48  ;;  %v538_v11 = vmul.f32 0.70710677, %v2921_v49 }
 0x14a   :  { %v508_v56 = vmul.f32 %v2442_v28, %v2807_v23  ;;  %2457 = vrsqrt.f32 %v495_v51  ;;  %v263_v37 = vmul.f32 %v255_v52, %v231_v57  ;;  %v2938_v5 = vadd.f32 %v2883_v41, %v213_v50 }
 0x14b   :  { %v2444_v59 = vpop.eup %2443  ;;  %v214_v60 = vmul.f32 %v2877_v31, %v200_v29  ;;  %2459 = verf.f32 %v241_v10  ;;  %v539_v36 = vmul.f32 0.70710677, %v2930_v58  ;;  %v233_v38 = vmul.f32 0.5, %v2913_v0 }
 0x14c   :  { %v2446_v44 = vpop.eup %2445  ;;  %v516_v63 = vmul.f32 %v2877_v31, %v508_v56  ;;  %v256_v3 = vadd.f32 1.0, %v2444_v59  ;;  %2461 = verf.f32 %v242_v53  ;;  %v234_v52 = vmul.f32 0.5, %v2916_v42  ;;  %v2985_v42 = vld [vmem:[%s3372_s8] sm:$0xff]  }
 0x14d   :  { %v2448_v23 = vpop.eup %2447  ;;  %v509_v4 = vmul.f32 %v2446_v44, %v2810_v17  ;;  %2463 = verf.f32 %v538_v11  ;;  %v2942_v7 = vadd.f32 %v2883_v41, %v214_v60  ;;  %v243_v17 = vmul.f32 0.70710677, %v2938_v5 }
 0x14e   :  { %v201_v2 = vmul.f32 %v2448_v23, %v2819_v35  ;;  %v264_v6 = vmul.f32 %v256_v3, %v232_v61  ;;  %v2945_v8 = vadd.f32 %v2883_v41, %v516_v63  ;;  %2465 = verf.f32 %v539_v36 }
 0x14f   :  { %v517_v9 = vmul.f32 %v2877_v31, %v509_v4  ;;  %v244_v45 = vmul.f32 0.70710677, %v2942_v7  ;;  %2467 = verf.f32 %v243_v17  ;;  %v530_v60 = vmul.f32 0.5, %v2921_v49  ;;  %v3000_v17 = vld [vmem:[%s3372_s8 + $0x8] sm:$0xff]  }
 0x150   :  { %v2450_v12 = vpop.eup %2449  ;;  %v215_v14 = vmul.f32 %v2877_v31, %v201_v2  ;;  %v271_v15 = vpack.c.bf16 %v264_v6, %v263_v37  ;;  %v540_v27 = vmul.f32 0.70710677, %v2945_v8  ;;  %v235_v49 = vmul.f32 0.5, %v2938_v5  ;;  %v2994_v2 = vld [vmem:[%s3373_s9] sm:$0xff]  }
 0x151   :  { %v2452_v18 = vpop.eup %2451  ;;  %v202_v35 = vmul.f32 %v2450_v12, %v2822_v21  ;;  %v2954_v22 = vadd.f32 %v2883_v41, %v517_v9  ;;  %2469 = verf.f32 %v244_v45 }
 0x152   :  { %v2454_v16 = vpop.eup %2453  ;;  %v510_v26 = vmul.f32 %v2452_v18, %v2831_v47  ;;  %2250 = vmatprep.mubr.msk.bf16.mxu0 %vm97_vm0, %v271_v15  ;;  %v2960_v30 = vadd.f32 %v2883_v41, %v215_v14  ;;  %2471 = verf.f32 %v540_v27  ;;  %v532_v15 = vmul.f32 0.5, %v2945_v8 }
 0x153   :  { %v2456_v32 = vpop.eup %2455  ;;  %v216_v21 = vmul.f32 %v2877_v31, %v202_v35  ;;  %v552_v33 = vadd.f32 1.0, %v2454_v16  ;;  %v541_v34 = vmul.f32 0.70710677, %v2954_v22  ;;  %v533_v45 = vmul.f32 0.5, %v2954_v22 }
 0x154   :  { %v2458_v55 = vpop.eup %2457  ;;  %v518_v20 = vmul.f32 %v2877_v31, %v510_v26  ;;  %v553_v47 = vadd.f32 1.0, %v2456_v32  ;;  %v245_v1 = vmul.f32 0.70710677, %v2960_v30 }
 0x155   :  { %v2460_v39 = vpop.eup %2459  ;;  %v511_v40 = vmul.f32 %v2458_v55, %v2834_v25  ;;  %v560_v43 = vmul.f32 %v552_v33, %v528_v54  ;;  %2473 = verf.f32 %v541_v34  ;;  %v2969_v46 = vadd.f32 %v2883_v41, %v216_v21  ;;  %v3010_v54 = vld [vmem:[%s3373_s9 + $0x8] sm:$0xff]  }
 0x156   :  { %v2462_v24 = vpop.eup %2461  ;;  %v561_v19 = vmul.f32 %v553_v47, %v529_v13  ;;  %v257_v48 = vadd.f32 1.0, %v2460_v39  ;;  %v2973_v50 = vadd.f32 %v2883_v41, %v518_v20  ;;  %2475 = verf.f32 %v245_v1 }
 0x157   :  { %v2464_v51 = vpop.eup %2463  ;;  %v519_v0 = vmul.f32 %v2877_v31, %v511_v40  ;;  %v258_v28 = vadd.f32 1.0, %v2462_v24  ;;  %v246_v25 = vmul.f32 0.70710677, %v2969_v46  ;;  %v531_v31 = vmul.f32 0.5, %v2930_v58 }
 0x158   :  { %v568_v29 = vpack.c.bf16 %v561_v19, %v560_v43  ;;  %v554_v10 = vadd.f32 1.0, %v2464_v51  ;;  %v2466_v53 = vpop.eup %2465  ;;  %v265_v56 = vmul.f32 %v257_v48, %v233_v38  ;;  %v542_v11 = vmul.f32 0.70710677, %v2973_v50  ;;  %v3025_v19 = vld [vmem:[#allocation4] sm:$0xff] }
 0x159   :  { %v266_v57 = vmul.f32 %v258_v28, %v234_v52  ;;  %2477 = verf.f32 %v246_v25  ;;  %v527_v59 = vadd.f32 %v2883_v41, %v519_v0  ;;  %v555_v61 = vadd.f32 1.0, %v2466_v53  ;;  %v2468_v44 = vpop.eup %2467  ;;  %v2110_v0 = vld [vmem:[%s3376_s6] ss:$0 sm:$0xff] }
 0x15a   :  { %2266 = vmatprep.mubr.msk.bf16.mxu1 %vm97_vm0, %v568_v29  ;;  %v562_v23 = vmul.f32 %v554_v10, %v530_v60  ;;  %v259_v4 = vadd.f32 1.0, %v2468_v44  ;;  %2479 = verf.f32 %v542_v11  ;;  %v236_v58 = vmul.f32 0.5, %v2942_v7  ;;  %v2119_v29 = vld [vmem:[%s3377_s7] ss:$0 sm:$0xff] }
 0x15b   :  { %v272_v63 = vpack.c.bf16 %v266_v57, %v265_v56  ;;  %v543_v3 = vmul.f32 0.70710677, %v527_v59  ;;  %v2470_v37 = vpop.eup %2469  ;;  %v563_v41 = vmul.f32 %v555_v61, %v531_v31  ;;  %v237_v21 = vmul.f32 0.5, %v2960_v30 }
 0x15c   :  { %v260_v36 = vadd.f32 1.0, %v2470_v37  ;;  %v2472_v6 = vpop.eup %2471  ;;  %v267_v5 = vmul.f32 %v259_v4, %v235_v49  ;;  %v238_v13 = vmul.f32 0.5, %v2969_v46  ;;  %v534_v40 = vmul.f32 0.5, %v2973_v50  ;;  %v3032_v50 = vld [vmem:[#allocation4 + $0x8] sm:$0xff] }
 0x15d   :  { %2251 = vmatmul.mubr.msk.bf16.vlgmr.msra.gmra.mrb[0].mxu0 %vm97_vm0, %v272_v63  ;;  %2481 = verf.f32 %v543_v3  ;;  %v569_v9 = vpack.c.bf16 %v563_v41, %v562_v23  ;;  %v556_v7 = vadd.f32 1.0, %v2472_v6  ;;  %v535_v43 = vmul.f32 0.5, %v527_v59 }
 0x15e   :  { %2275 = vmatpush3.bf16.msra.mxu0 %v2985_v42  ;;  %v268_v14 = vmul.f32 %v260_v36, %v236_v58  ;;  %v712_v1 = vpack.c.bf16 %v3025_v19, %v3025_v19  ;;  %v769_v51 = vpack.c.bf16 %v3032_v50, %v3032_v50 }
 0x15f   :  { %v2474_v12 = vpop.eup %2473  ;;  %2276 = vmatprep.subr.bf16.mxu0 %v2585_v62  ;;  %2267 = vmatmul.mubr.msk.bf16.vlgmr.msra.gmra.mrb[0].mxu1 %vm97_vm0, %v569_v9  ;;  %v564_v26 = vmul.f32 %v556_v7, %v532_v15 }
 0x160   :  { %v557_v18 = vadd.f32 1.0, %v2474_v12  ;;  %v273_v35 = vpack.c.bf16 %v268_v14, %v267_v5  ;;  %2283 = vmatpush3.bf16.msra.mxu1 %v2994_v2  ;;  %v2476_v16 = vpop.eup %2475 }
 0x161   :  { %2284 = vmatprep.subr.bf16.mxu1 %v2585_v62  ;;  %v261_v8 = vadd.f32 1.0, %v2476_v16 }
 0x162   :  { %v565_v27 = vmul.f32 %v557_v18, %v533_v45  ;;  %2277 = vmatpush3.bf16.msra.mxu0 %v3000_v17  ;;  %2254 = vmatprep.mubr.msk.bf16.mxu0 %vm97_vm0, %v273_v35  ;;  %v3071_v45 = vld [vmem:[%s3378_s10] sm:$0xff] }
 0x163   :  { %v2478_v32 = vpop.eup %2477  ;;  %2290 = vmatprep.subr.bf16.mxu0 %v2585_v62  ;;  %v269_v55 = vmul.f32 %v261_v8, %v237_v21 }
 0x164   :  { %v570_v22 = vpack.c.bf16 %v565_v27, %v564_v26  ;;  %v262_v33 = vadd.f32 1.0, %v2478_v32  ;;  %2285 = vmatpush3.bf16.msra.mxu1 %v3010_v54  ;;  %v2480_v34 = vpop.eup %2479 }
 0x165   :  { %2298 = vmatprep.subr.bf16.mxu1 %v2585_v62  ;;  %v558_v38 = vadd.f32 1.0, %v2480_v34 }
 0x166   :  { %2270 = vmatprep.mubr.msk.bf16.mxu1 %vm97_vm0, %v570_v22  ;;  %v270_v20 = vmul.f32 %v262_v33, %v238_v13  ;;  %v3081_v22 = vld [vmem:[%s3379_s11] sm:$0xff] }
 0x167   :  { %v2482_v47 = vpop.eup %2481  ;;  %v566_v30 = vmul.f32 %v558_v38, %v534_v40 }
 0x168   :  { %v274_v39 = vpack.c.bf16 %v270_v20, %v269_v55  ;;  %v559_v24 = vadd.f32 1.0, %v2482_v47 }
 0x16a   :  { %2255 = vmatmul.mubr.msk.bf16.gmra.mrb[4].mxu0 %vm97_vm0, %v274_v39  ;;  %v567_v46 = vmul.f32 %v559_v24, %v535_v43 }
 0x16b   :  { %2278 = vmatprep.mubr.msk.bf16.mxu0 %vm2586_vm2, %v2585_v62 }
 0x16c   :  { %v571_v48 = vpack.c.bf16 %v567_v46, %v566_v30 }
 0x16e   :  { %2271 = vmatmul.mubr.msk.bf16.gmra.mrb[4].mxu1 %vm97_vm0, %v571_v48 }
 0x16f   :  { %2286 = vmatprep.mubr.msk.bf16.mxu1 %vm2586_vm2, %v2585_v62 }
 0x172   :  { %2279 = vmatmul.mubr.msk.bf16.vlgmr.msra.gmra.mrb[8].mxu0 %vm84_vm1, %v712_v1 }
 0x173   :  { %2291 = vmatpush3.bf16.msra.mxu0 %v2985_v42  ;;  %2294 = vmatprep.mubr.msk.bf16.mxu0 %vm2586_vm2, %v2585_v62 }
 0x174   :  { %2292 = vmatprep.subr.bf16.mxu0 %v2585_v62 }
 0x176   :  { %2287 = vmatmul.mubr.msk.bf16.vlgmr.msra.gmra.mrb[8].mxu1 %vm84_vm1, %v769_v51 }
 0x177   :  { %2293 = vmatpush3.bf16.msra.mxu0 %v3000_v17  ;;  %2299 = vmatpush3.bf16.msra.mxu1 %v2994_v2 }
 0x178   :  { %2300 = vmatprep.subr.bf16.mxu1 %v2585_v62  ;;  %2302 = vmatprep.mubr.msk.bf16.mxu1 %vm2586_vm2, %v2585_v62 }
 0x179   :  { %2306 = vmatprep.subr.bf16.mxu0 %v2585_v62 }
 0x17b   :  { %2301 = vmatpush3.bf16.msra.mxu1 %v3010_v54 }
 0x17c   :  { %2314 = vmatprep.subr.bf16.mxu1 %v2585_v62 }
 0x230   :  { %v2252_v52 = vpop.f32.mrb[0].mxu0 }
 0x231   :  { %v369_v28 = vadd.f32 %v2252_v52, %v2110_v0  ;;  %v360_v25 = vpop.f32.mrb[1].mxu0 }
 0x232   :  { %v361_v10 = vadd.f32 %v2110_v0, %v360_v25  ;;  %v2253_v53 = vpop.f32.mrb[2].mxu0  ;;  %v2268_v59 = vpop.f32.mrb[0].mxu1 }
 0x233   :  { %394 = vst.msk [vmem:[#allocation2 + $0x10] sm:$0xff] %vm391_vm3, %v369_v28  ;;  %v372_v56 = vadd.f32 %v2253_v53, %v2110_v0  ;;  %v363_v57 = vpop.f32.mrb[3].mxu0  ;;  %v666_v31 = vadd.f32 %v2268_v59, %v2119_v29  ;;  %v657_v61 = vpop.f32.mrb[1].mxu1 }
 0x234   :  { %392 = vst.msk [vmem:[#allocation2] sm:$0xff] %vm391_vm3, %v361_v10  ;;  %v364_v60 = vadd.f32 %v2110_v0, %v363_v57  ;;  %v658_v11 = vadd.f32 %v2119_v29, %v657_v61  ;;  %v2269_v44 = vpop.f32.mrb[2].mxu1 }
 0x235   :  { %395 = vst.msk [vmem:[#allocation2 + $0x18] sm:$0xff] %vm391_vm3, %v372_v56  ;;  %690 = vst.msk [vmem:[#allocation3 + $0x10] sm:$0xff] %vm391_vm3, %v666_v31  ;;  %v669_v63 = vadd.f32 %v2269_v44, %v2119_v29  ;;  %v660_v3 = vpop.f32.mrb[3].mxu1 }
 0x236   :  { %393 = vst.msk [vmem:[#allocation2 + $0x8] sm:$0xff] %vm391_vm3, %v364_v60  ;;  %688 = vst.msk [vmem:[#allocation3] sm:$0xff] %vm391_vm3, %v658_v11  ;;  %v661_v37 = vadd.f32 %v2119_v29, %v660_v3 }
 0x237   :  { %691 = vst.msk [vmem:[#allocation3 + $0x18] sm:$0xff] %vm391_vm3, %v669_v63 }
 0x238   :  { %689 = vst.msk [vmem:[#allocation3 + $0x8] sm:$0xff] %vm391_vm3, %v661_v37 }
 0x23b   :  { %v709_v47 = vld [vmem:[#allocation2] sm:$0xff] }
 0x23d   :  { %v2256_v23 = vpop.f32.mrb[4].mxu0 }
 0x23e   :  { %v385_v41 = vadd.f32 %v2256_v23, %v2110_v0  ;;  %v376_v4 = vpop.f32.mrb[5].mxu0 }
 0x23f   :  { %v377_v49 = vadd.f32 %v2110_v0, %v376_v4  ;;  %v2257_v58 = vpop.f32.mrb[6].mxu0 }
 0x240   :  { %398 = vst.msk [vmem:[#allocation2 + $0x30] sm:$0xff] %vm391_vm3, %v385_v41  ;;  %v388_v36 = vadd.f32 %v2257_v58, %v2110_v0  ;;  %v379_v6 = vpop.f32.mrb[7].mxu0 }
 0x241   :  { %396 = vst.msk [vmem:[#allocation2 + $0x20] sm:$0xff] %vm391_vm3, %v377_v49  ;;  %v380_v9 = vadd.f32 %v2110_v0, %v379_v6  ;;  %v2272_v12 = vpop.f32.mrb[4].mxu1 }
 0x242   :  { %399 = vst.msk [vmem:[#allocation2 + $0x38] sm:$0xff] %vm391_vm3, %v388_v36  ;;  %v682_v5 = vadd.f32 %v2272_v12, %v2119_v29  ;;  %v673_v14 = vpop.f32.mrb[5].mxu1 }
 0x243   :  { %397 = vst.msk [vmem:[#allocation2 + $0x28] sm:$0xff] %vm391_vm3, %v380_v9  ;;  %v674_v7 = vadd.f32 %v2119_v29, %v673_v14  ;;  %v2273_v15 = vpop.f32.mrb[6].mxu1 }
 0x244   :  { %694 = vst.msk [vmem:[#allocation3 + $0x30] sm:$0xff] %vm391_vm3, %v682_v5  ;;  %v685_v18 = vadd.f32 %v2273_v15, %v2119_v29  ;;  %v676_v35 = vpop.f32.mrb[7].mxu1 }
 0x245   :  { %692 = vst.msk [vmem:[#allocation3 + $0x20] sm:$0xff] %vm391_vm3, %v674_v7  ;;  %v677_v16 = vadd.f32 %v2119_v29, %v676_v35  ;;  %v763_v26 = vpop.f32.mrb[8].mxu0 }
 0x246   :  { %695 = vst.msk [vmem:[#allocation3 + $0x38] sm:$0xff] %vm391_vm3, %v685_v18  ;;  %v764_v27 = vadd.f32 %v763_v26, %v3071_v45  ;;  %v2280_v32 = vpop.f32.mrb[9].mxu0 }
 0x247   :  { %693 = vst.msk [vmem:[#allocation3 + $0x28] sm:$0xff] %vm391_vm3, %v677_v16  ;;  %v766_v8 = vpop.f32.mrb[10].mxu0 }
 0x248   :  { %833 = vrot.lane.b32.xlu0 %v764_v27, %s2587_s15  ;;  %v2281_v21 = vpop.f32.mrb[11].mxu0  ;;  %v825_v38 = vadd.f32 %v764_v27, %v709_v47  ;;  %v901_v8 = vld [vmem:[#allocation2 + $0x8] sm:$0xff] }
 0x249   :  { %v819_v13 = vpop.f32.mrb[8].mxu1 }
 0x24a   :  { %v820_v33 = vadd.f32 %v819_v13, %v3081_v22  ;;  %v2288_v34 = vpop.f32.mrb[9].mxu1  ;;  %v2134_v40 = vmul.f32 -1.442695, %v825_v38 }
 0x24b   :  { %v822_v55 = vpop.f32.mrb[10].mxu1  ;;  %v903_v13 = vld [vmem:[#allocation3 + $0x30] sm:$0xff] }
 0x24c   :  { %863 = vrot.lane.b32.xlu1 %v820_v33, %s2587_s15  ;;  %v2289_v20 = vpop.f32.mrb[11].mxu1  ;;  %2483 = vpow2.f32 %v2134_v40 }
 0x24d   :  { %v711_v39 = vld [vmem:[#allocation3 + $0x38] sm:$0xff] }
 0x24e   :  { %v855_v43 = vadd.f32 %v820_v33, %v711_v39 }
 0x250   :  { %v2135_v24 = vmul.f32 -1.442695, %v855_v43 }
 0x252   :  { %2485 = vpow2.f32 %v2135_v24 }
 0x256   :  { %v2484_v30 = vpop.eup %2483 }
 0x257   :  { %v829_v46 = vadd.f32 1.0, %v2484_v30 }
 0x259   :  { %2487 = vrcp.f32 %v829_v46 }
 0x25c   :  { %v2486_v48 = vpop.eup %2485 }
 0x25d   :  { %v859_v1 = vadd.f32 1.0, %v2486_v48 }
 0x25f   :  { %2489 = vrcp.f32 %v859_v1 }
 0x263   :  { %v2488_v51 = vpop.eup %2487 }
 0x264   :  { %v843_v61 = vsub.f32 1.0, %v2488_v51 }
 0x269   :  { %v2490_v28 = vpop.eup %2489 }
 0x26a   :  { %v873_v3 = vsub.f32 1.0, %v2490_v28 }
 0x2ba   :  { %v834_v0 = vpop.permute.xlu0 %833 }
 0x2bb   :  { %v836_v52 = vmul.f32 %v2488_v51, %v834_v0 }
 0x2bd   :  { %838 = vrot.lane.b32.xlu1 %v836_v52, %s2587_s15 }
 0x2be   :  { %v864_v25 = vpop.permute.xlu1 %863 }
 0x2bf   :  { %v866_v29 = vmul.f32 %v2490_v28, %v864_v25 }
 0x2c1   :  { %868 = vrot.lane.b32.xlu1 %v866_v29, %s2587_s15 }
 0x2c5   :  { %850 = vrot.lane.b32.xlu1 %v3025_v19, %s2588_s16 }
 0x2c9   :  { %880 = vrot.lane.b32.xlu1 %v3032_v50, %s2588_s16 }
 0x32f   :  { %v839_v10 = vpop.permute.xlu1 %838 }
 0x330   :  { %v841_v53 = vadd.f32 %v839_v10, %v709_v47 }
 0x332   :  { %2491 = vtanh.f32 %v841_v53 }
 0x333   :  { %v869_v56 = vpop.permute.xlu1 %868 }
 0x334   :  { %v871_v57 = vadd.f32 %v869_v56, %v711_v39 }
 0x336   :  { %2493 = vtanh.f32 %v871_v57 }
 0x337   :  { %v851_v31 = vpop.permute.xlu1 %850 }
 0x338   :  { %v853_v19 = vmul.f32 %v2488_v51, %v851_v31 }
 0x33b   :  { %v881_v63 = vpop.permute.xlu1 %880 }
 0x33c   :  { %v2492_v59 = vpop.eup %2491  ;;  %v883_v23 = vmul.f32 %v2490_v28, %v881_v63 }
 0x33d   :  { %845 = vrot.lane.b32.xlu0 %v2492_v59, %s2589_s17 }
 0x340   :  { %v2494_v60 = vpop.eup %2493 }
 0x341   :  { %875 = vrot.lane.b32.xlu0 %v2494_v60, %s2589_s17 }
 0x3af   :  { %v846_v11 = vpop.permute.xlu0 %845 }
 0x3b0   :  { %v848_v44 = vmul.f32 %v846_v11, %v843_v61 }
 0x3b2   :  { %v854_v50 = vadd.f32 %v853_v19, %v848_v44 }
 0x3b3   :  { %v876_v37 = vpop.permute.xlu0 %875 }
 0x3b4   :  { %v878_v41 = vmul.f32 %v876_v37, %v873_v3  ;;  %886 = vrot.lane.b32.xlu0 %v854_v50, %s2589_s17 }
 0x3b6   :  { %v884_v4 = vadd.f32 %v883_v23, %v878_v41 }
 0x3b8   :  { %891 = vrot.lane.b32.xlu1 %v884_v4, %s2589_s17 }
 0x426   :  { %v887_v49 = vpop.permute.xlu0 %886 }
 0x427   :  { %889 = vst.msk [vmem:[#allocation4] sm:$0xff] %vm84_vm1, %v887_v49  ;;  %895 = vst.msk [vmem:[%s3380_s12] sm:$0xff] %vm84_vm1, %v887_v49 }
 0x42a   :  { %v892_v58 = vpop.permute.xlu1 %891 }
 0x42b   :  { %894 = vst.msk [vmem:[#allocation4 + $0x8] sm:$0xff] %vm84_vm1, %v892_v58  ;;  %2136 = vst.msk [vmem:[%s3381_s13 + $0x38] sm:$0xff] %vm84_vm1, %v892_v58 }
 0x42e   :  { %v898_v36 = vld [vmem:[#allocation4] sm:$0xff] }
 0x42f   :  { %v904_v6 = vpack.c.bf16 %v898_v36, %v898_v36 }
 0x431   :  { %2295 = vmatmul.mubr.msk.bf16.vlgmr.msra.gmra.mrb[12].mxu0 %vm84_vm1, %v904_v6 }
 0x432   :  { %v899_v9 = vld [vmem:[#allocation4 + $0x8] sm:$0xff]  ;;  %2307 = vmatpush3.bf16.msra.mxu0 %v2985_v42  ;;  %2310 = vmatprep.mubr.msk.bf16.mxu0 %vm2586_vm2, %v2585_v62 }
 0x433   :  { %v948_v12 = vpack.c.bf16 %v899_v9, %v899_v9  ;;  %2308 = vmatprep.subr.bf16.mxu0 %v2585_v62 }
 0x435   :  { %2303 = vmatmul.mubr.msk.bf16.vlgmr.msra.gmra.mrb[12].mxu1 %vm84_vm1, %v948_v12 }
 0x436   :  { %2309 = vmatpush3.bf16.msra.mxu0 %v3000_v17  ;;  %2315 = vmatpush3.bf16.msra.mxu1 %v2994_v2 }
 0x437   :  { %2316 = vmatprep.subr.bf16.mxu1 %v2585_v62  ;;  %2318 = vmatprep.mubr.msk.bf16.mxu1 %vm2586_vm2, %v2585_v62 }
 0x438   :  { %2322 = vmatprep.subr.bf16.mxu0 %v2585_v62 }
 0x43a   :  { %2317 = vmatpush3.bf16.msra.mxu1 %v3010_v54 }
 0x43b   :  { %2330 = vmatprep.subr.bf16.mxu1 %v2585_v62 }
 0x504   :  { %v942_v5 = vpop.f32.mrb[12].mxu0 }
 0x505   :  { %v943_v14 = vadd.f32 %v942_v5, %v3071_v45  ;;  %v2296_v7 = vpop.f32.mrb[13].mxu0 }
 0x506   :  { %v945_v15 = vpop.f32.mrb[14].mxu0 }
 0x507   :  { %1000 = vrot.lane.b32.xlu0 %v943_v14, %s2587_s15  ;;  %v2297_v18 = vpop.f32.mrb[15].mxu0  ;;  %v992_v21 = vadd.f32 %v943_v14, %v901_v8  ;;  %v1069_v15 = vld [vmem:[#allocation2 + $0x10] sm:$0xff] }
 0x508   :  { %v986_v35 = vpop.f32.mrb[12].mxu1 }
 0x509   :  { %v987_v16 = vadd.f32 %v986_v35, %v3081_v22  ;;  %v2304_v26 = vpop.f32.mrb[13].mxu1  ;;  %v2139_v33 = vmul.f32 -1.442695, %v992_v21  ;;  %v1071_v35 = vld [vmem:[#allocation3 + $0x28] sm:$0xff] }
 0x50a   :  { %v989_v27 = vpop.f32.mrb[14].mxu1 }
 0x50b   :  { %1030 = vrot.lane.b32.xlu1 %v987_v16, %s2587_s15  ;;  %v2305_v32 = vpop.f32.mrb[15].mxu1  ;;  %v1022_v34 = vadd.f32 %v987_v16, %v903_v13  ;;  %2495 = vpow2.f32 %v2139_v33 }
 0x50d   :  { %v2140_v55 = vmul.f32 -1.442695, %v1022_v34 }
 0x50f   :  { %2497 = vpow2.f32 %v2140_v55 }
 0x515   :  { %v2496_v20 = vpop.eup %2495 }
 0x516   :  { %v996_v47 = vadd.f32 1.0, %v2496_v20 }
 0x518   :  { %2499 = vrcp.f32 %v996_v47 }
 0x519   :  { %v2498_v38 = vpop.eup %2497 }
 0x51a   :  { %v1026_v39 = vadd.f32 1.0, %v2498_v38 }
 0x51c   :  { %2501 = vrcp.f32 %v1026_v39 }
 0x522   :  { %v2500_v40 = vpop.eup %2499 }
 0x523   :  { %v1010_v10 = vsub.f32 1.0, %v2500_v40 }
 0x526   :  { %v2502_v30 = vpop.eup %2501 }
 0x527   :  { %v1040_v31 = vsub.f32 1.0, %v2502_v30 }
 0x579   :  { %v1001_v43 = vpop.permute.xlu0 %1000 }
 0x57a   :  { %v1003_v24 = vmul.f32 %v2500_v40, %v1001_v43 }
 0x57c   :  { %1005 = vrot.lane.b32.xlu0 %v1003_v24, %s2587_s15 }
 0x57d   :  { %v1031_v46 = vpop.permute.xlu1 %1030 }
 0x57e   :  { %v1033_v48 = vmul.f32 %v2502_v30, %v1031_v46 }
 0x580   :  { %1035 = vrot.lane.b32.xlu1 %v1033_v48, %s2587_s15 }
 0x584   :  { %1017 = vrot.lane.b32.xlu1 %v898_v36, %s2588_s16 }
 0x588   :  { %1047 = vrot.lane.b32.xlu1 %v899_v9, %s2588_s16 }
 0x5ee   :  { %v1006_v1 = vpop.permute.xlu0 %1005 }
 0x5ef   :  { %v1008_v51 = vadd.f32 %v1006_v1, %v901_v8 }
 0x5f1   :  { %2503 = vtanh.f32 %v1008_v51 }
 0x5f2   :  { %v1036_v0 = vpop.permute.xlu1 %1035 }
 0x5f3   :  { %v1038_v52 = vadd.f32 %v1036_v0, %v903_v13 }
 0x5f5   :  { %2505 = vtanh.f32 %v1038_v52 }
 0x5f6   :  { %v1018_v29 = vpop.permute.xlu1 %1017 }
 0x5f7   :  { %v1020_v56 = vmul.f32 %v2500_v40, %v1018_v29 }
 0x5fa   :  { %v1048_v59 = vpop.permute.xlu1 %1047 }
 0x5fb   :  { %v2504_v28 = vpop.eup %2503  ;;  %v1050_v11 = vmul.f32 %v2502_v30, %v1048_v59 }
 0x5fc   :  { %1012 = vrot.lane.b32.xlu0 %v2504_v28, %s2589_s17 }
 0x5ff   :  { %v2506_v25 = vpop.eup %2505 }
 0x600   :  { %1042 = vrot.lane.b32.xlu0 %v2506_v25, %s2589_s17 }
 0x66e   :  { %v1013_v53 = vpop.permute.xlu0 %1012 }
 0x66f   :  { %v1015_v57 = vmul.f32 %v1013_v53, %v1010_v10 }
 0x671   :  { %v1021_v60 = vadd.f32 %v1020_v56, %v1015_v57 }
 0x672   :  { %v1043_v61 = vpop.permute.xlu0 %1042 }
 0x673   :  { %v1045_v19 = vmul.f32 %v1043_v61, %v1040_v31  ;;  %1053 = vrot.lane.b32.xlu0 %v1021_v60, %s2589_s17 }
 0x675   :  { %v1051_v44 = vadd.f32 %v1050_v11, %v1045_v19 }
 0x677   :  { %1058 = vrot.lane.b32.xlu1 %v1051_v44, %s2589_s17 }
 0x6e5   :  { %v1054_v63 = vpop.permute.xlu0 %1053 }
 0x6e6   :  { %1056 = vst.msk [vmem:[#allocation4] sm:$0xff] %vm84_vm1, %v1054_v63  ;;  %2141 = vst.msk [vmem:[%s3380_s12 + $0x8] sm:$0xff] %vm84_vm1, %v1054_v63 }
 0x6e9   :  { %v1059_v50 = vpop.permute.xlu1 %1058 }
 0x6ea   :  { %1061 = vst.msk [vmem:[#allocation4 + $0x8] sm:$0xff] %vm84_vm1, %v1059_v50  ;;  %2142 = vst.msk [vmem:[%s3381_s13 + $0x30] sm:$0xff] %vm84_vm1, %v1059_v50 }
 0x6ed   :  { %v1066_v3 = vld [vmem:[#allocation4] sm:$0xff] }
 0x6ee   :  { %v1072_v37 = vpack.c.bf16 %v1066_v3, %v1066_v3 }
 0x6f0   :  { %2311 = vmatmul.mubr.msk.bf16.vlgmr.msra.gmra.mrb[16].mxu0 %vm84_vm1, %v1072_v37 }
 0x6f1   :  { %v1067_v23 = vld [vmem:[#allocation4 + $0x8] sm:$0xff]  ;;  %2323 = vmatpush3.bf16.msra.mxu0 %v2985_v42  ;;  %2326 = vmatprep.mubr.msk.bf16.mxu0 %vm2586_vm2, %v2585_v62 }
 0x6f2   :  { %v1116_v41 = vpack.c.bf16 %v1067_v23, %v1067_v23  ;;  %2324 = vmatprep.subr.bf16.mxu0 %v2585_v62 }
 0x6f4   :  { %2319 = vmatmul.mubr.msk.bf16.vlgmr.msra.gmra.mrb[16].mxu1 %vm84_vm1, %v1116_v41 }
 0x6f5   :  { %2325 = vmatpush3.bf16.msra.mxu0 %v3000_v17  ;;  %2331 = vmatpush3.bf16.msra.mxu1 %v2994_v2 }
 0x6f6   :  { %2332 = vmatprep.subr.bf16.mxu1 %v2585_v62  ;;  %2334 = vmatprep.mubr.msk.bf16.mxu1 %vm2586_vm2, %v2585_v62 }
 0x6f7   :  { %2338 = vmatprep.subr.bf16.mxu0 %v2585_v62 }
 0x6f9   :  { %2333 = vmatpush3.bf16.msra.mxu1 %v3010_v54 }
 0x6fa   :  { %2346 = vmatprep.subr.bf16.mxu1 %v2585_v62 }
 0x7c3   :  { %v1110_v4 = vpop.f32.mrb[16].mxu0 }
 0x7c4   :  { %v1111_v49 = vadd.f32 %v1110_v4, %v3071_v45  ;;  %v2312_v58 = vpop.f32.mrb[17].mxu0 }
 0x7c5   :  { %v1113_v36 = vpop.f32.mrb[18].mxu0 }
 0x7c6   :  { %1168 = vrot.lane.b32.xlu0 %v1111_v49, %s2587_s15  ;;  %v2313_v6 = vpop.f32.mrb[19].mxu0  ;;  %v1160_v18 = vadd.f32 %v1111_v49, %v1069_v15  ;;  %v1237_v36 = vld [vmem:[#allocation2 + $0x18] sm:$0xff] }
 0x7c7   :  { %v1154_v9 = vpop.f32.mrb[16].mxu1 }
 0x7c8   :  { %v1155_v12 = vadd.f32 %v1154_v9, %v3081_v22  ;;  %v2320_v5 = vpop.f32.mrb[17].mxu1  ;;  %v2145_v16 = vmul.f32 -1.442695, %v1160_v18  ;;  %v1239_v9 = vld [vmem:[#allocation3 + $0x20] sm:$0xff] }
 0x7c9   :  { %v1157_v14 = vpop.f32.mrb[18].mxu1 }
 0x7ca   :  { %1198 = vrot.lane.b32.xlu1 %v1155_v12, %s2587_s15  ;;  %v2321_v7 = vpop.f32.mrb[19].mxu1  ;;  %v1190_v26 = vadd.f32 %v1155_v12, %v1071_v35  ;;  %2507 = vpow2.f32 %v2145_v16 }
 0x7cc   :  { %v2146_v27 = vmul.f32 -1.442695, %v1190_v26 }
 0x7ce   :  { %2509 = vpow2.f32 %v2146_v27 }
 0x7d4   :  { %v2508_v32 = vpop.eup %2507 }
 0x7d5   :  { %v1164_v8 = vadd.f32 1.0, %v2508_v32 }
 0x7d7   :  { %2511 = vrcp.f32 %v1164_v8 }
 0x7d8   :  { %v2510_v21 = vpop.eup %2509 }
 0x7d9   :  { %v1194_v13 = vadd.f32 1.0, %v2510_v21 }
 0x7db   :  { %2513 = vrcp.f32 %v1194_v13 }
 0x7e1   :  { %v2512_v33 = vpop.eup %2511 }
 0x7e2   :  { %v1178_v1 = vsub.f32 1.0, %v2512_v33 }
 0x7e5   :  { %v2514_v20 = vpop.eup %2513 }
 0x7e6   :  { %v1208_v29 = vsub.f32 1.0, %v2514_v20 }
 0x838   :  { %v1169_v34 = vpop.permute.xlu0 %1168 }
 0x839   :  { %v1171_v55 = vmul.f32 %v2512_v33, %v1169_v34 }
 0x83b   :  { %1173 = vrot.lane.b32.xlu0 %v1171_v55, %s2587_s15 }
 0x83c   :  { %v1199_v47 = vpop.permute.xlu1 %1198 }
 0x83d   :  { %v1201_v38 = vmul.f32 %v2514_v20, %v1199_v47 }
 0x83f   :  { %1203 = vrot.lane.b32.xlu1 %v1201_v38, %s2587_s15 }
 0x843   :  { %1185 = vrot.lane.b32.xlu1 %v1066_v3, %s2588_s16 }
 0x847   :  { %1215 = vrot.lane.b32.xlu1 %v1067_v23, %s2588_s16 }
 0x8ad   :  { %v1174_v39 = vpop.permute.xlu0 %1173 }
 0x8ae   :  { %v1176_v40 = vadd.f32 %v1174_v39, %v1069_v15 }
 0x8b0   :  { %2515 = vtanh.f32 %v1176_v40 }
 0x8b1   :  { %v1204_v43 = vpop.permute.xlu1 %1203 }
 0x8b2   :  { %v1206_v24 = vadd.f32 %v1204_v43, %v1071_v35 }
 0x8b4   :  { %2517 = vtanh.f32 %v1206_v24 }
 0x8b5   :  { %v1186_v48 = vpop.permute.xlu1 %1185 }
 0x8b6   :  { %v1188_v0 = vmul.f32 %v2512_v33, %v1186_v48 }
 0x8b9   :  { %v1216_v28 = vpop.permute.xlu1 %1215 }
 0x8ba   :  { %v2516_v30 = vpop.eup %2515  ;;  %v1218_v53 = vmul.f32 %v2514_v20, %v1216_v28 }
 0x8bb   :  { %1180 = vrot.lane.b32.xlu0 %v2516_v30, %s2589_s17 }
 0x8be   :  { %v2518_v46 = vpop.eup %2517 }
 0x8bf   :  { %1210 = vrot.lane.b32.xlu0 %v2518_v46, %s2589_s17 }
 0x92d   :  { %v1181_v51 = vpop.permute.xlu0 %1180 }
 0x92e   :  { %v1183_v52 = vmul.f32 %v1181_v51, %v1178_v1 }
 0x930   :  { %v1189_v25 = vadd.f32 %v1188_v0, %v1183_v52 }
 0x931   :  { %v1211_v10 = vpop.permute.xlu0 %1210 }
 0x932   :  { %v1213_v56 = vmul.f32 %v1211_v10, %v1208_v29  ;;  %1221 = vrot.lane.b32.xlu0 %v1189_v25, %s2589_s17 }
 0x934   :  { %v1219_v57 = vadd.f32 %v1218_v53, %v1213_v56 }
 0x936   :  { %1226 = vrot.lane.b32.xlu1 %v1219_v57, %s2589_s17 }
 0x9a4   :  { %v1222_v59 = vpop.permute.xlu0 %1221 }
 0x9a5   :  { %1224 = vst.msk [vmem:[#allocation4] sm:$0xff] %vm84_vm1, %v1222_v59  ;;  %2147 = vst.msk [vmem:[%s3380_s12 + $0x10] sm:$0xff] %vm84_vm1, %v1222_v59 }
 0x9a8   :  { %v1227_v60 = vpop.permute.xlu1 %1226 }
 0x9a9   :  { %1229 = vst.msk [vmem:[#allocation4 + $0x8] sm:$0xff] %vm84_vm1, %v1227_v60  ;;  %2148 = vst.msk [vmem:[%s3381_s13 + $0x28] sm:$0xff] %vm84_vm1, %v1227_v60 }
 0x9ac   :  { %v1234_v31 = vld [vmem:[#allocation4] sm:$0xff] }
 0x9ad   :  { %v1240_v61 = vpack.c.bf16 %v1234_v31, %v1234_v31 }
 0x9af   :  { %2327 = vmatmul.mubr.msk.bf16.vlgmr.msra.gmra.mrb[20].mxu0 %vm84_vm1, %v1240_v61 }
 0x9b0   :  { %v1235_v11 = vld [vmem:[#allocation4 + $0x8] sm:$0xff]  ;;  %2339 = vmatpush3.bf16.msra.mxu0 %v2985_v42  ;;  %2342 = vmatprep.mubr.msk.bf16.mxu0 %vm2586_vm2, %v2585_v62 }
 0x9b1   :  { %v1284_v19 = vpack.c.bf16 %v1235_v11, %v1235_v11  ;;  %2340 = vmatprep.subr.bf16.mxu0 %v2585_v62 }
 0x9b3   :  { %2335 = vmatmul.mubr.msk.bf16.vlgmr.msra.gmra.mrb[20].mxu1 %vm84_vm1, %v1284_v19 }
 0x9b4   :  { %2341 = vmatpush3.bf16.msra.mxu0 %v3000_v17  ;;  %2347 = vmatpush3.bf16.msra.mxu1 %v2994_v2 }
 0x9b5   :  { %2348 = vmatprep.subr.bf16.mxu1 %v2585_v62  ;;  %2350 = vmatprep.mubr.msk.bf16.mxu1 %vm2586_vm2, %v2585_v62 }
 0x9b6   :  { %2354 = vmatprep.subr.bf16.mxu0 %v2585_v62 }
 0x9b8   :  { %2349 = vmatpush3.bf16.msra.mxu1 %v3010_v54 }
 0x9b9   :  { %2362 = vmatprep.subr.bf16.mxu1 %v2585_v62 }
 0xa82   :  { %v1278_v44 = vpop.f32.mrb[20].mxu0 }
 0xa83   :  { %v1279_v63 = vadd.f32 %v1278_v44, %v3071_v45  ;;  %v2328_v50 = vpop.f32.mrb[21].mxu0  ;;  %v1405_v44 = vld [vmem:[#allocation2 + $0x20] sm:$0xff] }
 0xa84   :  { %v1281_v3 = vpop.f32.mrb[22].mxu0 }
 0xa85   :  { %1336 = vrot.lane.b32.xlu0 %v1279_v63, %s2587_s15  ;;  %v2329_v37 = vpop.f32.mrb[23].mxu0  ;;  %v1328_v6 = vadd.f32 %v1279_v63, %v1237_v36  ;;  %v1407_v63 = vld [vmem:[#allocation3 + $0x18] sm:$0xff] }
 0xa86   :  { %v1322_v23 = vpop.f32.mrb[20].mxu1 }
 0xa87   :  { %v1323_v41 = vadd.f32 %v1322_v23, %v3081_v22  ;;  %v2336_v4 = vpop.f32.mrb[21].mxu1  ;;  %v2151_v12 = vmul.f32 -1.442695, %v1328_v6 }
 0xa88   :  { %v1325_v49 = vpop.f32.mrb[22].mxu1 }
 0xa89   :  { %1366 = vrot.lane.b32.xlu1 %v1323_v41, %s2587_s15  ;;  %v2337_v58 = vpop.f32.mrb[23].mxu1  ;;  %v1358_v5 = vadd.f32 %v1323_v41, %v1239_v9  ;;  %2519 = vpow2.f32 %v2151_v12 }
 0xa8b   :  { %v2152_v14 = vmul.f32 -1.442695, %v1358_v5 }
 0xa8d   :  { %2521 = vpow2.f32 %v2152_v14 }
 0xa93   :  { %v2520_v7 = vpop.eup %2519 }
 0xa94   :  { %v1332_v15 = vadd.f32 1.0, %v2520_v7 }
 0xa96   :  { %2523 = vrcp.f32 %v1332_v15 }
 0xa97   :  { %v2522_v18 = vpop.eup %2521 }
 0xa98   :  { %v1362_v35 = vadd.f32 1.0, %v2522_v18 }
 0xa9a   :  { %2525 = vrcp.f32 %v1362_v35 }
 0xaa0   :  { %v2524_v16 = vpop.eup %2523 }
 0xaa1   :  { %v1346_v39 = vsub.f32 1.0, %v2524_v16 }
 0xaa4   :  { %v2526_v32 = vpop.eup %2525 }
 0xaa5   :  { %v1376_v48 = vsub.f32 1.0, %v2526_v32 }
 0xaf7   :  { %v1337_v26 = vpop.permute.xlu0 %1336 }
 0xaf8   :  { %v1339_v27 = vmul.f32 %v2524_v16, %v1337_v26 }
 0xafa   :  { %1341 = vrot.lane.b32.xlu0 %v1339_v27, %s2587_s15 }
 0xafb   :  { %v1367_v8 = vpop.permute.xlu1 %1366 }
 0xafc   :  { %v1369_v21 = vmul.f32 %v2526_v32, %v1367_v8 }
 0xafe   :  { %1371 = vrot.lane.b32.xlu1 %v1369_v21, %s2587_s15 }
 0xb02   :  { %1353 = vrot.lane.b32.xlu1 %v1234_v31, %s2588_s16 }
 0xb06   :  { %1383 = vrot.lane.b32.xlu1 %v1235_v11, %s2588_s16 }
 0xb6c   :  { %v1342_v13 = vpop.permute.xlu0 %1341 }
 0xb6d   :  { %v1344_v33 = vadd.f32 %v1342_v13, %v1237_v36 }
 0xb6f   :  { %2527 = vtanh.f32 %v1344_v33 }
 0xb70   :  { %v1372_v34 = vpop.permute.xlu1 %1371 }
 0xb71   :  { %v1374_v55 = vadd.f32 %v1372_v34, %v1239_v9 }
 0xb73   :  { %2529 = vtanh.f32 %v1374_v55 }
 0xb74   :  { %v1354_v38 = vpop.permute.xlu1 %1353 }
 0xb75   :  { %v1356_v43 = vmul.f32 %v2524_v16, %v1354_v38 }
 0xb78   :  { %v1384_v30 = vpop.permute.xlu1 %1383 }
 0xb79   :  { %v2528_v20 = vpop.eup %2527  ;;  %v1386_v51 = vmul.f32 %v2526_v32, %v1384_v30 }
 0xb7a   :  { %1348 = vrot.lane.b32.xlu0 %v2528_v20, %s2589_s17 }
 0xb7d   :  { %v2530_v47 = vpop.eup %2529 }
 0xb7e   :  { %1378 = vrot.lane.b32.xlu0 %v2530_v47, %s2589_s17 }
 0xbec   :  { %v1349_v40 = vpop.permute.xlu0 %1348 }
 0xbed   :  { %v1351_v24 = vmul.f32 %v1349_v40, %v1346_v39 }
 0xbef   :  { %v1357_v46 = vadd.f32 %v1356_v43, %v1351_v24 }
 0xbf0   :  { %v1379_v1 = vpop.permute.xlu0 %1378 }
 0xbf1   :  { %v1381_v0 = vmul.f32 %v1379_v1, %v1376_v48  ;;  %1389 = vrot.lane.b32.xlu0 %v1357_v46, %s2589_s17  ;;  %v3254_v46 = vld [vmem:[%s3372_s8] sm:$0xff]   ;;  %v3264_v1 = vld [vmem:[%s3372_s8 + $0x8] sm:$0xff]  }
 0xbf3   :  { %v1387_v52 = vadd.f32 %v1386_v51, %v1381_v0  ;;  %v3270_v51 = vld [vmem:[%s3373_s9] sm:$0xff]   ;;  %v3280_v0 = vld [vmem:[%s3373_s9 + $0x8] sm:$0xff]  }
 0xbf5   :  { %1394 = vrot.lane.b32.xlu1 %v1387_v52, %s2589_s17 }
 0xc63   :  { %v1390_v28 = vpop.permute.xlu0 %1389 }
 0xc64   :  { %1392 = vst.msk [vmem:[#allocation4] sm:$0xff] %vm84_vm1, %v1390_v28  ;;  %2153 = vst.msk [vmem:[%s3380_s12 + $0x18] sm:$0xff] %vm84_vm1, %v1390_v28 }
 0xc67   :  { %v1395_v25 = vpop.permute.xlu1 %1394 }
 0xc68   :  { %1397 = vst.msk [vmem:[#allocation4 + $0x8] sm:$0xff] %vm84_vm1, %v1395_v25  ;;  %2154 = vst.msk [vmem:[%s3381_s13 + $0x20] sm:$0xff] %vm84_vm1, %v1395_v25 }
 0xc6b   :  { %v1402_v29 = vld [vmem:[#allocation4] sm:$0xff] }
 0xc6c   :  { %v1408_v10 = vpack.c.bf16 %v1402_v29, %v1402_v29 }
 0xc6e   :  { %2343 = vmatmul.mubr.msk.bf16.vlgmr.msra.gmra.mrb[24].mxu0 %vm84_vm1, %v1408_v10 }
 0xc6f   :  { %v1403_v53 = vld [vmem:[#allocation4 + $0x8] sm:$0xff]  ;;  %2355 = vmatpush3.bf16.msra.mxu0 %v2985_v42  ;;  %2358 = vmatprep.mubr.msk.bf16.mxu0 %vm2586_vm2, %v2585_v62 }
 0xc70   :  { %v1452_v56 = vpack.c.bf16 %v1403_v53, %v1403_v53  ;;  %2356 = vmatprep.subr.bf16.mxu0 %v2585_v62 }
 0xc72   :  { %2351 = vmatmul.mubr.msk.bf16.vlgmr.msra.gmra.mrb[24].mxu1 %vm84_vm1, %v1452_v56 }
 0xc73   :  { %2357 = vmatpush3.bf16.msra.mxu0 %v3000_v17  ;;  %2363 = vmatpush3.bf16.msra.mxu1 %v2994_v2 }
 0xc74   :  { %2364 = vmatprep.subr.bf16.mxu1 %v2585_v62  ;;  %2366 = vmatprep.mubr.msk.bf16.mxu1 %vm2586_vm2, %v2585_v62 }
 0xc75   :  { %2370 = vmatprep.subr.bf16.mxu0 %v2585_v62 }
 0xc77   :  { %2365 = vmatpush3.bf16.msra.mxu1 %v3010_v54 }
 0xc78   :  { %2378 = vmatprep.subr.bf16.mxu1 %v2585_v62 }
 0xd41   :  { %v1446_v42 = vpop.f32.mrb[24].mxu0 }
 0xd42   :  { %v1447_v57 = vadd.f32 %v1446_v42, %v3071_v45  ;;  %v2344_v59 = vpop.f32.mrb[25].mxu0 }
 0xd43   :  { %v1449_v60 = vpop.f32.mrb[26].mxu0 }
 0xd44   :  { %1504 = vrot.lane.b32.xlu0 %v1447_v57, %s2587_s15  ;;  %v2345_v17 = vpop.f32.mrb[27].mxu0  ;;  %v1496_v54 = vadd.f32 %v1447_v57, %v1405_v44  ;;  %v1573_v60 = vld [vmem:[#allocation2 + $0x28] sm:$0xff] }
 0xd45   :  { %v1490_v2 = vpop.f32.mrb[24].mxu1 }
 0xd46   :  { %v1491_v31 = vadd.f32 %v1490_v2, %v3081_v22  ;;  %v2352_v61 = vpop.f32.mrb[25].mxu1  ;;  %v2157_v50 = vmul.f32 -1.442695, %v1496_v54  ;;  %v1575_v2 = vld [vmem:[#allocation3 + $0x10] sm:$0xff] }
 0xd47   :  { %v1493_v11 = vpop.f32.mrb[26].mxu1 }
 0xd48   :  { %1534 = vrot.lane.b32.xlu1 %v1491_v31, %s2587_s15  ;;  %v2353_v19 = vpop.f32.mrb[27].mxu1  ;;  %v1526_v3 = vadd.f32 %v1491_v31, %v1407_v63  ;;  %2531 = vpow2.f32 %v2157_v50 }
 0xd4a   :  { %v2158_v37 = vmul.f32 -1.442695, %v1526_v3 }
 0xd4c   :  { %2533 = vpow2.f32 %v2158_v37 }
 0xd52   :  { %v2532_v23 = vpop.eup %2531 }
 0xd53   :  { %v1500_v41 = vadd.f32 1.0, %v2532_v23 }
 0xd55   :  { %2535 = vrcp.f32 %v1500_v41 }
 0xd56   :  { %v2534_v4 = vpop.eup %2533 }
 0xd57   :  { %v1530_v49 = vadd.f32 1.0, %v2534_v4 }
 0xd59   :  { %2537 = vrcp.f32 %v1530_v49 }
 0xd5f   :  { %v2536_v58 = vpop.eup %2535 }
 0xd60   :  { %v1514_v27 = vsub.f32 1.0, %v2536_v58 }
 0xd63   :  { %v2538_v9 = vpop.eup %2537 }
 0xd64   :  { %v1544_v34 = vsub.f32 1.0, %v2538_v9 }
 0xdb6   :  { %v1505_v36 = vpop.permute.xlu0 %1504 }
 0xdb7   :  { %v1507_v6 = vmul.f32 %v2536_v58, %v1505_v36 }
 0xdb9   :  { %1509 = vrot.lane.b32.xlu0 %v1507_v6, %s2587_s15 }
 0xdba   :  { %v1535_v12 = vpop.permute.xlu1 %1534 }
 0xdbb   :  { %v1537_v5 = vmul.f32 %v2538_v9, %v1535_v12 }
 0xdbd   :  { %1539 = vrot.lane.b32.xlu1 %v1537_v5, %s2587_s15 }
 0xdc1   :  { %1521 = vrot.lane.b32.xlu1 %v1402_v29, %s2588_s16 }
 0xdc5   :  { %1551 = vrot.lane.b32.xlu1 %v1403_v53, %s2588_s16 }
 0xe2b   :  { %v1510_v14 = vpop.permute.xlu0 %1509 }
 0xe2c   :  { %v1512_v7 = vadd.f32 %v1510_v14, %v1405_v44 }
 0xe2e   :  { %2539 = vtanh.f32 %v1512_v7 }
 0xe2f   :  { %v1540_v15 = vpop.permute.xlu1 %1539 }
 0xe30   :  { %v1542_v18 = vadd.f32 %v1540_v15, %v1407_v63 }
 0xe32   :  { %2541 = vtanh.f32 %v1542_v18 }
 0xe33   :  { %v1522_v26 = vpop.permute.xlu1 %1521 }
 0xe34   :  { %v1524_v8 = vmul.f32 %v2536_v58, %v1522_v26 }
 0xe37   :  { %v1552_v13 = vpop.permute.xlu1 %1551 }
 0xe38   :  { %v2540_v35 = vpop.eup %2539  ;;  %v1554_v20 = vmul.f32 %v2538_v9, %v1552_v13 }
 0xe39   :  { %1516 = vrot.lane.b32.xlu0 %v2540_v35, %s2589_s17 }
 0xe3c   :  { %v2542_v16 = vpop.eup %2541 }
 0xe3d   :  { %1546 = vrot.lane.b32.xlu0 %v2542_v16, %s2589_s17 }
 0xeab   :  { %v1517_v32 = vpop.permute.xlu0 %1516 }
 0xeac   :  { %v1519_v21 = vmul.f32 %v1517_v32, %v1514_v27 }
 0xeae   :  { %v1525_v33 = vadd.f32 %v1524_v8, %v1519_v21 }
 0xeaf   :  { %v1547_v55 = vpop.permute.xlu0 %1546 }
 0xeb0   :  { %v1549_v47 = vmul.f32 %v1547_v55, %v1544_v34  ;;  %1557 = vrot.lane.b32.xlu0 %v1525_v33, %s2589_s17 }
 0xeb2   :  { %v1555_v38 = vadd.f32 %v1554_v20, %v1549_v47 }
 0xeb4   :  { %1562 = vrot.lane.b32.xlu1 %v1555_v38, %s2589_s17 }
 0xf22   :  { %v1558_v39 = vpop.permute.xlu0 %1557 }
 0xf23   :  { %1560 = vst.msk [vmem:[#allocation4] sm:$0xff] %vm84_vm1, %v1558_v39  ;;  %2159 = vst.msk [vmem:[%s3380_s12 + $0x20] sm:$0xff] %vm84_vm1, %v1558_v39 }
 0xf26   :  { %v1563_v40 = vpop.permute.xlu1 %1562 }
 0xf27   :  { %1565 = vst.msk [vmem:[#allocation4 + $0x8] sm:$0xff] %vm84_vm1, %v1563_v40  ;;  %2160 = vst.msk [vmem:[%s3381_s13 + $0x18] sm:$0xff] %vm84_vm1, %v1563_v40 }
 0xf2a   :  { %v1570_v43 = vld [vmem:[#allocation4] sm:$0xff] }
 0xf2b   :  { %v1576_v24 = vpack.c.bf16 %v1570_v43, %v1570_v43 }
 0xf2d   :  { %2359 = vmatmul.mubr.msk.bf16.vlgmr.msra.gmra.mrb[28].mxu0 %vm84_vm1, %v1576_v24 }
 0xf2e   :  { %v1571_v30 = vld [vmem:[#allocation4 + $0x8] sm:$0xff]  ;;  %2371 = vmatpush3.bf16.msra.mxu0 %v3254_v46  ;;  %2374 = vmatprep.mubr.msk.bf16.mxu0 %vm2586_vm2, %v2585_v62 }
 0xf2f   :  { %v1620_v48 = vpack.c.bf16 %v1571_v30, %v1571_v30  ;;  %2372 = vmatprep.subr.bf16.mxu0 %v2585_v62 }
 0xf31   :  { %2367 = vmatmul.mubr.msk.bf16.vlgmr.msra.gmra.mrb[28].mxu1 %vm84_vm1, %v1620_v48 }
 0xf32   :  { %2373 = vmatpush3.bf16.msra.mxu0 %v3264_v1  ;;  %2379 = vmatpush3.bf16.msra.mxu1 %v3270_v51 }
 0xf33   :  { %2380 = vmatprep.subr.bf16.mxu1 %v2585_v62  ;;  %2382 = vmatprep.mubr.msk.bf16.mxu1 %vm2586_vm2, %v2585_v62 }
 0xf34   :  { %2386 = vmatprep.subr.bf16.mxu0 %v2585_v62 }
 0xf36   :  { %2381 = vmatpush3.bf16.msra.mxu1 %v3280_v0 }
 0xf37   :  { %2394 = vmatprep.subr.bf16.mxu1 %v2585_v62 }
0x1000   :  { %v1614_v52 = vpop.f32.mrb[28].mxu0 }
0x1001   :  { %v1615_v28 = vadd.f32 %v1614_v52, %v3071_v45  ;;  %v2360_v25 = vpop.f32.mrb[29].mxu0  ;;  %v1741_v52 = vld [vmem:[#allocation2 + $0x30] sm:$0xff] }
0x1002   :  { %v1617_v29 = vpop.f32.mrb[30].mxu0 }
0x1003   :  { %1672 = vrot.lane.b32.xlu0 %v1615_v28, %s2587_s15  ;;  %v2361_v10 = vpop.f32.mrb[31].mxu0  ;;  %v1664_v17 = vadd.f32 %v1615_v28, %v1573_v60  ;;  %v1743_v28 = vld [vmem:[#allocation3 + $0x8] sm:$0xff] }
0x1004   :  { %v1658_v53 = vpop.f32.mrb[28].mxu1 }
0x1005   :  { %v1659_v56 = vadd.f32 %v1658_v53, %v3081_v22  ;;  %v2368_v42 = vpop.f32.mrb[29].mxu1  ;;  %v2163_v31 = vmul.f32 -1.442695, %v1664_v17 }
0x1006   :  { %v1661_v57 = vpop.f32.mrb[30].mxu1 }
0x1007   :  { %1702 = vrot.lane.b32.xlu1 %v1659_v56, %s2587_s15  ;;  %v2369_v59 = vpop.f32.mrb[31].mxu1  ;;  %v1694_v61 = vadd.f32 %v1659_v56, %v1575_v2  ;;  %2543 = vpow2.f32 %v2163_v31 }
0x1009   :  { %v2164_v11 = vmul.f32 -1.442695, %v1694_v61 }
0x100b   :  { %2545 = vpow2.f32 %v2164_v11 }
0x1011   :  { %v2544_v19 = vpop.eup %2543 }
0x1012   :  { %v1668_v44 = vadd.f32 1.0, %v2544_v19 }
0x1014   :  { %2547 = vrcp.f32 %v1668_v44 }
0x1015   :  { %v2546_v54 = vpop.eup %2545 }
0x1016   :  { %v1698_v63 = vadd.f32 1.0, %v2546_v54 }
0x1018   :  { %2549 = vrcp.f32 %v1698_v63 }
0x101e   :  { %v2548_v50 = vpop.eup %2547 }
0x101f   :  { %v1682_v14 = vsub.f32 1.0, %v2548_v50 }
0x1022   :  { %v2550_v23 = vpop.eup %2549 }
0x1023   :  { %v1712_v26 = vsub.f32 1.0, %v2550_v23 }
0x1075   :  { %v1673_v3 = vpop.permute.xlu0 %1672 }
0x1076   :  { %v1675_v37 = vmul.f32 %v2548_v50, %v1673_v3 }
0x1078   :  { %1677 = vrot.lane.b32.xlu0 %v1675_v37, %s2587_s15 }
0x1079   :  { %v1703_v41 = vpop.permute.xlu1 %1702 }
0x107a   :  { %v1705_v4 = vmul.f32 %v2550_v23, %v1703_v41 }
0x107c   :  { %1707 = vrot.lane.b32.xlu1 %v1705_v4, %s2587_s15 }
0x1080   :  { %1689 = vrot.lane.b32.xlu1 %v1570_v43, %s2588_s16 }
0x1084   :  { %1719 = vrot.lane.b32.xlu1 %v1571_v30, %s2588_s16 }
0x10ea   :  { %v1678_v49 = vpop.permute.xlu0 %1677 }
0x10eb   :  { %v1680_v58 = vadd.f32 %v1678_v49, %v1573_v60 }
0x10ed   :  { %2551 = vtanh.f32 %v1680_v58 }
0x10ee   :  { %v1708_v36 = vpop.permute.xlu1 %1707 }
0x10ef   :  { %v1710_v6 = vadd.f32 %v1708_v36, %v1575_v2 }
0x10f1   :  { %2553 = vtanh.f32 %v1710_v6 }
0x10f2   :  { %v1690_v5 = vpop.permute.xlu1 %1689 }
0x10f3   :  { %v1692_v15 = vmul.f32 %v2548_v50, %v1690_v5 }
0x10f6   :  { %v1720_v35 = vpop.permute.xlu1 %1719 }
0x10f7   :  { %v2552_v9 = vpop.eup %2551  ;;  %v1722_v32 = vmul.f32 %v2550_v23, %v1720_v35  ;;  %v2583_v35 = vld [vmem:[%s3378_s10] sm:$0xff] }
0x10f8   :  { %1684 = vrot.lane.b32.xlu0 %v2552_v9, %s2589_s17 }
0x10fb   :  { %v2554_v12 = vpop.eup %2553 }
0x10fc   :  { %1714 = vrot.lane.b32.xlu0 %v2554_v12, %s2589_s17 }
0x116a   :  { %v1685_v7 = vpop.permute.xlu0 %1684 }
0x116b   :  { %v1687_v18 = vmul.f32 %v1685_v7, %v1682_v14 }
0x116d   :  { %v1693_v16 = vadd.f32 %v1692_v15, %v1687_v18 }
0x116e   :  { %v1715_v27 = vpop.permute.xlu0 %1714 }
0x116f   :  { %v1717_v8 = vmul.f32 %v1715_v27, %v1712_v26  ;;  %1725 = vrot.lane.b32.xlu0 %v1693_v16, %s2589_s17 }
0x1171   :  { %v1723_v21 = vadd.f32 %v1722_v32, %v1717_v8 }
0x1173   :  { %1730 = vrot.lane.b32.xlu1 %v1723_v21, %s2589_s17  ;;  %v2584_v21 = vld [vmem:[%s3379_s11] sm:$0xff] }
0x11e1   :  { %v1726_v13 = vpop.permute.xlu0 %1725 }
0x11e2   :  { %1728 = vst.msk [vmem:[#allocation4] sm:$0xff] %vm84_vm1, %v1726_v13  ;;  %2165 = vst.msk [vmem:[%s3380_s12 + $0x28] sm:$0xff] %vm84_vm1, %v1726_v13 }
0x11e5   :  { %v1731_v33 = vpop.permute.xlu1 %1730 }
0x11e6   :  { %1733 = vst.msk [vmem:[#allocation4 + $0x8] sm:$0xff] %vm84_vm1, %v1731_v33  ;;  %2166 = vst.msk [vmem:[%s3381_s13 + $0x10] sm:$0xff] %vm84_vm1, %v1731_v33 }
0x11e9   :  { %v1738_v34 = vld [vmem:[#allocation4] sm:$0xff] }
0x11ea   :  { %v1744_v55 = vpack.c.bf16 %v1738_v34, %v1738_v34 }
0x11ec   :  { %2375 = vmatmul.mubr.msk.bf16.vlgmr.msra.gmra.mrb[32].mxu0 %vm84_vm1, %v1744_v55 }
0x11ed   :  { %v1739_v20 = vld [vmem:[#allocation4 + $0x8] sm:$0xff]  ;;  %2387 = vmatpush3.bf16.msra.mxu0 %v3254_v46  ;;  %2390 = vmatprep.mubr.msk.bf16.mxu0 %vm2586_vm2, %v2585_v62 }
0x11ee   :  { %v1788_v47 = vpack.c.bf16 %v1739_v20, %v1739_v20  ;;  %2388 = vmatprep.subr.bf16.mxu0 %v2585_v62 }
0x11f0   :  { %2383 = vmatmul.mubr.msk.bf16.vlgmr.msra.gmra.mrb[32].mxu1 %vm84_vm1, %v1788_v47 }
0x11f1   :  { %2389 = vmatpush3.bf16.msra.mxu0 %v3264_v1  ;;  %2395 = vmatpush3.bf16.msra.mxu1 %v3270_v51 }
0x11f2   :  { %2396 = vmatprep.subr.bf16.mxu1 %v2585_v62  ;;  %2398 = vmatprep.mubr.msk.bf16.mxu1 %vm2586_vm2, %v2585_v62 }
0x11f5   :  { %2397 = vmatpush3.bf16.msra.mxu1 %v3280_v0 }
0x12bf   :  { %v1782_v38 = vpop.f32.mrb[32].mxu0 }
0x12c0   :  { %v1783_v39 = vadd.f32 %v1782_v38, %v3071_v45  ;;  %v2376_v40 = vpop.f32.mrb[33].mxu0  ;;  %v1910_v38 = vld [vmem:[#allocation3] sm:$0xff] }
0x12c1   :  { %v1785_v43 = vpop.f32.mrb[34].mxu0 }
0x12c2   :  { %1840 = vrot.lane.b32.xlu0 %v1783_v39, %s2587_s15  ;;  %v2377_v24 = vpop.f32.mrb[35].mxu0  ;;  %v1832_v62 = vadd.f32 %v1783_v39, %v1741_v52 }
0x12c3   :  { %v1826_v30 = vpop.f32.mrb[32].mxu1 }
0x12c4   :  { %v1827_v46 = vadd.f32 %v1826_v30, %v3081_v22  ;;  %v2384_v48 = vpop.f32.mrb[33].mxu1  ;;  %v2169_v0 = vmul.f32 -1.442695, %v1832_v62 }
0x12c5   :  { %v1829_v1 = vpop.f32.mrb[34].mxu1 }
0x12c6   :  { %1870 = vrot.lane.b32.xlu1 %v1827_v46, %s2587_s15  ;;  %v2385_v51 = vpop.f32.mrb[35].mxu1  ;;  %v1862_v25 = vadd.f32 %v1827_v46, %v1743_v28  ;;  %2555 = vpow2.f32 %v2169_v0 }
0x12c8   :  { %v2170_v45 = vmul.f32 -1.442695, %v1862_v25 }
0x12ca   :  { %2557 = vpow2.f32 %v2170_v45 }
0x12d0   :  { %v2556_v29 = vpop.eup %2555 }
0x12d1   :  { %v1836_v10 = vadd.f32 1.0, %v2556_v29 }
0x12d3   :  { %2559 = vrcp.f32 %v1836_v10 }
0x12d4   :  { %v2558_v53 = vpop.eup %2557 }
0x12d5   :  { %v1866_v56 = vadd.f32 1.0, %v2558_v53 }
0x12d7   :  { %2561 = vrcp.f32 %v1866_v56 }
0x12dd   :  { %v2560_v22 = vpop.eup %2559 }
0x12de   :  { %v1850_v63 = vsub.f32 1.0, %v2560_v22 }
0x12e1   :  { %v2562_v59 = vpop.eup %2561 }
0x12e2   :  { %v1880_v4 = vsub.f32 1.0, %v2562_v59 }
0x1334   :  { %v1841_v42 = vpop.permute.xlu0 %1840 }
0x1335   :  { %v1843_v57 = vmul.f32 %v2560_v22, %v1841_v42 }
0x1337   :  { %1845 = vrot.lane.b32.xlu0 %v1843_v57, %s2587_s15 }
0x1338   :  { %v1871_v60 = vpop.permute.xlu1 %1870 }
0x1339   :  { %v1873_v17 = vmul.f32 %v2562_v59, %v1871_v60 }
0x133b   :  { %1875 = vrot.lane.b32.xlu1 %v1873_v17, %s2587_s15 }
0x133f   :  { %1857 = vrot.lane.b32.xlu1 %v1738_v34, %s2588_s16 }
0x1343   :  { %1887 = vrot.lane.b32.xlu1 %v1739_v20, %s2588_s16  ;;  %v1909_v20 = vld [vmem:[#allocation2 + $0x38] sm:$0xff] }
0x13a9   :  { %v1846_v2 = vpop.permute.xlu0 %1845 }
0x13aa   :  { %v1848_v31 = vadd.f32 %v1846_v2, %v1741_v52 }
0x13ac   :  { %2563 = vtanh.f32 %v1848_v31 }
0x13ad   :  { %v1876_v61 = vpop.permute.xlu1 %1875 }
0x13ae   :  { %v1878_v11 = vadd.f32 %v1876_v61, %v1743_v28 }
0x13b0   :  { %2565 = vtanh.f32 %v1878_v11 }
0x13b1   :  { %v1858_v54 = vpop.permute.xlu1 %1857 }
0x13b2   :  { %v1860_v3 = vmul.f32 %v2560_v22, %v1858_v54 }
0x13b5   :  { %v1888_v23 = vpop.permute.xlu1 %1887 }
0x13b6   :  { %v2564_v19 = vpop.eup %2563  ;;  %v1890_v58 = vmul.f32 %v2562_v59, %v1888_v23 }
0x13b7   :  { %1852 = vrot.lane.b32.xlu0 %v2564_v19, %s2589_s17 }
0x13ba   :  { %v2566_v44 = vpop.eup %2565 }
0x13bb   :  { %1882 = vrot.lane.b32.xlu0 %v2566_v44, %s2589_s17 }
0x1429   :  { %v1853_v50 = vpop.permute.xlu0 %1852 }
0x142a   :  { %v1855_v37 = vmul.f32 %v1853_v50, %v1850_v63 }
0x142c   :  { %v1861_v41 = vadd.f32 %v1860_v3, %v1855_v37 }
0x142d   :  { %v1883_v49 = vpop.permute.xlu0 %1882 }
0x142e   :  { %v1885_v36 = vmul.f32 %v1883_v49, %v1880_v4  ;;  %1893 = vrot.lane.b32.xlu0 %v1861_v41, %s2589_s17 }
0x1430   :  { %v1891_v6 = vadd.f32 %v1890_v58, %v1885_v36 }
0x1432   :  { %1898 = vrot.lane.b32.xlu1 %v1891_v6, %s2589_s17 }
0x14a0   :  { %v1894_v9 = vpop.permute.xlu0 %1893 }
0x14a1   :  { %1896 = vst.msk [vmem:[#allocation4] sm:$0xff] %vm84_vm1, %v1894_v9  ;;  %2171 = vst.msk [vmem:[%s3380_s12 + $0x30] sm:$0xff] %vm84_vm1, %v1894_v9 }
0x14a4   :  { %v1899_v12 = vpop.permute.xlu1 %1898 }
0x14a5   :  { %1901 = vst.msk [vmem:[#allocation4 + $0x8] sm:$0xff] %vm84_vm1, %v1899_v12  ;;  %2172 = vst.msk [vmem:[%s3381_s13 + $0x8] sm:$0xff] %vm84_vm1, %v1899_v12 }
0x14a8   :  { %v1906_v5 = vld [vmem:[#allocation4] sm:$0xff] }
0x14a9   :  { %v1911_v14 = vpack.c.bf16 %v1906_v5, %v1906_v5 }
0x14ab   :  { %2391 = vmatmul.mubr.msk.bf16.vlgmr.msra.gmra.mrb[36].mxu0 %vm84_vm1, %v1911_v14 }
0x14ac   :  { %v1907_v7 = vld [vmem:[#allocation4 + $0x8] sm:$0xff] }
0x14ad   :  { %v1955_v15 = vpack.c.bf16 %v1907_v7, %v1907_v7 }
0x14af   :  { %2399 = vmatmul.mubr.msk.bf16.vlgmr.msra.gmra.mrb[36].mxu1 %vm84_vm1, %v1955_v15 }
0x157e   :  { %v1949_v18 = vpop.f32.mrb[36].mxu0 }
0x157f   :  { %v1950_v16 = vadd.f32 %v2583_v35, %v1949_v18  ;;  %v2392_v26 = vpop.f32.mrb[37].mxu0 }
0x1580   :  { %v1952_v27 = vpop.f32.mrb[38].mxu0 }
0x1581   :  { %2007 = vrot.lane.b32.xlu0 %v1950_v16, %s2587_s15  ;;  %v2393_v32 = vpop.f32.mrb[39].mxu0  ;;  %v1999_v47 = vadd.f32 %v1950_v16, %v1909_v20 }
0x1582   :  { %v1993_v8 = vpop.f32.mrb[36].mxu1 }
0x1583   :  { %v1994_v13 = vadd.f32 %v2584_v21, %v1993_v8  ;;  %v2400_v33 = vpop.f32.mrb[37].mxu1  ;;  %v2175_v39 = vmul.f32 -1.442695, %v1999_v47 }
0x1584   :  { %v1996_v34 = vpop.f32.mrb[38].mxu1 }
0x1585   :  { %2037 = vrot.lane.b32.xlu1 %v1994_v13, %s2587_s15  ;;  %v2401_v55 = vpop.f32.mrb[39].mxu1  ;;  %v2029_v40 = vadd.f32 %v1994_v13, %v1910_v38  ;;  %2567 = vpow2.f32 %v2175_v39 }
0x1587   :  { %v2176_v43 = vmul.f32 -1.442695, %v2029_v40 }
0x1589   :  { %2569 = vpow2.f32 %v2176_v43 }
0x158f   :  { %v2568_v24 = vpop.eup %2567 }
0x1590   :  { %v2003_v30 = vadd.f32 1.0, %v2568_v24 }
0x1592   :  { %2571 = vrcp.f32 %v2003_v30 }
0x1593   :  { %v2570_v46 = vpop.eup %2569 }
0x1594   :  { %v2033_v48 = vadd.f32 1.0, %v2570_v46 }
0x1596   :  { %2573 = vrcp.f32 %v2033_v48 }
0x159c   :  { %v2572_v1 = vpop.eup %2571 }
0x159d   :  { %v2017_v42 = vsub.f32 1.0, %v2572_v1 }
0x15a0   :  { %v2574_v62 = vpop.eup %2573 }
0x15a1   :  { %v2047_v31 = vsub.f32 1.0, %v2574_v62 }
0x15f3   :  { %v2008_v51 = vpop.permute.xlu0 %2007 }
0x15f4   :  { %v2010_v52 = vmul.f32 %v2572_v1, %v2008_v51 }
0x15f6   :  { %2012 = vrot.lane.b32.xlu0 %v2010_v52, %s2587_s15 }
0x15f7   :  { %v2038_v28 = vpop.permute.xlu1 %2037 }
0x15f8   :  { %v2040_v0 = vmul.f32 %v2574_v62, %v2038_v28 }
0x15fa   :  { %2042 = vrot.lane.b32.xlu1 %v2040_v0, %s2587_s15 }
0x15fe   :  { %2024 = vrot.lane.b32.xlu1 %v1906_v5, %s2588_s16 }
0x1602   :  { %2054 = vrot.lane.b32.xlu1 %v1907_v7, %s2588_s16 }
0x1668   :  { %v2013_v25 = vpop.permute.xlu0 %2012 }
0x1669   :  { %v2015_v45 = vadd.f32 %v2013_v25, %v1909_v20 }
0x166b   :  { %2575 = vtanh.f32 %v2015_v45 }
0x166c   :  { %v2043_v29 = vpop.permute.xlu1 %2042 }
0x166d   :  { %v2045_v10 = vadd.f32 %v2043_v29, %v1910_v38 }
0x166f   :  { %2577 = vtanh.f32 %v2045_v10 }
0x1670   :  { %v2025_v22 = vpop.permute.xlu1 %2024 }
0x1671   :  { %v2027_v59 = vmul.f32 %v2572_v1, %v2025_v22 }
0x1674   :  { %v2055_v17 = vpop.permute.xlu1 %2054 }
0x1675   :  { %v2576_v53 = vpop.eup %2575  ;;  %v2057_v11 = vmul.f32 %v2574_v62, %v2055_v17 }
0x1676   :  { %2019 = vrot.lane.b32.xlu0 %v2576_v53, %s2589_s17 }
0x1679   :  { %v2578_v56 = vpop.eup %2577 }
0x167a   :  { %2049 = vrot.lane.b32.xlu0 %v2578_v56, %s2589_s17 }
0x16e8   :  { %v2020_v57 = vpop.permute.xlu0 %2019 }
0x16e9   :  { %v2022_v60 = vmul.f32 %v2020_v57, %v2017_v42 }
0x16eb   :  { %v2028_v2 = vadd.f32 %v2027_v59, %v2022_v60 }
0x16ec   :  { %v2050_v61 = vpop.permute.xlu0 %2049 }
0x16ed   :  { %v2052_v19 = vmul.f32 %v2050_v61, %v2047_v31  ;;  %2060 = vrot.lane.b32.xlu0 %v2028_v2, %s2589_s17 }
0x16ef   :  { %v2058_v44 = vadd.f32 %v2057_v11, %v2052_v19 }
0x16f1   :  { %2065 = vrot.lane.b32.xlu1 %v2058_v44, %s2589_s17 }
0x175f   :  { %v2061_v54 = vpop.permute.xlu0 %2060 }
0x1760   :  { %2063 = vst.msk [vmem:[#allocation4] sm:$0xff] %vm84_vm1, %v2061_v54  ;;  %2177 = vst.msk [vmem:[%s3380_s12 + $0x38] sm:$0xff] %vm84_vm1, %v2061_v54 }
0x1763   :  { %v2066_v63 = vpop.permute.xlu1 %2065 }
0x1764   :  { %2068 = vst.msk [vmem:[#allocation4 + $0x8] sm:$0xff] %vm84_vm1, %v2066_v63  ;;  %2071 = vst.msk [vmem:[%s3381_s13] sm:$0xff] %vm84_vm1, %v2066_v63 }

</bundles_post_ra>
